<compile_context>
chip_gen: v6e
topology: v6e:2x2x1
jax: 0.10.0
libtpu: 0.0.40
codegen_flags: <defaults>
</compile_context>

<pallas_src>
import jax
import jax.numpy as jnp
from jax.experimental import pallas as pl
from jax.experimental.pallas import tpu as pltpu

H1 = 4096   # hidden 1
H2 = 1024   # hidden 2
H3 = 128    # hidden 3
OUT = 8     # output params

NC = 2      # leading "parallel" grid axis: dual-TensorCore split on v7x
TH = 1024   # tile along the 4096 hidden axis (reduction grid axis)


# ---------------------------------------------------------------------------
# Kernel 1: big weight-streaming part.
#   partial[c] = sum_{k in core c's blocks} relu(x @ W1[:, blk] + b1[blk]) @ W2[blk, :]
# grid = (NC, NK), dims ("parallel", "arbitrary"); each c writes its own
# (B, H2) partial accumulator block, summed later in the epilogue kernel.
# ---------------------------------------------------------------------------
def _reduce_kernel(x_ref, w1_ref, b1_ref, w2_ref, p_ref, acc_ref):
    k = pl.program_id(1)

    @pl.when(k == 0)
    def _():
        acc_ref[...] = jnp.zeros_like(acc_ref)

    # Layer 1 partial: h1_blk = relu(x @ W1[:, blk] + b1[blk])   (bf16 MXU, f32 acc)
    h1 = jnp.dot(x_ref[...], w1_ref[...], preferred_element_type=jnp.float32)
    h1 = jnp.maximum(h1 + b1_ref[...], 0.0)

    # Layer 2 partial contraction: acc += h1_blk @ W2[blk, :]
    acc_ref[...] += jnp.dot(h1.astype(jnp.bfloat16), w2_ref[...],
                            preferred_element_type=jnp.float32)

    @pl.when(k == pl.num_programs(1) - 1)
    def _():
        p_ref[0] = acc_ref[...]


# ---------------------------------------------------------------------------
# Kernel 2: tiny epilogue (combine partials + small tail layers).
# ---------------------------------------------------------------------------
def _epilogue_kernel(p_ref, b2_ref, w3_ref, b3_ref, w4_ref, b4_ref, o_ref):
    h2 = jnp.sum(p_ref[...], axis=0) + b2_ref[...]                # [B, 1024]
    h2 = jnp.maximum(h2, 0.0)
    h3 = jnp.dot(h2, w3_ref[...], preferred_element_type=jnp.float32)
    h3 = jnp.maximum(h3 + b3_ref[...], 0.0)                       # [B, 128]
    h4 = jnp.dot(h3, w4_ref[...], preferred_element_type=jnp.float32)
    o_ref[...] = jax.nn.sigmoid(h4 + b4_ref[...]).astype(o_ref.dtype)


def camera_param_regressor_8(x_nchw, params):
    """x_nchw: [B, C, H, W] float32. Returns [B, 8] float32."""
    w1, b1, w2, b2, w3, b3, w4, b4 = params
    B = x_nchw.shape[0]
    D = w1.shape[0]

    # nn.Flatten; stream activations / big weights as bf16 (f32 accumulation).
    # (For production, pass w1/w2 pre-cast to bf16 to avoid the per-call cast.)
    x = x_nchw.reshape(B, D).astype(jnp.bfloat16)
    w1b = w1.astype(jnp.bfloat16)
    w2b = w2.astype(jnp.bfloat16)
    b1f = b1.astype(jnp.float32)

    assert H1 % (NC * TH) == 0
    NK = H1 // (NC * TH)   # reduction blocks per core

    flops1 = 2 * B * (D * H1 + H1 * H2)
    bytes1 = (B * D * 2) + (D * H1 * 2) + (H1 * 4) + (H1 * H2 * 2) + (NC * B * H2 * 4)

    partials = pl.pallas_call(
        _reduce_kernel,
        out_shape=jax.ShapeDtypeStruct((NC, B, H2), jnp.float32),
        grid_spec=pltpu.PrefetchScalarGridSpec(
            num_scalar_prefetch=0,
            grid=(NC, NK),
            in_specs=[
                pl.BlockSpec((B, D), lambda c, k: (0, 0)),              # x (bf16)
                pl.BlockSpec((D, TH), lambda c, k: (0, c * NK + k)),    # W1 col block (bf16)
                pl.BlockSpec((1, TH), lambda c, k: (0, c * NK + k)),    # b1 block
                pl.BlockSpec((TH, H2), lambda c, k: (c * NK + k, 0)),   # W2 row block (bf16)
            ],
            out_specs=pl.BlockSpec((1, B, H2), lambda c, k: (c, 0, 0)),
            scratch_shapes=[pltpu.VMEM((B, H2), jnp.float32)],
        ),
        compiler_params=pltpu.CompilerParams(
            dimension_semantics=("parallel", "arbitrary"),
            vmem_limit_bytes=48 << 20,   # v7x-safe (64 MiB == entire v7x VMEM)
        ),
        cost_estimate=pl.CostEstimate(
            flops=flops1, transcendentals=0, bytes_accessed=bytes1),
    )(x, w1b, b1f, w2b)

    flops2 = 2 * B * (H2 * H3 + H3 * OUT)
    bytes2 = (NC * B * H2 * 4) + (H2 * 4) + (H2 * H3 * 4) + (H3 * 4) \
             + (H3 * OUT * 4) + (OUT * 4) + (B * OUT * 4)

    out = pl.pallas_call(
        _epilogue_kernel,
        out_shape=jax.ShapeDtypeStruct((B, OUT), jnp.float32),
        cost_estimate=pl.CostEstimate(
            flops=flops2, transcendentals=B * OUT, bytes_accessed=bytes2),
    )(partials,
      b2.astype(jnp.float32), w3.astype(jnp.float32), b3.astype(jnp.float32),
      w4.astype(jnp.float32), b4.astype(jnp.float32))

    return out


def init_params(key, input_size):
    """Deterministic synthetic parameters (PyTorch-style uniform fan-in scaling)."""
    def linear(k, fan_in, fan_out):
        k1, k2 = jax.random.split(k)
        bound = 1.0 / jnp.sqrt(fan_in)
        w = jax.random.uniform(k1, (fan_in, fan_out), jnp.float32, -bound, bound)
        b = jax.random.uniform(k2, (1, fan_out), jnp.float32, -bound, bound)
        return w, b

    k1, k2, k3, k4 = jax.random.split(key, 4)
    w1, b1 = linear(k1, input_size, H1)
    w2, b2 = linear(k2, H1, H2)
    w3, b3 = linear(k3, H2, H3)
    w4, b4 = linear(k4, H3, OUT)
    return (w1, b1, w2, b2, w3, b3, w4, b4)


def reference_forward(x_nchw, params):
    """Pure-f32 reference matching the PyTorch module in eval mode."""
    w1, b1, w2, b2, w3, b3, w4, b4 = params
    x = x_nchw.reshape(x_nchw.shape[0], -1)
    h = jnp.maximum(x @ w1 + b1, 0.0)
    h = jnp.maximum(h @ w2 + b2, 0.0)
    h = jnp.maximum(h @ w3 + b3, 0.0)
    return jax.nn.sigmoid(h @ w4 + b4)


if __name__ == "__main__":
    key = jax.random.PRNGKey(0)
    kx, kp = jax.random.split(key)

    B, C, H, W = 2, 4, 16, 16          # input_size = C*H*W = 1024
    input_size = C * H * W

    x = jax.random.normal(kx, (B, C, H, W), jnp.float32)
    params = init_params(kp, input_size)

    out = camera_param_regressor_8(x, params)
    out = jax.block_until_ready(out)

    ref = reference_forward(x, params)
    assert out.shape == (B, OUT)
    # bf16 weight streaming -> relaxed tolerance vs. the pure-f32 reference.
    assert jnp.allclose(out, ref, atol=2e-2, rtol=2e-2)

    print("KERNEL_OK")
</pallas_src>

<mosaic_0001>
module attributes {stable_mosaic.version = 11 : i64} {
  func.func @_reduce_kernel(%arg0: i32, %arg1: i32, %arg2: memref<2x1024xbf16, #tpu.memory_space<vmem>>, %arg3: memref<1024x1024xbf16, #tpu.memory_space<vmem>>, %arg4: memref<1x1024xf32, #tpu.memory_space<vmem>>, %arg5: memref<1024x1024xbf16, #tpu.memory_space<vmem>>, %arg6: memref<1x2x1024xf32, #tpu.memory_space<vmem>>, %arg7: memref<2x1024xf32, #tpu.memory_space<vmem>>) attributes {dimension_semantics = [#tpu.dimension_semantics<parallel>, #tpu.dimension_semantics<arbitrary>], iteration_bounds = array<i64: 2, 2>, scalar_prefetch = 0 : i64, scratch_operands = 1 : i64, tpu.core_type = #tpu.core_type<tc>, window_params = [{pipeline_mode = #tpu.pipeline_mode<synchronous>, transform_indices = @transform_0, window_bounds = array<i64: 2, 1024>}, {transform_indices = @transform_1, window_bounds = array<i64: 1024, 1024>}, {transform_indices = @transform_2, window_bounds = array<i64: 1, 1024>}, {transform_indices = @transform_3, window_bounds = array<i64: 1024, 1024>}, {transform_indices = @transform_4, window_bounds = array<i64: 1, 2, 1024>}]} {
    %c0_i32 = arith.constant 0 : i32
    %0 = arith.cmpi eq, %arg1, %c0_i32 : i32
    %1 = arith.extui %0 : i1 to i32
    %c0_i32_0 = arith.constant 0 : i32
    %2 = arith.cmpi ne, %1, %c0_i32_0 : i32
    scf.if %2 {
      %cst_15 = arith.constant 0.000000e+00 : f32
      %20 = vector.broadcast %cst_15 : f32 to vector<2x1024xf32>
      %c0_16 = arith.constant 0 : index
      %c0_17 = arith.constant 0 : index
      %21 = vector.load %arg7[%c0_16, %c0_17] : memref<2x1024xf32, #tpu.memory_space<vmem>>, vector<2x1024xf32>
      tpu.vector_store %arg7[%c0_16, %c0_17], %20 {strides = array<i32>} : memref<2x1024xf32, #tpu.memory_space<vmem>>, vector<2x1024xf32>,
    } else {
    }
    %c0 = arith.constant 0 : index
    %c0_1 = arith.constant 0 : index
    %3 = vector.load %arg2[%c0, %c0_1] : memref<2x1024xbf16, #tpu.memory_space<vmem>>, vector<2x1024xbf16>
    %c0_2 = arith.constant 0 : index
    %c0_3 = arith.constant 0 : index
    %4 = vector.load %arg3[%c0_2, %c0_3] : memref<1024x1024xbf16, #tpu.memory_space<vmem>>, vector<1024x1024xbf16>
    %cst = arith.constant dense<0.000000e+00> : vector<2x1024xf32>
    %5 = tpu.matmul %3, %4, %cst {dimension_numbers = #tpu.dot_dimension_numbers<[1], [0], [0], [1], [0, 0, 1, 1], [], []>} : vector<2x1024xbf16>, vector<1024x1024xbf16>, vector<2x1024xf32> -> vector<2x1024xf32>
    %c0_4 = arith.constant 0 : index
    %c0_5 = arith.constant 0 : index
    %6 = vector.load %arg4[%c0_4, %c0_5] : memref<1x1024xf32, #tpu.memory_space<vmem>>, vector<1x1024xf32>
    %7 = vector.broadcast %6 : vector<1x1024xf32> to vector<2x1024xf32>
    %8 = arith.addf %5, %7 : vector<2x1024xf32>
    %cst_6 = arith.constant 0.000000e+00 : f32
    %9 = vector.broadcast %cst_6 : f32 to vector<2x1024xf32>
    %10 = arith.maximumf %8, %9 : vector<2x1024xf32>
    %c0_7 = arith.constant 0 : index
    %c0_8 = arith.constant 0 : index
    %11 = vector.load %arg7[%c0_7, %c0_8] : memref<2x1024xf32, #tpu.memory_space<vmem>>, vector<2x1024xf32>
    %12 = arith.truncf %10 : vector<2x1024xf32> to vector<2x1024xbf16>
    %c0_9 = arith.constant 0 : index
    %c0_10 = arith.constant 0 : index
    %13 = vector.load %arg5[%c0_9, %c0_10] : memref<1024x1024xbf16, #tpu.memory_space<vmem>>, vector<1024x1024xbf16>
    %cst_11 = arith.constant dense<0.000000e+00> : vector<2x1024xf32>
    %14 = tpu.matmul %12, %13, %cst_11 {dimension_numbers = #tpu.dot_dimension_numbers<[1], [0], [0], [1], [0, 0, 1, 1], [], []>} : vector<2x1024xbf16>, vector<1024x1024xbf16>, vector<2x1024xf32> -> vector<2x1024xf32>
    %15 = arith.addf %11, %14 : vector<2x1024xf32>
    %c0_12 = arith.constant 0 : index
    %c0_13 = arith.constant 0 : index
    %16 = vector.load %arg7[%c0_12, %c0_13] : memref<2x1024xf32, #tpu.memory_space<vmem>>, vector<2x1024xf32>
    tpu.vector_store %arg7[%c0_12, %c0_13], %15 {strides = array<i32>} : memref<2x1024xf32, #tpu.memory_space<vmem>>, vector<2x1024xf32>,
    %c1_i32 = arith.constant 1 : i32
    %17 = arith.cmpi eq, %arg1, %c1_i32 : i32
    %18 = arith.extui %17 : i1 to i32
    %c0_i32_14 = arith.constant 0 : i32
    %19 = arith.cmpi ne, %18, %c0_i32_14 : i32
    scf.if %19 {
      %c0_15 = arith.constant 0 : index
      %c0_16 = arith.constant 0 : index
      %20 = vector.load %arg7[%c0_15, %c0_16] : memref<2x1024xf32, #tpu.memory_space<vmem>>, vector<2x1024xf32>
      %c0_17 = arith.constant 0 : index
      %c0_18 = arith.constant 0 : index
      %c0_19 = arith.constant 0 : index
      %21 = vector.load %arg6[%c0_17, %c0_18, %c0_19] : memref<1x2x1024xf32, #tpu.memory_space<vmem>>, vector<1x2x1024xf32>
      %22 = vector.shape_cast %21 : vector<1x2x1024xf32> to vector<2x1024xf32>
      %23 = vector.shape_cast %20 : vector<2x1024xf32> to vector<1x2x1024xf32>
      tpu.vector_store %arg6[%c0_17, %c0_18, %c0_19], %23 {strides = array<i32>} : memref<1x2x1024xf32, #tpu.memory_space<vmem>>, vector<1x2x1024xf32>,
    } else {
    }
    return
  }
  func.func @transform_0(%arg0: i32, %arg1: i32) -> (i32, i32) {
    %c0_i32 = arith.constant 0 : i32
    %c0_i32_0 = arith.constant 0 : i32
    %c0_i32_1 = arith.constant 0 : i32
    return %c0_i32, %c0_i32_0 : i32, i32
  }
  func.func @transform_1(%arg0: i32, %arg1: i32) -> (i32, i32) {
    %c2_i32 = arith.constant 2 : i32
    %0 = arith.muli %arg0, %c2_i32 : i32
    %1 = arith.addi %0, %arg1 : i32
    %c0_i32 = arith.constant 0 : i32
    %c0_i32_0 = arith.constant 0 : i32
    return %c0_i32, %1 : i32, i32
  }
  func.func @transform_2(%arg0: i32, %arg1: i32) -> (i32, i32) {
    %c2_i32 = arith.constant 2 : i32
    %0 = arith.muli %arg0, %c2_i32 : i32
    %1 = arith.addi %0, %arg1 : i32
    %c0_i32 = arith.constant 0 : i32
    %c0_i32_0 = arith.constant 0 : i32
    return %c0_i32, %1 : i32, i32
  }
  func.func @transform_3(%arg0: i32, %arg1: i32) -> (i32, i32) {
    %c2_i32 = arith.constant 2 : i32
    %0 = arith.muli %arg0, %c2_i32 : i32
    %1 = arith.addi %0, %arg1 : i32
    %c0_i32 = arith.constant 0 : i32
    %c0_i32_0 = arith.constant 0 : i32
    return %1, %c0_i32 : i32, i32
  }
  func.func @transform_4(%arg0: i32, %arg1: i32) -> (i32, i32, i32) {
    %c0_i32 = arith.constant 0 : i32
    %c0_i32_0 = arith.constant 0 : i32
    %c0_i32_1 = arith.constant 0 : i32
    return %arg0, %c0_i32, %c0_i32_0 : i32, i32, i32
  }
}

</mosaic_0001>

<bundles_post_ra>
// kernel: tpu_custom_call.1
= control target key start
LH: loop header
LB: loop body
LE: loop exit
PB: predicated region body
PF: predicated region fallthrough
CT: control target
= control target key end

     0   :  { %s11169_s0 = inlined_call_operand.hbm [shape: bf16[2,1024], index: 0, kind: input, shape index: {}]   ;;  %s11170_s1 = inlined_call_operand.hbm [shape: bf16[1024,4096], index: 1, kind: input, shape index: {}]   ;;  %s11171_s2 = inlined_call_operand.hbm [shape: f32[1,4096], index: 2, kind: input, shape index: {}]   ;;  %s11172_s3 = inlined_call_operand.hbm [shape: bf16[4096,1024], index: 3, kind: input, shape index: {}]   ;;  %s11173_s4 = inlined_call_operand.hbm [shape: f32[2,2,1024], index: 4, kind: output, shape index: {}]  }
   0x1   :  { %11187 = sst [smem:[#allocation22_spill]] %s11169_s0 }
   0x2   :  { %11188 = sst [smem:[#allocation23_spill]] %s11170_s1 }
   0x3   :  { %11189 = sst [smem:[#allocation24_spill]] %s11171_s2 }
   0x4   :  { %11190 = sst [smem:[#allocation25_spill]] %s11173_s4 }
   0x5   :  { %9 = vsyncpa [#allocation4], 0 }
   0x6   :  { %10 = vsyncpa [#allocation7], 0 }
   0x7   :  { %12 = vsyncpa [#allocation7 + $0x1], 0 }
   0x8   :  { %13 = vsyncpa [#allocation10], 0 }
   0x9   :  { %15 = vsyncpa [#allocation10 + $0x1], 0 }
   0xa   :  { %16 = vsyncpa [#allocation5], 0 }
   0xb   :  { %18 = vsyncpa [#allocation5 + $0x1], 0  ;;  %s9612_s15 = smov 0   ;;  %s9614_s16 = smov 0  }
   0xc   :  { %s9616_s17 = smov 0   ;;  %s9618_s18 = smov 0  }
   0xd   :  { %s9620_s19 = smov 0   ;;  %s9622_s20 = smov 0  }
   0xe   :  { %s9624_s21 = smov 0   ;;  %s9626_s22 = smov 0  }
   0xf   :  { %s9628_s23 = smov 0   ;;  %s9630_s24 = smov 0  }
  0x10   :  { %s9632_s25 = smov 0  }
  0x11 LB: > { %11191 = sst [smem:[#allocation16_spill]] %s9558_s21  ;;  %s33_s26 = sadd.s32 1, %s9566_s23  ;;  %s9574_s25 = sphi %s9632_s25, %s24_s25   ;;  %s9570_s24 = sphi %s9630_s24, %s11224_s24   ;;  %s9566_s23 = sphi %s9628_s23, %s11223_s23   ;;  %s9562_s22 = sphi %s9626_s22, %s11231_s22   ;;  %s9558_s21 = sphi %s9624_s21, %s11221_s21   ;;  %s9554_s20 = sphi %s9622_s20, %s11230_s20   ;;  %s9550_s19 = sphi %s9620_s19, %s11229_s19   ;;  %s9546_s18 = sphi %s9618_s18, %s11228_s18   ;;  %s9542_s17 = sphi %s9616_s17, %s11227_s17   ;;  %s9538_s16 = sphi %s9614_s16, %s11226_s16   ;;  %s9534_s15 = sphi %s9612_s15, %s11225_s15  }
  0x12   : > { %11192 = sst [smem:[#allocation17_spill]] %s9562_s22  ;;  %s36_s27 = sadd.s32 1, %s9570_s24 }
  0x13   : > { %11193 = sst [smem:[#allocation18_spill]] %s9566_s23  ;;  %p34_p0 = scmp.ge.s32.totalorder %s33_s26, 2 }
  0x14   : > { %11194 = sst [smem:[#allocation19_spill]] %s9570_s24  ;;  %s8140_s28 = sshll.u32 %s9570_s24, 1 }
  0x15   : > { %s9671_s29 = sadd.s32 %s9566_s23, %s8140_s28  ;;  %s68_s30 = sadd.s32 1, %s9554_s20 }
  0x16   : > { %s11233_s26 = smov (%p34_p0, %s33_s26), 0  ;;  %s11235_s27 = smov (!%p34_p0, %s36_s27), %s9570_s24 }
  0x17   : > { %11195 = sst [smem:[#allocation20_spill]] %s11233_s26  ;;  %p75_p1 = scmp.ne.s32.totalorder %s9554_s20, %s9550_s19 }
  0x18   : > { %p76_p2 = scmp.eq.s32.totalorder %s9574_s25, 0  ;;  %p38_p3 = scmp.ge.s32.totalorder %s11235_s27, 2 }
  0x19   : > { %p9235_p5 = scmp.lt.s32.totalorder %s9574_s25, 4  ;;  %s202_s6 = sand.u32 1, %s9574_s25  }
  0x1a   : > { %p9680_p4 = por %p76_p2, %p75_p1  ;;  %s11237_s27 = smov (%p38_p3, %s11235_s27), 0 }
  0x1b   : > { %11197 = sst [smem:[#allocation21_spill]] %s11237_s27  ;;  %s9689_s7 = sand.u32 1, %s9554_s20  }
  0x1c   : > { %s8141_s8 = sshll.u32 %s11237_s27, 1  ;;  %s11178_s10 = sshll.u32 %s9689_s7, 12 }
  0x1d   : > { %s64_s9 = sadd.s32 %s8141_s8, %s11233_s26  ;;  %s9199_s12 = sshll.u32 %s9671_s29, 9 }
  0x1e   : > { %s65_s11 = ssub.s32 %s9671_s29, %s64_s9  ;;  %s11198_s1 = sld [smem:[#allocation23_spill]] }
  0x1f   : > { %p66_p6 = scmp.eq.s32.totalorder %s65_s11, 0  ;;  %s206_s23 = scalar_lea.vmem [#allocation6], %s11178_s10 }
  0x20   : > { %s215_s4 = sshll.u32 %s206_s23, 4  ;;  %p9708_p7 = pnand %p9235_p5, %p9680_p4  ;;  %s216_s4 = int_to_ptr.vmem [resolvable:$true] %s215_s4 }
  0x21   : > { %s9702_s22 = scalar_select %p66_p6, %s9554_s20, %s68_s30  }
  0x22   : > { %s9712_s8 = scalar_lea.sflag [#allocation7], %s202_s6  ;;  %p11181_p8 = pneg %p9708_p7 }
  0x23   : > { %s9349_s9 = scalar_lea.vmem %s216_s4, 65536  ;;  %s9576_s23 = smov [#allocation6]  }
  0x24   : > { %s214_s28 = scalar_lea.hbm %s11198_s1, %s9199_s12  ;;  %p9350_p9 = scmp.ne.s32.totalorder %s216_s4, %s9349_s9 }
  0x25   : > { %s9354_s30 = sshll.u32 %s9576_s23, 4  ;;  %s9355_s30 = int_to_ptr.vmem [resolvable:$false] %s9354_s30 }
  0x26   : > { %p9352_p10 = pnand %p9350_p9, %p11181_p8  ;;  %s9356_s5 = scalar_lea.vmem %s9355_s30, 131072 }
  0x27   : > { %p9357_p12 = scmp.lt.s32.totalorder %s216_s4, %s9355_s30  ;;  %p9358_p13 = scmp.lt.s32.totalorder %s9356_s5, %s9349_s9 }
  0x28   : > { %p9353_p11 = pneg %p9352_p10 }
  0x29   : > { %p9359_p0 = por %p9358_p13, %p9357_p12 }
  0x2b   : > { %p9360_p1 = pnand %p9359_p0, %p9353_p11 }
  0x2d   : > { %9363 = shalt.err (!%p9360_p1)
}
  0x2e   : > { %s9577_s11 = smov 2048   ;;  %s11176_s6 = smov 512  }
  0x2f   : > { %s11177_s12 = smov 32   ;;  %s9725_s13 = sadd.s32 4294967295, %s9574_s25  }
  0x30   : > { %9223 = dma.hbm_to_vmem [thread:$0]  (!%p9708_p7), %s214_s28, 65536, %s216_s4, %s9712_s8, %s9577_s11, %s11176_s6, %s11177_s12  }
  0x31   : > { %s8139_s14 = sadd.s32 4294967294, %s9574_s25   ;;  %p81_p2 = scmp.ne.s32.totalorder %s9550_s19, %s9546_s18 }
  0x32   : > { %p11183_p3 = scmp.eq.s32.totalorder %s9725_s13, 0  ;;  %s151_s9 = ssub.s32 %s9570_s24, %s11237_s27 }
  0x33   : > { %s154_s23 = sadd.s32 1, %s9542_s17  ;;  %p152_p5 = scmp.eq.s32.totalorder %s151_s9, 0 }
  0x34   : > { %p9736_p4 = por %p11183_p3, %p81_p2  ;;  %p164_p6 = scmp.ne.s32.totalorder %s9542_s17, %s9538_s16 }
  0x35   : > { %p165_p9 = scmp.eq.s32.totalorder %s9725_s13, 3  ;;  %p170_p11 = scmp.ne.s32.totalorder %s9538_s16, %s9534_s15 }
  0x36   : > { %s11200_s30 = scalar_select %p9736_p4, 1, 0 }
  0x37   : > { %s9744_s4 = scalar_select %p152_p5, %s9542_s17, %s154_s23  }
  0x38   : > { %p9746_p10 = por %p165_p9, %p164_p6  ;;  %p171_p12 = scmp.eq.s32.totalorder %s8139_s14, 3 }
  0x39   : > { %p8146_p13 = scmp.ge.s32.totalorder %s9574_s25, 1  ;;  %p178_p0 = scmp.lt.s32.totalorder %s9574_s25, 5 }
  0x3a   : > { %s11201_s28 = scalar_select %p9746_p10, 1, 0 }
  0x3b   : > { %p9754_p1 = por %p171_p12, %p170_p11  ;;  %p9758_p2 = pnand %p8146_p13, %p178_p0 }
  0x3c   : > { %s9580_s11 = smov [#allocation3]   ;;  %s8153_s23 = sshll.u32 %s9689_s7, 3 }
  0x3d   : > { %s11202_s18 = scalar_select %p9754_p1, 1, 0 }
  0x3e   : > { %s11203_s5 = scalar_select %p9758_p2, 1, 0 }
  0x3f   : > { %s191_s9 = sshll.u32 %s9580_s11, 4  ;;  %p9216_p5 = pneg %p9758_p2  ;;  %s192_s9 = int_to_ptr.vmem [resolvable:$true] %s191_s9 }
  0x40   : > { %s9200_s6 = sshll.u32 %s9671_s29, 7  ;;  %s229_s12 = scalar_lea.vmem [#allocation8], %s8153_s23 }
  0x41   : > { %s239_s14 = sshll.u32 %s229_s12, 4  ;;  %p9217_p6 = pnand %p9216_p5, %p11183_p3  ;;  %s240_s14 = int_to_ptr.vmem [resolvable:$true] %s239_s14 }
  0x42   : > { %s11204_s2 = sld [smem:[#allocation24_spill]]  ;;  %s9375_s26 = scalar_lea.vmem %s192_s9, 128 }
  0x43   : > { %p9366_p9 = pneg %p9217_p6  ;;  %p9376_p11 = scmp.ne.s32.totalorder %s192_s9, %s9375_s26 }
  0x44   : > { %p9383_p0 = scmp.lt.s32.totalorder %s192_s9, %s192_s9  ;;  %p9384_p8 = scmp.lt.s32.totalorder %s9375_s26, %s9375_s26 }
  0x45   : > { %p9378_p12 = pnand %p9376_p11, %p9366_p9 }
  0x46   : > { %p9385_p1 = por %p9384_p8, %p9383_p0 }
  0x47   : > { %p9379_p13 = pneg %p9378_p12 }
  0x48   : > { %s237_s27 = scalar_lea.hbm %s11204_s2, %s9200_s6 }
  0x49   : > { %p9386_p10 = pnand %p9385_p1, %p9379_p13 }
  0x4b   : > { %9389 = shalt.err (!%p9386_p10)
}
  0x4c   : > { %s11205_s0 = sld [smem:[#allocation22_spill]]  ;;  %s9403_s12 = scalar_lea.vmem %s240_s14, 128 }
  0x4d   : > { %p9404_p5 = scmp.ne.s32.totalorder %s240_s14, %s9403_s12  ;;  %p11206_p3 = pneg %p9708_p7 }
  0x4e   : > { %s9581_s1 = smov [#allocation8]  }
  0x4f   : > { %p9406_p4 = pnand %p9404_p5, %p11206_p3  ;;  %s9408_s10 = sshll.u32 %s9581_s1, 4  ;;  %s9409_s10 = int_to_ptr.vmem [resolvable:$false] %s9408_s10 }
  0x50   : > { %s9410_s6 = scalar_lea.vmem %s9409_s10, 256  ;;  %p9411_p9 = scmp.lt.s32.totalorder %s240_s14, %s9409_s10 }
  0x51   : > { %p9407_p2 = pneg %p9406_p4  ;;  %p9412_p11 = scmp.lt.s32.totalorder %s9410_s6, %s9403_s12 }
  0x52   : > { %9219 = dma.hbm_to_vmem [thread:$0]  (!%p9217_p6), %s11205_s0, 128, %s192_s9, [#allocation4]  }
  0x53   : > { %p9413_p8 = por %p9412_p11, %p9411_p9 }
  0x55   : > { %p9414_p1 = pnand %p9413_p8, %p9407_p2 }
  0x57   : > { %9417 = shalt.err (!%p9414_p1)
}
  0x58   : > { %9226 = dma.hbm_to_vmem [thread:$0]  (!%p9708_p7), %s237_s27, 128, %s240_s14, %s9712_s8  }
  0x59   : > { %s9202_s26 = sshll.u32 %s9671_s29, 16  ;;  %s11207_s9 = sshll.u32 %s9689_s7, 12 }
  0x5a   : > { %s250_s11 = scalar_lea.vmem [#allocation9], %s11207_s9  ;;  %s259_s10 = scalar_lea.hbm %s11172_s3, %s9202_s26 }
  0x5b   : > { %s260_s23 = sshll.u32 %s250_s11, 4  ;;  %s247_s12 = scalar_lea.sflag [#allocation10], %s9689_s7  ;;  %s261_s23 = int_to_ptr.vmem [resolvable:$true] %s260_s23 }
  0x5c   : > { %s9431_s6 = scalar_lea.vmem %s261_s23, 65536  ;;  %p11208_p4 = pneg %p9708_p7 }
  0x5d   : > { %p9432_p3 = scmp.ne.s32.totalorder %s261_s23, %s9431_s6  ;;  %s9582_s2 = smov [#allocation9]  }
  0x5e   : > { %s9436_s24 = sshll.u32 %s9582_s2, 4  ;;  %s9437_s24 = int_to_ptr.vmem [resolvable:$false] %s9436_s24 }
  0x5f   : > { %p9434_p10 = pnand %p9432_p3, %p11208_p4  ;;  %s9438_s27 = scalar_lea.vmem %s9437_s24, 131072 }
  0x60   : > { %p9439_p6 = scmp.lt.s32.totalorder %s261_s23, %s9437_s24  ;;  %p9440_p12 = scmp.lt.s32.totalorder %s9438_s27, %s9431_s6 }
  0x61   : > { %p9435_p2 = pneg %p9434_p10 }
  0x62   : > { %p9441_p13 = por %p9440_p12, %p9439_p6 }
  0x64   : > { %p9442_p0 = pnand %p9441_p13, %p9435_p2 }
  0x66   : > { %9445 = shalt.err (!%p9442_p0)
}
  0x67   : > { %s11209_s0 = smov 32   ;;  %s11210_s29 = smov 512  }
  0x68   : > { %9229 = dma.hbm_to_vmem [thread:$0]  (!%p9708_p7), %s259_s10, 65536, %s261_s23, %s247_s12, %s11210_s29, %s11210_s29, %s11209_s0  }
  0x69   : > { %p11211_p5 = scmp.ne.s32.totalorder %s11203_s5, 0 }
  0x6a   : > { %p11212_p9 = scmp.eq.s32.totalorder (!%p11211_p5), %s9725_s13, 0 }
  0x6b   : > { %272 = sbr.rel (%p11211_p5) target bundleno = 1480 (0x5c8), region = 36 }
  0x70   : > { %9517 = dma.done.wait (%p11212_p9), [#allocation4], 128   ;;  %p11213_p11 = pmov %p11212_p9 }
  0x71   : > { %s278_s2 = sand.u32 1, %s9725_s13   ;;  %s280_s24 = sand.u32 1, %s9550_s19  }
  0x72   : > { %9519 = vsyncadd (%p11213_p11), [#allocation4], 4294967168  ;;  %s8164_s7 = sshll.u32 %s280_s24, 12  ;;  %s279_s21 = scalar_lea.sflag [#allocation7], %s278_s2 }
  0x73   : > { %s9803_s8 = scalar_lea.vmem [#allocation6], %s8164_s7  ;;  %p11214_p8 = scmp.ne.s32.totalorder %s11200_s30, 0 }
  0x75   : > { %9521 = dma.done.wait (%p11214_p8), %s279_s21, 65664  }
  0x76   : > { %9523 = vsyncadd (%p11214_p8), %s279_s21, 4294901632  ;;  %s8165_s5 = sshll.u32 %s280_s24, 3  ;;  %s297_s26 = scalar_lea.sflag [#allocation10], %s280_s24 }
  0x77   : > { %s9809_s14 = scalar_lea.vmem [#allocation8], %s8165_s5  ;;  %s9811_s9 = scalar_lea.vmem [#allocation9], %s8164_s7 }
  0x78   : > { %9525 = dma.done.wait (%p11214_p8), %s297_s26, 65536  }
  0x79   : > { %9527 = vsyncadd (%p11214_p8), %s297_s26, 4294901760  ;;  %s332_s13 = sand.u32 1, %s9538_s16   ;;  %s11215_s1 = sld [smem:[#allocation16_spill]] }
  0x7a   : > { %s8167_s11 = sshll.u32 %s332_s13, 4 }
  0x7b   : > { %s9820_s23 = scalar_lea.vmem [#allocation11], %s8167_s11 }
  0x7f   : > { %p8168_p7 = scmp.ne.s32.totalorder %s11215_s1, 0 }
  0x81   : > { %347 = sbr.rel (%p8168_p7) target bundleno = 136 (0x88), region = 56 }
  0x86   : > { %v9583_v0 = vmov 0.0  }
  0x87   : > { %348 = vst [vmem:[#allocation2] sm:$0xff] %v9583_v0  ;;  %349 = vst [vmem:[#allocation2 + $0x8] sm:$0xff] %v9583_v0 }
  0x88 PF: > { %v407_v1 = vld [vmem:[%s9803_s8 + $0x1c0] sm:$0xff]  ;;  %v865_v33 = vlaneseq  ;;  %v9584_v34 = vmov 1966171168   ;;  %v350_v60 = vld [vmem:[#allocation3] sm:$0xff]  ;;  %s11216_s30 = sld [smem:[#allocation16_spill]] }
  0x89   : > { %v411_v2 = vld [vmem:[%s9803_s8 + $0x1e0] sm:$0xff]  ;;  %v908_v35 = vunpack.c.l.s4 %v9584_v34 }
  0x8a   : > { %v535_v3 = vld [vmem:[%s9803_s8 + $0x5c0] sm:$0xff]  ;;  %v8226_v4 = vcombine.high %v407_v1, %v411_v2  ;;  %v8225_v6 = vcombine.low %v407_v1, %v411_v2  ;;  %v9845_v44 = vshrl.u32 %v865_v33, 7 }
  0x8b   : > { %v539_v5 = vld [vmem:[%s9803_s8 + $0x5e0] sm:$0xff]  ;;  %v909_v45 = vunpack.c.0.s8 %v908_v35 }
  0x8c   : > { %v399_v7 = vld [vmem:[%s9803_s8 + $0x180] sm:$0xff]  ;;  %v8354_v9 = vcombine.high %v535_v3, %v539_v5  ;;  %v8353_v10 = vcombine.low %v535_v3, %v539_v5  ;;  %3523 = vmatprep.subr.bf16.mxu0 %v8226_v4 }
  0x8d   : > { %v403_v8 = vld [vmem:[%s9803_s8 + $0x1a0] sm:$0xff]  ;;  %3524 = vmatpush1.bf16.msra.mxu0 %v8225_v6  ;;  %v9852_v54 = vsub.s32 %v909_v45, %v9845_v44 }
  0x8e   : > { %v8218_v11 = vcombine.high %v399_v7, %v403_v8  ;;  %v527_v12 = vld [vmem:[%s9803_s8 + $0x580] sm:$0xff]  ;;  %3564 = vmatprep.subr.bf16.mxu1 %v8354_v9  ;;  %v8217_v19 = vcombine.low %v399_v7, %v403_v8  ;;  %p9193_p1 = scmp.ne.s32.totalorder %s11216_s30, 1 }
  0x8f   : > { %v531_v13 = vld [vmem:[%s9803_s8 + $0x5a0] sm:$0xff]  ;;  %3565 = vmatpush1.bf16.msra.mxu1 %v8353_v10  ;;  %v9859_v0 = vrot.slane %v350_v60, %v9852_v54 }
  0x90   : > { %v391_v14 = vld [vmem:[%s9803_s8 + $0x140] sm:$0xff]  ;;  %v8346_v15 = vcombine.high %v527_v12, %v531_v13  ;;  %3525 = vmatprep.subr.bf16.mxu0 %v8218_v11  ;;  %v8345_v20 = vcombine.low %v527_v12, %v531_v13 }
  0x91   : > { %v395_v16 = vld [vmem:[%s9803_s8 + $0x160] sm:$0xff]  ;;  %3526 = vmatpush1.bf16.msra.mxu0 %v8217_v19  ;;  %v921_v4 = vcombine.high %v9859_v0, %v9859_v0 }
  0x92   : > { %v519_v17 = vld [vmem:[%s9803_s8 + $0x540] sm:$0xff]  ;;  %v8210_v21 = vcombine.high %v391_v14, %v395_v16  ;;  %3566 = vmatprep.subr.bf16.mxu1 %v8346_v15  ;;  %v8209_v27 = vcombine.low %v391_v14, %v395_v16 }
  0x93   : > { %v523_v18 = vld [vmem:[%s9803_s8 + $0x560] sm:$0xff]  ;;  %3567 = vmatpush1.bf16.msra.mxu1 %v8345_v20  ;;  %v9868_v10 = vrot.slane %v921_v4, %v9852_v54  ;;  %v906_v20 = vcombine.high %v350_v60, %v350_v60 }
  0x94   : > { %v8338_v22 = vcombine.high %v519_v17, %v523_v18  ;;  %v383_v23 = vld [vmem:[%s9803_s8 + $0x100] sm:$0xff]  ;;  %3527 = vmatprep.subr.bf16.mxu0 %v8210_v21  ;;  %v8337_v28 = vcombine.low %v519_v17, %v523_v18 }
  0x95   : > { %v387_v24 = vld [vmem:[%s9803_s8 + $0x120] sm:$0xff]  ;;  %3528 = vmatpush1.bf16.msra.mxu0 %v8209_v27  ;;  %3555 = vmatprep.mubr.bf16.mxu0 %v9868_v10  ;;  %v9875_v14 = vcombine.high %v9868_v10, %v9868_v10 }
  0x96   : > { %v511_v25 = vld [vmem:[%s9803_s8 + $0x500] sm:$0xff]  ;;  %v8202_v29 = vcombine.high %v383_v23, %v387_v24  ;;  %3568 = vmatprep.subr.bf16.mxu1 %v8338_v22  ;;  %v8201_v38 = vcombine.low %v383_v23, %v387_v24 }
  0x97   : > { %v515_v26 = vld [vmem:[%s9803_s8 + $0x520] sm:$0xff]  ;;  %3569 = vmatpush1.bf16.msra.mxu1 %v8337_v28  ;;  %3596 = vmatprep.mubr.bf16.mxu1 %v9875_v14 }
  0x98   : > { %v8330_v30 = vcombine.high %v511_v25, %v515_v26  ;;  %v375_v31 = vld [vmem:[%s9803_s8 + $0xc0] sm:$0xff]  ;;  %3529 = vmatprep.subr.bf16.mxu0 %v8202_v29  ;;  %v8329_v39 = vcombine.low %v511_v25, %v515_v26  ;;  %v9885_v29 = vrot.slane %v906_v20, %v9852_v54 }
  0x99   : > { %v379_v32 = vld [vmem:[%s9803_s8 + $0xe0] sm:$0xff]  ;;  %3530 = vmatpush1.bf16.msra.mxu0 %v8201_v38 }
  0x9a   : > { %v503_v36 = vld [vmem:[%s9803_s8 + $0x4c0] sm:$0xff]  ;;  %v8194_v40 = vcombine.high %v375_v31, %v379_v32  ;;  %3570 = vmatprep.subr.bf16.mxu1 %v8330_v30  ;;  %v8193_v48 = vcombine.low %v375_v31, %v379_v32  ;;  %v9891_v33 = vrot.slane %v9885_v29, %v9852_v54 }
  0x9b   : > { %v507_v37 = vld [vmem:[%s9803_s8 + $0x4e0] sm:$0xff]  ;;  %3571 = vmatpush1.bf16.msra.mxu1 %v8329_v39 }
  0x9c   : > { %v8322_v41 = vcombine.high %v503_v36, %v507_v37  ;;  %v367_v42 = vld [vmem:[%s9803_s8 + $0x80] sm:$0xff]  ;;  %3531 = vmatprep.subr.bf16.mxu0 %v8194_v40  ;;  %v8321_v49 = vcombine.low %v503_v36, %v507_v37 }
  0x9d   : > { %v371_v43 = vld [vmem:[%s9803_s8 + $0xa0] sm:$0xff]  ;;  %3532 = vmatpush1.bf16.msra.mxu0 %v8193_v48 }
  0x9e   : > { %v495_v46 = vld [vmem:[%s9803_s8 + $0x480] sm:$0xff]  ;;  %v8186_v50 = vcombine.high %v367_v42, %v371_v43  ;;  %3572 = vmatprep.subr.bf16.mxu1 %v8322_v41  ;;  %v8185_v57 = vcombine.low %v367_v42, %v371_v43 }
  0x9f   : > { %v499_v47 = vld [vmem:[%s9803_s8 + $0x4a0] sm:$0xff]  ;;  %3573 = vmatpush1.bf16.msra.mxu1 %v8321_v49 }
  0xa0   : > { %v8314_v51 = vcombine.high %v495_v46, %v499_v47  ;;  %v359_v52 = vld [vmem:[%s9803_s8 + $0x40] sm:$0xff]  ;;  %3533 = vmatprep.subr.bf16.mxu0 %v8186_v50  ;;  %v8313_v58 = vcombine.low %v495_v46, %v499_v47 }
  0xa1   : > { %v363_v53 = vld [vmem:[%s9803_s8 + $0x60] sm:$0xff]  ;;  %3534 = vmatpush1.bf16.msra.mxu0 %v8185_v57 }
  0xa2   : > { %v487_v55 = vld [vmem:[%s9803_s8 + $0x440] sm:$0xff]  ;;  %v8178_v59 = vcombine.high %v359_v52, %v363_v53  ;;  %3574 = vmatprep.subr.bf16.mxu1 %v8314_v51  ;;  %v8177_v3 = vcombine.low %v359_v52, %v363_v53 }
  0xa3   : > { %v491_v56 = vld [vmem:[%s9803_s8 + $0x460] sm:$0xff]  ;;  %3575 = vmatpush1.bf16.msra.mxu1 %v8313_v58 }
  0xa4   : > { %v8306_v61 = vcombine.high %v487_v55, %v491_v56  ;;  %v351_v62 = vld [vmem:[%s9803_s8] sm:$0xff]  ;;  %3535 = vmatprep.subr.bf16.mxu0 %v8178_v59  ;;  %v8305_v5 = vcombine.low %v487_v55, %v491_v56 }
  0xa5   : > { %v355_v63 = vld [vmem:[%s9803_s8 + $0x20] sm:$0xff]  ;;  %3536 = vmatpush1.bf16.msra.mxu0 %v8177_v3 }
  0xa6   : > { %v479_v1 = vld [vmem:[%s9803_s8 + $0x400] sm:$0xff]  ;;  %v8170_v6 = vcombine.high %v351_v62, %v355_v63  ;;  %3576 = vmatprep.subr.bf16.mxu1 %v8306_v61  ;;  %v8169_v13 = vcombine.low %v351_v62, %v355_v63 }
  0xa7   : > { %v483_v2 = vld [vmem:[%s9803_s8 + $0x420] sm:$0xff]  ;;  %3577 = vmatpush1.bf16.msra.mxu1 %v8305_v5 }
  0xa8   : > { %v8298_v7 = vcombine.high %v479_v1, %v483_v2  ;;  %v471_v8 = vld [vmem:[%s9803_s8 + $0x3c0] sm:$0xff]  ;;  %3537 = vmatprep.subr.bf16.mxu0 %v8170_v6  ;;  %v8297_v15 = vcombine.low %v479_v1, %v483_v2 }
  0xa9   : > { %v475_v9 = vld [vmem:[%s9803_s8 + $0x3e0] sm:$0xff]  ;;  %3538 = vmatpush1.bf16.msra.mxu0 %v8169_v13 }
  0xaa   : > { %v599_v11 = vld [vmem:[%s9803_s8 + $0x7c0] sm:$0xff]  ;;  %v8290_v16 = vcombine.high %v471_v8, %v475_v9  ;;  %3578 = vmatprep.subr.bf16.mxu1 %v8298_v7  ;;  %v8289_v23 = vcombine.low %v471_v8, %v475_v9 }
  0xab   : > { %v603_v12 = vld [vmem:[%s9803_s8 + $0x7e0] sm:$0xff]  ;;  %3579 = vmatpush1.bf16.msra.mxu1 %v8297_v15 }
  0xac   : > { %v8418_v17 = vcombine.high %v599_v11, %v603_v12  ;;  %v463_v18 = vld [vmem:[%s9803_s8 + $0x380] sm:$0xff]  ;;  %3539 = vmatprep.subr.bf16.mxu0 %v8290_v16  ;;  %v8417_v24 = vcombine.low %v599_v11, %v603_v12 }
  0xad   : > { %v467_v19 = vld [vmem:[%s9803_s8 + $0x3a0] sm:$0xff]  ;;  %3540 = vmatpush2.bf16.msra.mxu0 %v8289_v23 }
  0xae   : > { %v591_v21 = vld [vmem:[%s9803_s8 + $0x780] sm:$0xff]  ;;  %v8282_v25 = vcombine.high %v463_v18, %v467_v19  ;;  %3580 = vmatprep.subr.bf16.mxu1 %v8418_v17  ;;  %v8281_v32 = vcombine.low %v463_v18, %v467_v19 }
  0xaf   : > { %v595_v22 = vld [vmem:[%s9803_s8 + $0x7a0] sm:$0xff]  ;;  %3581 = vmatpush2.bf16.msra.mxu1 %v8417_v24  ;;  %v9921_v24 = vrot.slane %v9859_v0, %v9852_v54 }
  0xb0   : > { %v8410_v26 = vcombine.high %v591_v21, %v595_v22  ;;  %v455_v27 = vld [vmem:[%s9803_s8 + $0x340] sm:$0xff]  ;;  %3541 = vmatprep.subr.bf16.mxu0 %v8282_v25  ;;  %v8409_v34 = vcombine.low %v591_v21, %v595_v22  ;;  %v922_v22 = vcombine.high %v9885_v29, %v9885_v29 }
  0xb1   : > { %v459_v28 = vld [vmem:[%s9803_s8 + $0x360] sm:$0xff]  ;;  %3542 = vmatpush2.bf16.msra.mxu0 %v8281_v32  ;;  %v9932_v0 = vcombine.high %v9921_v24, %v9921_v24 }
  0xb2   : > { %v583_v30 = vld [vmem:[%s9803_s8 + $0x740] sm:$0xff]  ;;  %v8274_v35 = vcombine.high %v455_v27, %v459_v28  ;;  %3582 = vmatprep.subr.bf16.mxu1 %v8410_v26  ;;  %v8273_v41 = vcombine.low %v455_v27, %v459_v28  ;;  %v9928_v32 = vrot.slane %v922_v22, %v9852_v54 }
  0xb3   : > { %v587_v31 = vld [vmem:[%s9803_s8 + $0x760] sm:$0xff]  ;;  %3583 = vmatpush2.bf16.msra.mxu1 %v8409_v34 }
  0xb4   : > { %v8402_v36 = vcombine.high %v583_v30, %v587_v31  ;;  %v447_v37 = vld [vmem:[%s9803_s8 + $0x300] sm:$0xff]  ;;  %3543 = vmatprep.subr.bf16.mxu0 %v8274_v35  ;;  %v8401_v42 = vcombine.low %v583_v30, %v587_v31 }
  0xb5   : > { %v451_v38 = vld [vmem:[%s9803_s8 + $0x320] sm:$0xff]  ;;  %3544 = vmatpush2.bf16.msra.mxu0 %v8273_v41  ;;  %v9941_v41 = vcombine.high %v9928_v32, %v9928_v32 }
  0xb6   : > { %v575_v39 = vld [vmem:[%s9803_s8 + $0x700] sm:$0xff]  ;;  %v8266_v43 = vcombine.high %v447_v37, %v451_v38  ;;  %3584 = vmatprep.subr.bf16.mxu1 %v8402_v36  ;;  %v8265_v50 = vcombine.low %v447_v37, %v451_v38 }
  0xb7   : > { %v579_v40 = vld [vmem:[%s9803_s8 + $0x720] sm:$0xff]  ;;  %3585 = vmatpush2.bf16.msra.mxu1 %v8401_v42 }
  0xb8   : > { %v8394_v45 = vcombine.high %v575_v39, %v579_v40  ;;  %v439_v46 = vld [vmem:[%s9803_s8 + $0x2c0] sm:$0xff]  ;;  %3545 = vmatprep.subr.bf16.mxu0 %v8266_v43  ;;  %v8393_v51 = vcombine.low %v575_v39, %v579_v40 }
  0xb9   : > { %v443_v47 = vld [vmem:[%s9803_s8 + $0x2e0] sm:$0xff]  ;;  %3546 = vmatpush2.bf16.msra.mxu0 %v8265_v50 }
  0xba   : > { %v567_v48 = vld [vmem:[%s9803_s8 + $0x6c0] sm:$0xff]  ;;  %v8258_v52 = vcombine.high %v439_v46, %v443_v47  ;;  %3586 = vmatprep.subr.bf16.mxu1 %v8394_v45  ;;  %v8257_v59 = vcombine.low %v439_v46, %v443_v47 }
  0xbb   : > { %v571_v49 = vld [vmem:[%s9803_s8 + $0x6e0] sm:$0xff]  ;;  %3587 = vmatpush2.bf16.msra.mxu1 %v8393_v51 }
  0xbc   : > { %v8386_v53 = vcombine.high %v567_v48, %v571_v49  ;;  %v431_v55 = vld [vmem:[%s9803_s8 + $0x280] sm:$0xff]  ;;  %3547 = vmatprep.subr.bf16.mxu0 %v8258_v52  ;;  %v8385_v60 = vcombine.low %v567_v48, %v571_v49 }
  0xbd   : > { %v435_v56 = vld [vmem:[%s9803_s8 + $0x2a0] sm:$0xff]  ;;  %3548 = vmatpush2.bf16.msra.mxu0 %v8257_v59 }
  0xbe   : > { %v559_v57 = vld [vmem:[%s9803_s8 + $0x680] sm:$0xff]  ;;  %v8250_v61 = vcombine.high %v431_v55, %v435_v56  ;;  %3588 = vmatprep.subr.bf16.mxu1 %v8386_v53  ;;  %v8249_v4 = vcombine.low %v431_v55, %v435_v56 }
  0xbf   : > { %v563_v58 = vld [vmem:[%s9803_s8 + $0x6a0] sm:$0xff]  ;;  %3589 = vmatpush2.bf16.msra.mxu1 %v8385_v60 }
  0xc0   : > { %v8378_v62 = vcombine.high %v559_v57, %v563_v58  ;;  %v423_v63 = vld [vmem:[%s9803_s8 + $0x240] sm:$0xff]  ;;  %3549 = vmatprep.subr.bf16.mxu0 %v8250_v61  ;;  %v8377_v5 = vcombine.low %v559_v57, %v563_v58 }
  0xc1   : > { %v427_v1 = vld [vmem:[%s9803_s8 + $0x260] sm:$0xff]  ;;  %3550 = vmatpush2.bf16.msra.mxu0 %v8249_v4 }
  0xc2   : > { %v551_v2 = vld [vmem:[%s9803_s8 + $0x640] sm:$0xff]  ;;  %v8242_v6 = vcombine.high %v423_v63, %v427_v1  ;;  %3590 = vmatprep.subr.bf16.mxu1 %v8378_v62  ;;  %v8241_v13 = vcombine.low %v423_v63, %v427_v1 }
  0xc3   : > { %v555_v3 = vld [vmem:[%s9803_s8 + $0x660] sm:$0xff]  ;;  %3591 = vmatpush2.bf16.msra.mxu1 %v8377_v5 }
  0xc4   : > { %v8370_v7 = vcombine.high %v551_v2, %v555_v3  ;;  %v415_v8 = vld [vmem:[%s9803_s8 + $0x200] sm:$0xff]  ;;  %3551 = vmatprep.subr.bf16.mxu0 %v8242_v6  ;;  %v8369_v15 = vcombine.low %v551_v2, %v555_v3 }
  0xc5   : > { %v419_v9 = vld [vmem:[%s9803_s8 + $0x220] sm:$0xff]  ;;  %3552 = vmatpush2.bf16.msra.mxu0 %v8241_v13 }
  0xc6   : > { %v543_v11 = vld [vmem:[%s9803_s8 + $0x600] sm:$0xff]  ;;  %v8234_v16 = vcombine.high %v415_v8, %v419_v9  ;;  %3592 = vmatprep.subr.bf16.mxu1 %v8370_v7  ;;  %v8233_v23 = vcombine.low %v415_v8, %v419_v9 }
  0xc7   : > { %v547_v12 = vld [vmem:[%s9803_s8 + $0x620] sm:$0xff]  ;;  %3593 = vmatpush2.bf16.msra.mxu1 %v8369_v15 }
  0xc8   : > { %v8362_v17 = vcombine.high %v543_v11, %v547_v12  ;;  %v663_v18 = vld [vmem:[%s9803_s8 + $0x9c0] sm:$0xff]  ;;  %3553 = vmatprep.subr.bf16.mxu0 %v8234_v16  ;;  %v8361_v25 = vcombine.low %v543_v11, %v547_v12 }
  0xc9   : > { %v667_v19 = vld [vmem:[%s9803_s8 + $0x9e0] sm:$0xff]  ;;  %3554 = vmatpush2.bf16.msra.mxu0 %v8233_v23 }
  0xca   : > { %v791_v20 = vld [vmem:[%s9803_s8 + $0xdc0] sm:$0xff]  ;;  %v8482_v26 = vcombine.high %v663_v18, %v667_v19  ;;  %3594 = vmatprep.subr.bf16.mxu1 %v8362_v17  ;;  %v8481_v34 = vcombine.low %v663_v18, %v667_v19 }
  0xcb   : > { %v795_v21 = vld [vmem:[%s9803_s8 + $0xde0] sm:$0xff]  ;;  %3595 = vmatpush2.bf16.msra.mxu1 %v8361_v25 }
  0xcc   : > { %v8610_v27 = vcombine.high %v791_v20, %v795_v21  ;;  %v655_v28 = vld [vmem:[%s9803_s8 + $0x980] sm:$0xff]  ;;  %3605 = vmatprep.subr.bf16.mxu0 %v8482_v26  ;;  %v8609_v35 = vcombine.low %v791_v20, %v795_v21  ;;  %3556 = vmatmul.mubr.bf16.vlgmr.msra.gmra.mxu0 %v9921_v24 }
  0xcd   : > { %v659_v30 = vld [vmem:[%s9803_s8 + $0x9a0] sm:$0xff]  ;;  %3606 = vmatpush1.bf16.msra.mxu0 %v8481_v34  ;;  %3637 = vmatprep.mubr.bf16.mxu0 %v9928_v32 }
  0xce   : > { %v783_v31 = vld [vmem:[%s9803_s8 + $0xd80] sm:$0xff]  ;;  %v8474_v36 = vcombine.high %v655_v28, %v659_v30  ;;  %3646 = vmatprep.subr.bf16.mxu1 %v8610_v27  ;;  %3597 = vmatmul.mubr.bf16.vlgmr.msra.gmra.mxu1 %v9932_v0  ;;  %v8473_v42 = vcombine.low %v655_v28, %v659_v30 }
  0xcf   : > { %v787_v29 = vld [vmem:[%s9803_s8 + $0xda0] sm:$0xff]  ;;  %3647 = vmatpush1.bf16.msra.mxu1 %v8609_v35  ;;  %3678 = vmatprep.mubr.bf16.mxu1 %v9941_v41 }
  0xd0   : > { %v8602_v37 = vcombine.high %v783_v31, %v787_v29  ;;  %v647_v38 = vld [vmem:[%s9803_s8 + $0x940] sm:$0xff]  ;;  %3607 = vmatprep.subr.bf16.mxu0 %v8474_v36  ;;  %v8601_v43 = vcombine.low %v783_v31, %v787_v29 }
  0xd1   : > { %v651_v39 = vld [vmem:[%s9803_s8 + $0x960] sm:$0xff]  ;;  %3608 = vmatpush1.bf16.msra.mxu0 %v8473_v42 }
  0xd2   : > { %v775_v54 = vld [vmem:[%s9803_s8 + $0xd40] sm:$0xff]  ;;  %v8466_v45 = vcombine.high %v647_v38, %v651_v39  ;;  %3648 = vmatprep.subr.bf16.mxu1 %v8602_v37  ;;  %v8465_v51 = vcombine.low %v647_v38, %v651_v39 }
  0xd3   : > { %v779_v40 = vld [vmem:[%s9803_s8 + $0xd60] sm:$0xff]  ;;  %3649 = vmatpush1.bf16.msra.mxu1 %v8601_v43 }
  0xd4   : > { %v8594_v46 = vcombine.high %v775_v54, %v779_v40  ;;  %v639_v47 = vld [vmem:[%s9803_s8 + $0x900] sm:$0xff]  ;;  %3609 = vmatprep.subr.bf16.mxu0 %v8466_v45  ;;  %v8593_v52 = vcombine.low %v775_v54, %v779_v40 }
  0xd5   : > { %v643_v48 = vld [vmem:[%s9803_s8 + $0x920] sm:$0xff]  ;;  %3610 = vmatpush1.bf16.msra.mxu0 %v8465_v51 }
  0xd6   : > { %v767_v49 = vld [vmem:[%s9803_s8 + $0xd00] sm:$0xff]  ;;  %v8458_v53 = vcombine.high %v639_v47, %v643_v48  ;;  %3650 = vmatprep.subr.bf16.mxu1 %v8594_v46  ;;  %v8457_v60 = vcombine.low %v639_v47, %v643_v48 }
  0xd7   : > { %v771_v50 = vld [vmem:[%s9803_s8 + $0xd20] sm:$0xff]  ;;  %3651 = vmatpush1.bf16.msra.mxu1 %v8593_v52 }
  0xd8   : > { %v8586_v55 = vcombine.high %v767_v49, %v771_v50  ;;  %v631_v56 = vld [vmem:[%s9803_s8 + $0x8c0] sm:$0xff]  ;;  %3611 = vmatprep.subr.bf16.mxu0 %v8458_v53  ;;  %v8585_v61 = vcombine.low %v767_v49, %v771_v50 }
  0xd9   : > { %v635_v57 = vld [vmem:[%s9803_s8 + $0x8e0] sm:$0xff]  ;;  %3612 = vmatpush1.bf16.msra.mxu0 %v8457_v60 }
  0xda   : > { %v759_v58 = vld [vmem:[%s9803_s8 + $0xcc0] sm:$0xff]  ;;  %v8450_v62 = vcombine.high %v631_v56, %v635_v57  ;;  %3652 = vmatprep.subr.bf16.mxu1 %v8586_v55  ;;  %v8449_v5 = vcombine.low %v631_v56, %v635_v57 }
  0xdb   : > { %v763_v59 = vld [vmem:[%s9803_s8 + $0xce0] sm:$0xff]  ;;  %3653 = vmatpush1.bf16.msra.mxu1 %v8585_v61 }
  0xdc   : > { %v8578_v63 = vcombine.high %v759_v58, %v763_v59  ;;  %v623_v1 = vld [vmem:[%s9803_s8 + $0x880] sm:$0xff]  ;;  %3613 = vmatprep.subr.bf16.mxu0 %v8450_v62  ;;  %v8577_v6 = vcombine.low %v759_v58, %v763_v59 }
  0xdd   : > { %v627_v2 = vld [vmem:[%s9803_s8 + $0x8a0] sm:$0xff]  ;;  %3614 = vmatpush1.bf16.msra.mxu0 %v8449_v5 }
  0xde   : > { %v751_v3 = vld [vmem:[%s9803_s8 + $0xc80] sm:$0xff]  ;;  %v8442_v7 = vcombine.high %v623_v1, %v627_v2  ;;  %3654 = vmatprep.subr.bf16.mxu1 %v8578_v63  ;;  %v8441_v15 = vcombine.low %v623_v1, %v627_v2 }
  0xdf   : > { %v755_v4 = vld [vmem:[%s9803_s8 + $0xca0] sm:$0xff]  ;;  %3655 = vmatpush1.bf16.msra.mxu1 %v8577_v6 }
  0xe0   : > { %v8570_v8 = vcombine.high %v751_v3, %v755_v4  ;;  %v615_v9 = vld [vmem:[%s9803_s8 + $0x840] sm:$0xff]  ;;  %3615 = vmatprep.subr.bf16.mxu0 %v8442_v7  ;;  %v8569_v16 = vcombine.low %v751_v3, %v755_v4 }
  0xe1   : > { %v619_v11 = vld [vmem:[%s9803_s8 + $0x860] sm:$0xff]  ;;  %3616 = vmatpush1.bf16.msra.mxu0 %v8441_v15 }
  0xe2   : > { %v743_v12 = vld [vmem:[%s9803_s8 + $0xc40] sm:$0xff]  ;;  %v8434_v17 = vcombine.high %v615_v9, %v619_v11  ;;  %3656 = vmatprep.subr.bf16.mxu1 %v8570_v8  ;;  %v8433_v23 = vcombine.low %v615_v9, %v619_v11 }
  0xe3   : > { %v747_v13 = vld [vmem:[%s9803_s8 + $0xc60] sm:$0xff]  ;;  %3657 = vmatpush1.bf16.msra.mxu1 %v8569_v16 }
  0xe4   : > { %v8562_v18 = vcombine.high %v743_v12, %v747_v13  ;;  %v607_v19 = vld [vmem:[%s9803_s8 + $0x800] sm:$0xff]  ;;  %3617 = vmatprep.subr.bf16.mxu0 %v8434_v17  ;;  %v8561_v25 = vcombine.low %v743_v12, %v747_v13 }
  0xe5   : > { %v611_v20 = vld [vmem:[%s9803_s8 + $0x820] sm:$0xff]  ;;  %3618 = vmatpush1.bf16.msra.mxu0 %v8433_v23 }
  0xe6   : > { %v735_v21 = vld [vmem:[%s9803_s8 + $0xc00] sm:$0xff]  ;;  %v8426_v26 = vcombine.high %v607_v19, %v611_v20  ;;  %3658 = vmatprep.subr.bf16.mxu1 %v8562_v18  ;;  %v8425_v34 = vcombine.low %v607_v19, %v611_v20 }
  0xe7   : > { %v739_v22 = vld [vmem:[%s9803_s8 + $0xc20] sm:$0xff]  ;;  %3659 = vmatpush1.bf16.msra.mxu1 %v8561_v25 }
  0xe8   : > { %v8554_v27 = vcombine.high %v735_v21, %v739_v22  ;;  %v727_v28 = vld [vmem:[%s9803_s8 + $0xbc0] sm:$0xff]  ;;  %3619 = vmatprep.subr.bf16.mxu0 %v8426_v26  ;;  %v8553_v35 = vcombine.low %v735_v21, %v739_v22 }
  0xe9   : > { %v731_v30 = vld [vmem:[%s9803_s8 + $0xbe0] sm:$0xff]  ;;  %3620 = vmatpush1.bf16.msra.mxu0 %v8425_v34 }
  0xea   : > { %v855_v31 = vld [vmem:[%s9803_s8 + $0xfc0] sm:$0xff]  ;;  %v8546_v36 = vcombine.high %v727_v28, %v731_v30  ;;  %3660 = vmatprep.subr.bf16.mxu1 %v8554_v27  ;;  %v8545_v42 = vcombine.low %v727_v28, %v731_v30 }
  0xeb   : > { %v859_v29 = vld [vmem:[%s9803_s8 + $0xfe0] sm:$0xff]  ;;  %3661 = vmatpush1.bf16.msra.mxu1 %v8553_v35 }
  0xec   : > { %v8674_v37 = vcombine.high %v855_v31, %v859_v29  ;;  %v719_v38 = vld [vmem:[%s9803_s8 + $0xb80] sm:$0xff]  ;;  %3621 = vmatprep.subr.bf16.mxu0 %v8546_v36  ;;  %v8673_v43 = vcombine.low %v855_v31, %v859_v29 }
  0xed   : > { %v723_v39 = vld [vmem:[%s9803_s8 + $0xba0] sm:$0xff]  ;;  %3622 = vmatpush2.bf16.msra.mxu0 %v8545_v42 }
  0xee   : > { %v847_v54 = vld [vmem:[%s9803_s8 + $0xf80] sm:$0xff]  ;;  %v8538_v45 = vcombine.high %v719_v38, %v723_v39  ;;  %3662 = vmatprep.subr.bf16.mxu1 %v8674_v37  ;;  %v8537_v51 = vcombine.low %v719_v38, %v723_v39  ;;  %v408_v38 = vld [vmem:[%s9803_s8 + $0x1c8] sm:$0xff] }
  0xef   : > { %v851_v40 = vld [vmem:[%s9803_s8 + $0xfa0] sm:$0xff]  ;;  %3663 = vmatpush2.bf16.msra.mxu1 %v8673_v43  ;;  %v412_v39 = vld [vmem:[%s9803_s8 + $0x1e8] sm:$0xff] }
  0xf0   : > { %v8666_v46 = vcombine.high %v847_v54, %v851_v40  ;;  %v711_v47 = vld [vmem:[%s9803_s8 + $0xb40] sm:$0xff]  ;;  %3623 = vmatprep.subr.bf16.mxu0 %v8538_v45  ;;  %v8665_v52 = vcombine.low %v847_v54, %v851_v40  ;;  %v536_v54 = vld [vmem:[%s9803_s8 + $0x5c8] sm:$0xff]  ;;  %v8228_v45 = vcombine.high %v408_v38, %v412_v39 }
  0xf1   : > { %v715_v48 = vld [vmem:[%s9803_s8 + $0xb60] sm:$0xff]  ;;  %3624 = vmatpush2.bf16.msra.mxu0 %v8537_v51  ;;  %v540_v40 = vld [vmem:[%s9803_s8 + $0x5e8] sm:$0xff]  ;;  %v10008_v51 = vcombine.high %v9891_v33, %v9891_v33 }
  0xf2   : > { %v839_v49 = vld [vmem:[%s9803_s8 + $0xf40] sm:$0xff]  ;;  %v8530_v53 = vcombine.high %v711_v47, %v715_v48  ;;  %3664 = vmatprep.subr.bf16.mxu1 %v8666_v46  ;;  %v8529_v60 = vcombine.low %v711_v47, %v715_v48  ;;  %v8356_v46 = vcombine.high %v536_v54, %v540_v40  ;;  %v400_v47 = vld [vmem:[%s9803_s8 + $0x188] sm:$0xff] }
  0xf3   : > { %v843_v50 = vld [vmem:[%s9803_s8 + $0xf60] sm:$0xff]  ;;  %3665 = vmatpush2.bf16.msra.mxu1 %v8665_v52  ;;  %v404_v48 = vld [vmem:[%s9803_s8 + $0x1a8] sm:$0xff]  ;;  %v8227_v52 = vcombine.low %v408_v38, %v412_v39 }
  0xf4   : > { %v8658_v55 = vcombine.high %v839_v49, %v843_v50  ;;  %v703_v56 = vld [vmem:[%s9803_s8 + $0xb00] sm:$0xff]  ;;  %3625 = vmatprep.subr.bf16.mxu0 %v8530_v53  ;;  %v8657_v61 = vcombine.low %v839_v49, %v843_v50  ;;  %v528_v49 = vld [vmem:[%s9803_s8 + $0x588] sm:$0xff]  ;;  %v8355_v53 = vcombine.low %v536_v54, %v540_v40 }
  0xf5   : > { %v707_v57 = vld [vmem:[%s9803_s8 + $0xb20] sm:$0xff]  ;;  %3626 = vmatpush2.bf16.msra.mxu0 %v8529_v60  ;;  %v532_v50 = vld [vmem:[%s9803_s8 + $0x5a8] sm:$0xff] }
  0xf6   : > { %v831_v58 = vld [vmem:[%s9803_s8 + $0xf00] sm:$0xff]  ;;  %v8522_v62 = vcombine.high %v703_v56, %v707_v57  ;;  %3666 = vmatprep.subr.bf16.mxu1 %v8658_v55  ;;  %v8521_v5 = vcombine.low %v703_v56, %v707_v57  ;;  %v8220_v55 = vcombine.high %v400_v47, %v404_v48  ;;  %v8348_v56 = vcombine.high %v528_v49, %v532_v50  ;;  %v392_v57 = vld [vmem:[%s9803_s8 + $0x148] sm:$0xff] }
  0xf7   : > { %v835_v59 = vld [vmem:[%s9803_s8 + $0xf20] sm:$0xff]  ;;  %3667 = vmatpush2.bf16.msra.mxu1 %v8657_v61  ;;  %v524_v60 = vld [vmem:[%s9803_s8 + $0x568] sm:$0xff]  ;;  %v8219_v61 = vcombine.low %v400_v47, %v404_v48 }
  0xf8   : > { %v8650_v63 = vcombine.high %v831_v58, %v835_v59  ;;  %v695_v1 = vld [vmem:[%s9803_s8 + $0xac0] sm:$0xff]  ;;  %3627 = vmatprep.subr.bf16.mxu0 %v8522_v62  ;;  %v8649_v6 = vcombine.low %v831_v58, %v835_v59  ;;  %v396_v58 = vld [vmem:[%s9803_s8 + $0x168] sm:$0xff]  ;;  %v8347_v62 = vcombine.low %v528_v49, %v532_v50 }
  0xf9   : > { %v699_v2 = vld [vmem:[%s9803_s8 + $0xae0] sm:$0xff]  ;;  %3628 = vmatpush2.bf16.msra.mxu0 %v8521_v5  ;;  %v520_v59 = vld [vmem:[%s9803_s8 + $0x548] sm:$0xff] }
  0xfa   : > { %v823_v3 = vld [vmem:[%s9803_s8 + $0xec0] sm:$0xff]  ;;  %v8514_v7 = vcombine.high %v695_v1, %v699_v2  ;;  %3668 = vmatprep.subr.bf16.mxu1 %v8650_v63  ;;  %v8513_v15 = vcombine.low %v695_v1, %v699_v2  ;;  %v8212_v63 = vcombine.high %v392_v57, %v396_v58  ;;  %v8340_v1 = vcombine.high %v520_v59, %v524_v60  ;;  %v384_v2 = vld [vmem:[%s9803_s8 + $0x108] sm:$0xff] }
  0xfb   : > { %v827_v4 = vld [vmem:[%s9803_s8 + $0xee0] sm:$0xff]  ;;  %3669 = vmatpush2.bf16.msra.mxu1 %v8649_v6  ;;  %v516_v5 = vld [vmem:[%s9803_s8 + $0x528] sm:$0xff]  ;;  %v8211_v6 = vcombine.low %v392_v57, %v396_v58 }
  0xfc   : > { %v8642_v8 = vcombine.high %v823_v3, %v827_v4  ;;  %v687_v9 = vld [vmem:[%s9803_s8 + $0xa80] sm:$0xff]  ;;  %3629 = vmatprep.subr.bf16.mxu0 %v8514_v7  ;;  %v8641_v16 = vcombine.low %v823_v3, %v827_v4  ;;  %v388_v3 = vld [vmem:[%s9803_s8 + $0x128] sm:$0xff]  ;;  %v8339_v7 = vcombine.low %v520_v59, %v524_v60 }
  0xfd   : > { %v691_v11 = vld [vmem:[%s9803_s8 + $0xaa0] sm:$0xff]  ;;  %3630 = vmatpush2.bf16.msra.mxu0 %v8513_v15  ;;  %v512_v4 = vld [vmem:[%s9803_s8 + $0x508] sm:$0xff] }
  0xfe   : > { %v815_v12 = vld [vmem:[%s9803_s8 + $0xe80] sm:$0xff]  ;;  %v8506_v17 = vcombine.high %v687_v9, %v691_v11  ;;  %3670 = vmatprep.subr.bf16.mxu1 %v8642_v8  ;;  %v8505_v23 = vcombine.low %v687_v9, %v691_v11  ;;  %v8204_v8 = vcombine.high %v384_v2, %v388_v3  ;;  %v8332_v9 = vcombine.high %v512_v4, %v516_v5  ;;  %v376_v11 = vld [vmem:[%s9803_s8 + $0xc8] sm:$0xff] }
  0xff   : > { %v819_v13 = vld [vmem:[%s9803_s8 + $0xea0] sm:$0xff]  ;;  %3671 = vmatpush2.bf16.msra.mxu1 %v8641_v16  ;;  %v508_v15 = vld [vmem:[%s9803_s8 + $0x4e8] sm:$0xff]  ;;  %v8203_v16 = vcombine.low %v384_v2, %v388_v3 }
 0x100   : > { %v8634_v18 = vcombine.high %v815_v12, %v819_v13  ;;  %v679_v19 = vld [vmem:[%s9803_s8 + $0xa40] sm:$0xff]  ;;  %3631 = vmatprep.subr.bf16.mxu0 %v8506_v17  ;;  %v8633_v25 = vcombine.low %v815_v12, %v819_v13  ;;  %v380_v12 = vld [vmem:[%s9803_s8 + $0xe8] sm:$0xff]  ;;  %v8331_v17 = vcombine.low %v512_v4, %v516_v5 }
 0x101   : > { %v683_v20 = vld [vmem:[%s9803_s8 + $0xa60] sm:$0xff]  ;;  %3632 = vmatpush2.bf16.msra.mxu0 %v8505_v23  ;;  %v504_v13 = vld [vmem:[%s9803_s8 + $0x4c8] sm:$0xff] }
 0x102   : > { %v807_v21 = vld [vmem:[%s9803_s8 + $0xe40] sm:$0xff]  ;;  %v8498_v26 = vcombine.high %v679_v19, %v683_v20  ;;  %3672 = vmatprep.subr.bf16.mxu1 %v8634_v18  ;;  %v8497_v34 = vcombine.low %v679_v19, %v683_v20  ;;  %v8196_v18 = vcombine.high %v376_v11, %v380_v12  ;;  %v8324_v19 = vcombine.high %v504_v13, %v508_v15  ;;  %v368_v20 = vld [vmem:[%s9803_s8 + $0x88] sm:$0xff] }
 0x103   : > { %v811_v22 = vld [vmem:[%s9803_s8 + $0xe60] sm:$0xff]  ;;  %3673 = vmatpush2.bf16.msra.mxu1 %v8633_v25  ;;  %v500_v23 = vld [vmem:[%s9803_s8 + $0x4a8] sm:$0xff]  ;;  %v8195_v25 = vcombine.low %v376_v11, %v380_v12 }
 0x104   : > { %v8626_v27 = vcombine.high %v807_v21, %v811_v22  ;;  %v671_v28 = vld [vmem:[%s9803_s8 + $0xa00] sm:$0xff]  ;;  %3633 = vmatprep.subr.bf16.mxu0 %v8498_v26  ;;  %v8625_v35 = vcombine.low %v807_v21, %v811_v22  ;;  %v372_v21 = vld [vmem:[%s9803_s8 + $0xa8] sm:$0xff]  ;;  %v8323_v26 = vcombine.low %v504_v13, %v508_v15 }
 0x105   : > { %v675_v30 = vld [vmem:[%s9803_s8 + $0xa20] sm:$0xff]  ;;  %3634 = vmatpush2.bf16.msra.mxu0 %v8497_v34  ;;  %v496_v22 = vld [vmem:[%s9803_s8 + $0x488] sm:$0xff] }
 0x106   : > { %v799_v31 = vld [vmem:[%s9803_s8 + $0xe00] sm:$0xff]  ;;  %v8490_v36 = vcombine.high %v671_v28, %v675_v30  ;;  %3674 = vmatprep.subr.bf16.mxu1 %v8626_v27  ;;  %v8489_v42 = vcombine.low %v671_v28, %v675_v30  ;;  %v8188_v27 = vcombine.high %v368_v20, %v372_v21  ;;  %v8316_v28 = vcombine.high %v496_v22, %v500_v23  ;;  %v360_v30 = vld [vmem:[%s9803_s8 + $0x48] sm:$0xff] }
 0x107   : > { %v803_v29 = vld [vmem:[%s9803_s8 + $0xe20] sm:$0xff]  ;;  %3675 = vmatpush2.bf16.msra.mxu1 %v8625_v35  ;;  %v492_v34 = vld [vmem:[%s9803_s8 + $0x468] sm:$0xff]  ;;  %v8187_v35 = vcombine.low %v368_v20, %v372_v21 }
 0x108   : > { %v8618_v37 = vcombine.high %v799_v31, %v803_v29  ;;  %3635 = vmatprep.subr.bf16.mxu0 %v8490_v36  ;;  %v8617_v43 = vcombine.low %v799_v31, %v803_v29  ;;  %v364_v31 = vld [vmem:[%s9803_s8 + $0x68] sm:$0xff]  ;;  %v8315_v36 = vcombine.low %v496_v22, %v500_v23 }
 0x109   : > { %3636 = vmatpush2.bf16.msra.mxu0 %v8489_v42  ;;  %v488_v29 = vld [vmem:[%s9803_s8 + $0x448] sm:$0xff] }
 0x10a   : > { %3676 = vmatprep.subr.bf16.mxu1 %v8618_v37  ;;  %3687 = vmatprep.subr.bf16.mxu0 %v8228_v45  ;;  %v8180_v37 = vcombine.high %v360_v30, %v364_v31  ;;  %v8308_v38 = vcombine.high %v488_v29, %v492_v34  ;;  %v352_v39 = vld [vmem:[%s9803_s8 + $0x8] sm:$0xff]  ;;  %v8307_v45 = vcombine.low %v488_v29, %v492_v34 }
 0x10b   : > { %3677 = vmatpush2.bf16.msra.mxu1 %v8617_v43  ;;  %v356_v54 = vld [vmem:[%s9803_s8 + $0x28] sm:$0xff]  ;;  %v8179_v43 = vcombine.low %v360_v30, %v364_v31 }
 0x10c   : > { %3728 = vmatprep.subr.bf16.mxu1 %v8356_v46  ;;  %3638 = vmatmul.mubr.bf16.vlgmr.msra.gmra.mxu0 %v9891_v33  ;;  %v480_v40 = vld [vmem:[%s9803_s8 + $0x408] sm:$0xff]  ;;  %v8172_v46 = vcombine.high %v352_v39, %v356_v54 }
 0x10d   : > { %3688 = vmatpush1.bf16.msra.mxu0 %v8227_v52  ;;  %3719 = vmatprep.mubr.bf16.mxu0 %v9868_v10  ;;  %v484_v42 = vld [vmem:[%s9803_s8 + $0x428] sm:$0xff] }
 0x10e   : > { %3679 = vmatmul.mubr.bf16.vlgmr.msra.gmra.mxu1 %v10008_v51  ;;  %3689 = vmatprep.subr.bf16.mxu0 %v8220_v55  ;;  %v8300_v47 = vcombine.high %v480_v40, %v484_v42  ;;  %v472_v48 = vld [vmem:[%s9803_s8 + $0x3c8] sm:$0xff]  ;;  %v8299_v55 = vcombine.low %v480_v40, %v484_v42 }
 0x10f   : > { %3729 = vmatpush1.bf16.msra.mxu1 %v8355_v53  ;;  %3760 = vmatprep.mubr.bf16.mxu1 %v9875_v14  ;;  %v476_v49 = vld [vmem:[%s9803_s8 + $0x3e8] sm:$0xff]  ;;  %v8171_v53 = vcombine.low %v352_v39, %v356_v54 }
 0x110   : > { %3730 = vmatprep.subr.bf16.mxu1 %v8348_v56  ;;  %v600_v50 = vld [vmem:[%s9803_s8 + $0x7c8] sm:$0xff]  ;;  %v8292_v56 = vcombine.high %v472_v48, %v476_v49 }
 0x111   : > { %3690 = vmatpush1.bf16.msra.mxu0 %v8219_v61  ;;  %v604_v52 = vld [vmem:[%s9803_s8 + $0x7e8] sm:$0xff] }
 0x112   : > { %3691 = vmatprep.subr.bf16.mxu0 %v8212_v63  ;;  %v8420_v57 = vcombine.high %v600_v50, %v604_v52  ;;  %v464_v58 = vld [vmem:[%s9803_s8 + $0x388] sm:$0xff]  ;;  %v8419_v63 = vcombine.low %v600_v50, %v604_v52 }
 0x113   : > { %3731 = vmatpush1.bf16.msra.mxu1 %v8347_v62  ;;  %v468_v59 = vld [vmem:[%s9803_s8 + $0x3a8] sm:$0xff]  ;;  %v8291_v62 = vcombine.low %v472_v48, %v476_v49 }
 0x114   : > { %3732 = vmatprep.subr.bf16.mxu1 %v8340_v1  ;;  %v592_v60 = vld [vmem:[%s9803_s8 + $0x788] sm:$0xff]  ;;  %v8284_v1 = vcombine.high %v464_v58, %v468_v59 }
 0x115   : > { %3692 = vmatpush1.bf16.msra.mxu0 %v8211_v6  ;;  %v596_v61 = vld [vmem:[%s9803_s8 + $0x7a8] sm:$0xff] }
 0x116   : > { %3693 = vmatprep.subr.bf16.mxu0 %v8204_v8  ;;  %v8412_v2 = vcombine.high %v592_v60, %v596_v61  ;;  %v456_v3 = vld [vmem:[%s9803_s8 + $0x348] sm:$0xff]  ;;  %v8411_v8 = vcombine.low %v592_v60, %v596_v61 }
 0x117   : > { %3733 = vmatpush1.bf16.msra.mxu1 %v8339_v7  ;;  %v460_v4 = vld [vmem:[%s9803_s8 + $0x368] sm:$0xff]  ;;  %v8283_v7 = vcombine.low %v464_v58, %v468_v59 }
 0x118   : > { %3734 = vmatprep.subr.bf16.mxu1 %v8332_v9  ;;  %v584_v5 = vld [vmem:[%s9803_s8 + $0x748] sm:$0xff]  ;;  %v8276_v9 = vcombine.high %v456_v3, %v460_v4 }
 0x119   : > { %3694 = vmatpush1.bf16.msra.mxu0 %v8203_v16  ;;  %v588_v6 = vld [vmem:[%s9803_s8 + $0x768] sm:$0xff] }
 0x11a   : > { %3695 = vmatprep.subr.bf16.mxu0 %v8196_v18  ;;  %v8404_v11 = vcombine.high %v584_v5, %v588_v6  ;;  %v448_v12 = vld [vmem:[%s9803_s8 + $0x308] sm:$0xff]  ;;  %v8403_v18 = vcombine.low %v584_v5, %v588_v6 }
 0x11b   : > { %3735 = vmatpush1.bf16.msra.mxu1 %v8331_v17  ;;  %v452_v13 = vld [vmem:[%s9803_s8 + $0x328] sm:$0xff]  ;;  %v8275_v17 = vcombine.low %v456_v3, %v460_v4 }
 0x11c   : > { %3736 = vmatprep.subr.bf16.mxu1 %v8324_v19  ;;  %v576_v15 = vld [vmem:[%s9803_s8 + $0x708] sm:$0xff]  ;;  %v8268_v19 = vcombine.high %v448_v12, %v452_v13 }
 0x11d   : > { %3696 = vmatpush1.bf16.msra.mxu0 %v8195_v25  ;;  %v580_v16 = vld [vmem:[%s9803_s8 + $0x728] sm:$0xff] }
 0x11e   : > { %3697 = vmatprep.subr.bf16.mxu0 %v8188_v27  ;;  %v8396_v20 = vcombine.high %v576_v15, %v580_v16  ;;  %v440_v21 = vld [vmem:[%s9803_s8 + $0x2c8] sm:$0xff]  ;;  %v8395_v27 = vcombine.low %v576_v15, %v580_v16 }
 0x11f   : > { %3737 = vmatpush1.bf16.msra.mxu1 %v8323_v26  ;;  %v444_v22 = vld [vmem:[%s9803_s8 + $0x2e8] sm:$0xff]  ;;  %v8267_v26 = vcombine.low %v448_v12, %v452_v13 }
 0x120   : > { %3738 = vmatprep.subr.bf16.mxu1 %v8316_v28  ;;  %v568_v23 = vld [vmem:[%s9803_s8 + $0x6c8] sm:$0xff]  ;;  %v8260_v28 = vcombine.high %v440_v21, %v444_v22 }
 0x121   : > { %3698 = vmatpush1.bf16.msra.mxu0 %v8187_v35  ;;  %v572_v25 = vld [vmem:[%s9803_s8 + $0x6e8] sm:$0xff] }
 0x122   : > { %3699 = vmatprep.subr.bf16.mxu0 %v8180_v37  ;;  %v8388_v30 = vcombine.high %v568_v23, %v572_v25  ;;  %v432_v31 = vld [vmem:[%s9803_s8 + $0x288] sm:$0xff]  ;;  %v8387_v37 = vcombine.low %v568_v23, %v572_v25 }
 0x123   : > { %3739 = vmatpush1.bf16.msra.mxu1 %v8315_v36  ;;  %v436_v29 = vld [vmem:[%s9803_s8 + $0x2a8] sm:$0xff]  ;;  %v8259_v36 = vcombine.low %v440_v21, %v444_v22 }
 0x124   : > { %3740 = vmatprep.subr.bf16.mxu1 %v8308_v38  ;;  %v560_v34 = vld [vmem:[%s9803_s8 + $0x688] sm:$0xff]  ;;  %v8252_v38 = vcombine.high %v432_v31, %v436_v29 }
 0x125   : > { %3700 = vmatpush1.bf16.msra.mxu0 %v8179_v43  ;;  %v564_v35 = vld [vmem:[%s9803_s8 + $0x6a8] sm:$0xff] }
 0x126   : > { %3701 = vmatprep.subr.bf16.mxu0 %v8172_v46  ;;  %v8380_v39 = vcombine.high %v560_v34, %v564_v35  ;;  %v424_v54 = vld [vmem:[%s9803_s8 + $0x248] sm:$0xff]  ;;  %v8379_v46 = vcombine.low %v560_v34, %v564_v35 }
 0x127   : > { %3741 = vmatpush1.bf16.msra.mxu1 %v8307_v45  ;;  %v428_v40 = vld [vmem:[%s9803_s8 + $0x268] sm:$0xff]  ;;  %v8251_v45 = vcombine.low %v432_v31, %v436_v29 }
 0x128   : > { %3742 = vmatprep.subr.bf16.mxu1 %v8300_v47  ;;  %v552_v42 = vld [vmem:[%s9803_s8 + $0x648] sm:$0xff]  ;;  %v8244_v47 = vcombine.high %v424_v54, %v428_v40 }
 0x129   : > { %3702 = vmatpush1.bf16.msra.mxu0 %v8171_v53  ;;  %v556_v43 = vld [vmem:[%s9803_s8 + $0x668] sm:$0xff] }
 0x12a   : > { %3703 = vmatprep.subr.bf16.mxu0 %v8292_v56  ;;  %v8372_v48 = vcombine.high %v552_v42, %v556_v43  ;;  %v416_v49 = vld [vmem:[%s9803_s8 + $0x208] sm:$0xff]  ;;  %v8371_v56 = vcombine.low %v552_v42, %v556_v43 }
 0x12b   : > { %3743 = vmatpush1.bf16.msra.mxu1 %v8299_v55  ;;  %v420_v50 = vld [vmem:[%s9803_s8 + $0x228] sm:$0xff]  ;;  %v8243_v55 = vcombine.low %v424_v54, %v428_v40 }
 0x12c   : > { %3744 = vmatprep.subr.bf16.mxu1 %v8420_v57  ;;  %v544_v52 = vld [vmem:[%s9803_s8 + $0x608] sm:$0xff]  ;;  %v8236_v57 = vcombine.high %v416_v49, %v420_v50 }
 0x12d   : > { %3704 = vmatpush2.bf16.msra.mxu0 %v8291_v62  ;;  %v548_v53 = vld [vmem:[%s9803_s8 + $0x628] sm:$0xff] }
 0x12e   : > { %3705 = vmatprep.subr.bf16.mxu0 %v8284_v1  ;;  %v8364_v58 = vcombine.high %v544_v52, %v548_v53  ;;  %v664_v59 = vld [vmem:[%s9803_s8 + $0x9c8] sm:$0xff]  ;;  %v8363_v1 = vcombine.low %v544_v52, %v548_v53 }
 0x12f   : > { %3745 = vmatpush2.bf16.msra.mxu1 %v8419_v63  ;;  %v668_v60 = vld [vmem:[%s9803_s8 + $0x9e8] sm:$0xff]  ;;  %v8235_v63 = vcombine.low %v416_v49, %v420_v50 }
 0x130   : > { %3746 = vmatprep.subr.bf16.mxu1 %v8412_v2  ;;  %v792_v61 = vld [vmem:[%s9803_s8 + $0xdc8] sm:$0xff]  ;;  %v8484_v2 = vcombine.high %v664_v59, %v668_v60 }
 0x131   : > { %3706 = vmatpush2.bf16.msra.mxu0 %v8283_v7  ;;  %v796_v62 = vld [vmem:[%s9803_s8 + $0xde8] sm:$0xff] }
 0x132   : > { %3707 = vmatprep.subr.bf16.mxu0 %v8276_v9  ;;  %v8612_v3 = vcombine.high %v792_v61, %v796_v62  ;;  %v656_v4 = vld [vmem:[%s9803_s8 + $0x988] sm:$0xff]  ;;  %v8611_v9 = vcombine.low %v792_v61, %v796_v62 }
 0x133   : > { %3747 = vmatpush2.bf16.msra.mxu1 %v8411_v8  ;;  %v660_v5 = vld [vmem:[%s9803_s8 + $0x9a8] sm:$0xff]  ;;  %v8483_v8 = vcombine.low %v664_v59, %v668_v60 }
 0x134   : > { %3748 = vmatprep.subr.bf16.mxu1 %v8404_v11  ;;  %v784_v6 = vld [vmem:[%s9803_s8 + $0xd88] sm:$0xff]  ;;  %v8476_v11 = vcombine.high %v656_v4, %v660_v5 }
 0x135   : > { %3708 = vmatpush2.bf16.msra.mxu0 %v8275_v17  ;;  %v788_v7 = vld [vmem:[%s9803_s8 + $0xda8] sm:$0xff] }
 0x136   : > { %3709 = vmatprep.subr.bf16.mxu0 %v8268_v19  ;;  %v8604_v12 = vcombine.high %v784_v6, %v788_v7  ;;  %v648_v13 = vld [vmem:[%s9803_s8 + $0x948] sm:$0xff]  ;;  %v8603_v19 = vcombine.low %v784_v6, %v788_v7 }
 0x137   : > { %3749 = vmatpush2.bf16.msra.mxu1 %v8403_v18  ;;  %v652_v15 = vld [vmem:[%s9803_s8 + $0x968] sm:$0xff]  ;;  %v8475_v18 = vcombine.low %v656_v4, %v660_v5 }
 0x138   : > { %3750 = vmatprep.subr.bf16.mxu1 %v8396_v20  ;;  %v776_v16 = vld [vmem:[%s9803_s8 + $0xd48] sm:$0xff]  ;;  %v8468_v20 = vcombine.high %v648_v13, %v652_v15 }
 0x139   : > { %3710 = vmatpush2.bf16.msra.mxu0 %v8267_v26  ;;  %v780_v17 = vld [vmem:[%s9803_s8 + $0xd68] sm:$0xff] }
 0x13a   : > { %3711 = vmatprep.subr.bf16.mxu0 %v8260_v28  ;;  %v8596_v21 = vcombine.high %v776_v16, %v780_v17  ;;  %v640_v22 = vld [vmem:[%s9803_s8 + $0x908] sm:$0xff]  ;;  %v8595_v28 = vcombine.low %v776_v16, %v780_v17 }
 0x13b   : > { %3751 = vmatpush2.bf16.msra.mxu1 %v8395_v27  ;;  %v644_v23 = vld [vmem:[%s9803_s8 + $0x928] sm:$0xff]  ;;  %v8467_v27 = vcombine.low %v648_v13, %v652_v15 }
 0x13c   : > { %3752 = vmatprep.subr.bf16.mxu1 %v8388_v30  ;;  %v768_v25 = vld [vmem:[%s9803_s8 + $0xd08] sm:$0xff]  ;;  %v8460_v30 = vcombine.high %v640_v22, %v644_v23 }
 0x13d   : > { %3712 = vmatpush2.bf16.msra.mxu0 %v8259_v36  ;;  %v772_v26 = vld [vmem:[%s9803_s8 + $0xd28] sm:$0xff] }
 0x13e   : > { %3713 = vmatprep.subr.bf16.mxu0 %v8252_v38  ;;  %v8588_v31 = vcombine.high %v768_v25, %v772_v26  ;;  %v632_v29 = vld [vmem:[%s9803_s8 + $0x8c8] sm:$0xff]  ;;  %v8587_v38 = vcombine.low %v768_v25, %v772_v26 }
 0x13f   : > { %3753 = vmatpush2.bf16.msra.mxu1 %v8387_v37  ;;  %v636_v34 = vld [vmem:[%s9803_s8 + $0x8e8] sm:$0xff]  ;;  %v8459_v37 = vcombine.low %v640_v22, %v644_v23 }
 0x140   : > { %3754 = vmatprep.subr.bf16.mxu1 %v8380_v39  ;;  %v760_v35 = vld [vmem:[%s9803_s8 + $0xcc8] sm:$0xff]  ;;  %v8452_v39 = vcombine.high %v632_v29, %v636_v34 }
 0x141   : > { %3714 = vmatpush2.bf16.msra.mxu0 %v8251_v45  ;;  %v764_v36 = vld [vmem:[%s9803_s8 + $0xce8] sm:$0xff] }
 0x142   : > { %3715 = vmatprep.subr.bf16.mxu0 %v8244_v47  ;;  %v8580_v54 = vcombine.high %v760_v35, %v764_v36  ;;  %v624_v40 = vld [vmem:[%s9803_s8 + $0x888] sm:$0xff]  ;;  %v8579_v47 = vcombine.low %v760_v35, %v764_v36 }
 0x143   : > { %3755 = vmatpush2.bf16.msra.mxu1 %v8379_v46  ;;  %v628_v42 = vld [vmem:[%s9803_s8 + $0x8a8] sm:$0xff]  ;;  %v8451_v46 = vcombine.low %v632_v29, %v636_v34 }
 0x144   : > { %3756 = vmatprep.subr.bf16.mxu1 %v8372_v48  ;;  %v752_v43 = vld [vmem:[%s9803_s8 + $0xc88] sm:$0xff]  ;;  %v8444_v48 = vcombine.high %v624_v40, %v628_v42 }
 0x145   : > { %3716 = vmatpush2.bf16.msra.mxu0 %v8243_v55  ;;  %v756_v45 = vld [vmem:[%s9803_s8 + $0xca8] sm:$0xff] }
 0x146   : > { %3717 = vmatprep.subr.bf16.mxu0 %v8236_v57  ;;  %v8572_v49 = vcombine.high %v752_v43, %v756_v45  ;;  %v616_v50 = vld [vmem:[%s9803_s8 + $0x848] sm:$0xff]  ;;  %v8571_v57 = vcombine.low %v752_v43, %v756_v45 }
 0x147   : > { %3757 = vmatpush2.bf16.msra.mxu1 %v8371_v56  ;;  %v620_v52 = vld [vmem:[%s9803_s8 + $0x868] sm:$0xff]  ;;  %v8443_v56 = vcombine.low %v624_v40, %v628_v42 }
 0x148   : > { %3758 = vmatprep.subr.bf16.mxu1 %v8364_v58  ;;  %v744_v53 = vld [vmem:[%s9803_s8 + $0xc48] sm:$0xff]  ;;  %v8436_v58 = vcombine.high %v616_v50, %v620_v52 }
 0x149   : > { %3718 = vmatpush2.bf16.msra.mxu0 %v8235_v63  ;;  %v748_v55 = vld [vmem:[%s9803_s8 + $0xc68] sm:$0xff] }
 0x14a   : > { %3769 = vmatprep.subr.bf16.mxu0 %v8484_v2  ;;  %v8564_v59 = vcombine.high %v744_v53, %v748_v55  ;;  %v608_v60 = vld [vmem:[%s9803_s8 + $0x808] sm:$0xff]  ;;  %v8563_v2 = vcombine.low %v744_v53, %v748_v55 }
 0x14b   : > { %3759 = vmatpush2.bf16.msra.mxu1 %v8363_v1  ;;  %v612_v61 = vld [vmem:[%s9803_s8 + $0x828] sm:$0xff]  ;;  %v8435_v1 = vcombine.low %v616_v50, %v620_v52 }
 0x14c   : > { %3810 = vmatprep.subr.bf16.mxu1 %v8612_v3  ;;  %3720 = vmatmul.mubr.bf16.vlgmr.msra.gmra.mxu0 %v9921_v24  ;;  %v736_v62 = vld [vmem:[%s9803_s8 + $0xc08] sm:$0xff]  ;;  %v8428_v3 = vcombine.high %v608_v60, %v612_v61 }
 0x14d   : > { %3770 = vmatpush1.bf16.msra.mxu0 %v8483_v8  ;;  %3801 = vmatprep.mubr.bf16.mxu0 %v9928_v32  ;;  %v740_v63 = vld [vmem:[%s9803_s8 + $0xc28] sm:$0xff] }
 0x14e   : > { %3761 = vmatmul.mubr.bf16.vlgmr.msra.gmra.mxu1 %v9932_v0  ;;  %3771 = vmatprep.subr.bf16.mxu0 %v8476_v11  ;;  %v8556_v4 = vcombine.high %v736_v62, %v740_v63  ;;  %v728_v5 = vld [vmem:[%s9803_s8 + $0xbc8] sm:$0xff]  ;;  %v8555_v11 = vcombine.low %v736_v62, %v740_v63 }
 0x14f   : > { %3811 = vmatpush1.bf16.msra.mxu1 %v8611_v9  ;;  %3842 = vmatprep.mubr.bf16.mxu1 %v9941_v41  ;;  %v732_v6 = vld [vmem:[%s9803_s8 + $0xbe8] sm:$0xff]  ;;  %v8427_v9 = vcombine.low %v608_v60, %v612_v61 }
 0x150   : > { %3812 = vmatprep.subr.bf16.mxu1 %v8604_v12  ;;  %v856_v7 = vld [vmem:[%s9803_s8 + $0xfc8] sm:$0xff]  ;;  %v8548_v12 = vcombine.high %v728_v5, %v732_v6 }
 0x151   : > { %3772 = vmatpush1.bf16.msra.mxu0 %v8475_v18  ;;  %v860_v8 = vld [vmem:[%s9803_s8 + $0xfe8] sm:$0xff] }
 0x152   : > { %3773 = vmatprep.subr.bf16.mxu0 %v8468_v20  ;;  %v8676_v13 = vcombine.high %v856_v7, %v860_v8  ;;  %v720_v15 = vld [vmem:[%s9803_s8 + $0xb88] sm:$0xff]  ;;  %v8675_v20 = vcombine.low %v856_v7, %v860_v8 }
 0x153   : > { %3813 = vmatpush1.bf16.msra.mxu1 %v8603_v19  ;;  %v724_v16 = vld [vmem:[%s9803_s8 + $0xba8] sm:$0xff]  ;;  %v8547_v19 = vcombine.low %v728_v5, %v732_v6 }
 0x154   : > { %3814 = vmatprep.subr.bf16.mxu1 %v8596_v21  ;;  %v848_v17 = vld [vmem:[%s9803_s8 + $0xf88] sm:$0xff]  ;;  %v8540_v21 = vcombine.high %v720_v15, %v724_v16 }
 0x155   : > { %3774 = vmatpush1.bf16.msra.mxu0 %v8467_v27  ;;  %v852_v18 = vld [vmem:[%s9803_s8 + $0xfa8] sm:$0xff] }
 0x156   : > { %3775 = vmatprep.subr.bf16.mxu0 %v8460_v30  ;;  %v8668_v22 = vcombine.high %v848_v17, %v852_v18  ;;  %v712_v23 = vld [vmem:[%s9803_s8 + $0xb48] sm:$0xff]  ;;  %v8667_v30 = vcombine.low %v848_v17, %v852_v18  ;;  %v413_v17 = vld [vmem:[%s9803_s8 + $0x1f0] sm:$0xff] }
 0x157   : > { %3815 = vmatpush1.bf16.msra.mxu1 %v8595_v28  ;;  %v716_v25 = vld [vmem:[%s9803_s8 + $0xb68] sm:$0xff]  ;;  %v8539_v28 = vcombine.low %v720_v15, %v724_v16  ;;  %v409_v16 = vld [vmem:[%s9803_s8 + $0x1d0] sm:$0xff] }
 0x158   : > { %3816 = vmatprep.subr.bf16.mxu1 %v8588_v31  ;;  %v840_v26 = vld [vmem:[%s9803_s8 + $0xf48] sm:$0xff]  ;;  %v8532_v31 = vcombine.high %v712_v23, %v716_v25  ;;  %v537_v18 = vld [vmem:[%s9803_s8 + $0x5d0] sm:$0xff] }
 0x159   : > { %3776 = vmatpush1.bf16.msra.mxu0 %v8459_v37  ;;  %v844_v27 = vld [vmem:[%s9803_s8 + $0xf68] sm:$0xff] }
 0x15a   : > { %3777 = vmatprep.subr.bf16.mxu0 %v8452_v39  ;;  %v8660_v29 = vcombine.high %v840_v26, %v844_v27  ;;  %v704_v34 = vld [vmem:[%s9803_s8 + $0xb08] sm:$0xff]  ;;  %v8659_v39 = vcombine.low %v840_v26, %v844_v27  ;;  %v871_v27 = vsub.s32 1, %v9845_v44 }
 0x15b   : > { %3817 = vmatpush1.bf16.msra.mxu1 %v8587_v38  ;;  %v708_v35 = vld [vmem:[%s9803_s8 + $0xb28] sm:$0xff]  ;;  %v8531_v38 = vcombine.low %v712_v23, %v716_v25  ;;  %v8230_v25 = vcombine.high %v409_v16, %v413_v17 }
 0x15c   : > { %3818 = vmatprep.subr.bf16.mxu1 %v8580_v54  ;;  %v832_v36 = vld [vmem:[%s9803_s8 + $0xf08] sm:$0xff]  ;;  %v8524_v54 = vcombine.high %v704_v34, %v708_v35 }
 0x15d   : > { %3778 = vmatpush1.bf16.msra.mxu0 %v8451_v46  ;;  %v836_v37 = vld [vmem:[%s9803_s8 + $0xf28] sm:$0xff] }
 0x15e   : > { %3779 = vmatprep.subr.bf16.mxu0 %v8444_v48  ;;  %v8652_v40 = vcombine.high %v832_v36, %v836_v37  ;;  %v696_v42 = vld [vmem:[%s9803_s8 + $0xac8] sm:$0xff]  ;;  %v8651_v48 = vcombine.low %v832_v36, %v836_v37 }
 0x15f   : > { %3819 = vmatpush1.bf16.msra.mxu1 %v8579_v47  ;;  %v700_v43 = vld [vmem:[%s9803_s8 + $0xae8] sm:$0xff]  ;;  %v8523_v47 = vcombine.low %v704_v34, %v708_v35  ;;  %v8229_v35 = vcombine.low %v409_v16, %v413_v17 }
 0x160   : > { %3820 = vmatprep.subr.bf16.mxu1 %v8572_v49  ;;  %v824_v45 = vld [vmem:[%s9803_s8 + $0xec8] sm:$0xff]  ;;  %v8516_v49 = vcombine.high %v696_v42, %v700_v43 }
 0x161   : > { %3780 = vmatpush1.bf16.msra.mxu0 %v8443_v56  ;;  %v828_v46 = vld [vmem:[%s9803_s8 + $0xee8] sm:$0xff] }
 0x162   : > { %3781 = vmatprep.subr.bf16.mxu0 %v8436_v58  ;;  %v8644_v50 = vcombine.high %v824_v45, %v828_v46  ;;  %v688_v52 = vld [vmem:[%s9803_s8 + $0xa88] sm:$0xff]  ;;  %v8643_v58 = vcombine.low %v824_v45, %v828_v46  ;;  %v525_v45 = vld [vmem:[%s9803_s8 + $0x570] sm:$0xff] }
 0x163   : > { %3821 = vmatpush1.bf16.msra.mxu1 %v8571_v57  ;;  %v692_v53 = vld [vmem:[%s9803_s8 + $0xaa8] sm:$0xff]  ;;  %v8515_v57 = vcombine.low %v696_v42, %v700_v43  ;;  %v521_v43 = vld [vmem:[%s9803_s8 + $0x550] sm:$0xff] }
 0x164   : > { %3822 = vmatprep.subr.bf16.mxu1 %v8564_v59  ;;  %v816_v55 = vld [vmem:[%s9803_s8 + $0xe88] sm:$0xff]  ;;  %v8508_v59 = vcombine.high %v688_v52, %v692_v53 }
 0x165   : > { %3782 = vmatpush1.bf16.msra.mxu0 %v8435_v1  ;;  %v820_v56 = vld [vmem:[%s9803_s8 + $0xea8] sm:$0xff] }
 0x166   : > { %3783 = vmatprep.subr.bf16.mxu0 %v8428_v3  ;;  %v8636_v60 = vcombine.high %v816_v55, %v820_v56  ;;  %v680_v61 = vld [vmem:[%s9803_s8 + $0xa48] sm:$0xff]  ;;  %v8635_v3 = vcombine.low %v816_v55, %v820_v56 }
 0x167   : > { %3823 = vmatpush1.bf16.msra.mxu1 %v8563_v2  ;;  %v684_v62 = vld [vmem:[%s9803_s8 + $0xa68] sm:$0xff]  ;;  %v8507_v2 = vcombine.low %v688_v52, %v692_v53 }
 0x168   : > { %3824 = vmatprep.subr.bf16.mxu1 %v8556_v4  ;;  %v808_v63 = vld [vmem:[%s9803_s8 + $0xe48] sm:$0xff]  ;;  %v8500_v4 = vcombine.high %v680_v61, %v684_v62 }
 0x169   : > { %3784 = vmatpush1.bf16.msra.mxu0 %v8427_v9  ;;  %v812_v1 = vld [vmem:[%s9803_s8 + $0xe68] sm:$0xff] }
 0x16a   : > { %3785 = vmatprep.subr.bf16.mxu0 %v8548_v12  ;;  %v8628_v5 = vcombine.high %v808_v63, %v812_v1  ;;  %v672_v6 = vld [vmem:[%s9803_s8 + $0xa08] sm:$0xff]  ;;  %v8627_v12 = vcombine.low %v808_v63, %v812_v1 }
 0x16b   : > { %3825 = vmatpush1.bf16.msra.mxu1 %v8555_v11  ;;  %v676_v7 = vld [vmem:[%s9803_s8 + $0xa28] sm:$0xff]  ;;  %v8499_v11 = vcombine.low %v680_v61, %v684_v62  ;;  %v513_v61 = vld [vmem:[%s9803_s8 + $0x510] sm:$0xff] }
 0x16c   : > { %3826 = vmatprep.subr.bf16.mxu1 %v8676_v13  ;;  %v800_v8 = vld [vmem:[%s9803_s8 + $0xe08] sm:$0xff]  ;;  %v8492_v13 = vcombine.high %v672_v6, %v676_v7  ;;  %v517_v62 = vld [vmem:[%s9803_s8 + $0x530] sm:$0xff] }
 0x16d   : > { %3786 = vmatpush2.bf16.msra.mxu0 %v8547_v19  ;;  %v804_v9 = vld [vmem:[%s9803_s8 + $0xe28] sm:$0xff]  ;;  %v541_v19 = vld [vmem:[%s9803_s8 + $0x5f0] sm:$0xff] }
 0x16e   : > { %3787 = vmatprep.subr.bf16.mxu0 %v8540_v21  ;;  %v8620_v15 = vcombine.high %v800_v8, %v804_v9  ;;  %v867_v21 = vsub.s32 0, %v9845_v44  ;;  %v10144_v23 = vld [vmem:[%s9809_s14] sm:$0xff]  ;;  %v8358_v26 = vcombine.high %v537_v18, %v541_v19  ;;  %v8357_v36 = vcombine.low %v537_v18, %v541_v19  ;;  %v369_v18 = vld [vmem:[%s9803_s8 + $0x90] sm:$0xff] }
 0x16f   : > { %3827 = vmatpush2.bf16.msra.mxu1 %v8675_v20  ;;  %v8491_v20 = vcombine.low %v672_v6, %v676_v7  ;;  %v8334_v7 = vcombine.high %v513_v61, %v517_v62  ;;  %v373_v19 = vld [vmem:[%s9803_s8 + $0xb0] sm:$0xff] }
 0x170   : > { %3828 = vmatprep.subr.bf16.mxu1 %v8668_v22  ;;  %v8619_v22 = vcombine.low %v800_v8, %v804_v9  ;;  %v868_v34 = vrot.slane %v10144_v23, %v867_v21  ;;  %v377_v8 = vld [vmem:[%s9803_s8 + $0xd0] sm:$0xff] }
 0x171   : > { %3788 = vmatpush2.bf16.msra.mxu0 %v8539_v28  ;;  %v401_v28 = vld [vmem:[%s9803_s8 + $0x190] sm:$0xff] }
 0x172   : > { %3789 = vmatprep.subr.bf16.mxu0 %v8532_v31  ;;  %v529_v31 = vld [vmem:[%s9803_s8 + $0x590] sm:$0xff] }
 0x173   : > { %3829 = vmatpush2.bf16.msra.mxu1 %v8667_v30  ;;  %v405_v30 = vld [vmem:[%s9803_s8 + $0x1b0] sm:$0xff] }
 0x174   : > { %3830 = vmatprep.subr.bf16.mxu1 %v8660_v29  ;;  %v533_v29 = vld [vmem:[%s9803_s8 + $0x5b0] sm:$0xff]  ;;  %v8222_v37 = vcombine.high %v401_v28, %v405_v30 }
 0x175   : > { %3790 = vmatpush2.bf16.msra.mxu0 %v8531_v38  ;;  %v872_v38 = vrot.slane %v10144_v23, %v871_v27  ;;  %v381_v9 = vld [vmem:[%s9803_s8 + $0xf0] sm:$0xff] }
 0x176   : > { %3791 = vmatprep.subr.bf16.mxu0 %v8524_v54  ;;  %v393_v54 = vld [vmem:[%s9803_s8 + $0x150] sm:$0xff]  ;;  %v8198_v16 = vcombine.high %v377_v8, %v381_v9 }
 0x177   : > { %3831 = vmatpush2.bf16.msra.mxu1 %v8659_v39  ;;  %v8350_v39 = vcombine.high %v529_v31, %v533_v29  ;;  %v501_v21 = vld [vmem:[%s9803_s8 + $0x4b0] sm:$0xff] }
 0x178   : > { %3832 = vmatprep.subr.bf16.mxu1 %v8652_v40  ;;  %v397_v40 = vld [vmem:[%s9803_s8 + $0x170] sm:$0xff] }
 0x179   : > { %3792 = vmatpush2.bf16.msra.mxu0 %v8523_v47  ;;  %v8214_v52 = vcombine.high %v393_v54, %v397_v40 }
 0x17a   : > { %3793 = vmatprep.subr.bf16.mxu0 %v8516_v49 }
 0x17b   : > { %3833 = vmatpush2.bf16.msra.mxu1 %v8651_v48  ;;  %v8221_v48 = vcombine.low %v401_v28, %v405_v30  ;;  %v361_v28 = vld [vmem:[%s9803_s8 + $0x50] sm:$0xff] }
 0x17c   : > { %3834 = vmatprep.subr.bf16.mxu1 %v8644_v50  ;;  %v8349_v50 = vcombine.low %v529_v31, %v533_v29  ;;  %v365_v30 = vld [vmem:[%s9803_s8 + $0x70] sm:$0xff] }
 0x17d   : > { %3794 = vmatpush2.bf16.msra.mxu0 %v8515_v57  ;;  %v8342_v57 = vcombine.high %v521_v43, %v525_v45  ;;  %v489_v31 = vld [vmem:[%s9803_s8 + $0x450] sm:$0xff] }
 0x17e   : > { %3795 = vmatprep.subr.bf16.mxu0 %v8508_v59  ;;  %v389_v59 = vld [vmem:[%s9803_s8 + $0x130] sm:$0xff] }
 0x17f   : > { %3835 = vmatpush2.bf16.msra.mxu1 %v8643_v58  ;;  %v385_v58 = vld [vmem:[%s9803_s8 + $0x110] sm:$0xff] }
 0x180   : > { %3836 = vmatprep.subr.bf16.mxu1 %v8636_v60  ;;  %v493_v29 = vld [vmem:[%s9803_s8 + $0x470] sm:$0xff] }
 0x181   : > { %3796 = vmatpush2.bf16.msra.mxu0 %v8507_v2  ;;  %v8213_v2 = vcombine.low %v393_v54, %v397_v40  ;;  %v481_v54 = vld [vmem:[%s9803_s8 + $0x410] sm:$0xff] }
 0x182   : > { %3797 = vmatprep.subr.bf16.mxu0 %v8500_v4  ;;  %v8341_v4 = vcombine.low %v521_v43, %v525_v45  ;;  %v485_v40 = vld [vmem:[%s9803_s8 + $0x430] sm:$0xff]  ;;  %v8309_v43 = vcombine.low %v489_v31, %v493_v29 }
 0x183   : > { %3837 = vmatpush2.bf16.msra.mxu1 %v8635_v3 }
 0x184   : > { %3838 = vmatprep.subr.bf16.mxu1 %v8628_v5  ;;  %v8206_v5 = vcombine.high %v385_v58, %v389_v59 }
 0x185   : > { %3798 = vmatpush2.bf16.msra.mxu0 %v8499_v11  ;;  %v505_v11 = vld [vmem:[%s9803_s8 + $0x4d0] sm:$0xff] }
 0x186   : > { %3799 = vmatprep.subr.bf16.mxu0 %v8492_v13  ;;  %v8205_v13 = vcombine.low %v385_v58, %v389_v59  ;;  %v465_v58 = vld [vmem:[%s9803_s8 + $0x390] sm:$0xff] }
 0x187   : > { %3839 = vmatpush2.bf16.msra.mxu1 %v8627_v12  ;;  %v509_v12 = vld [vmem:[%s9803_s8 + $0x4f0] sm:$0xff] }
 0x188   : > { %3840 = vmatprep.subr.bf16.mxu1 %v8620_v15  ;;  %v8333_v15 = vcombine.low %v513_v61, %v517_v62  ;;  %v8326_v17 = vcombine.high %v505_v11, %v509_v12  ;;  %v469_v59 = vld [vmem:[%s9803_s8 + $0x3b0] sm:$0xff] }
 0x189   : > { %3800 = vmatpush2.bf16.msra.mxu0 %v8491_v20  ;;  %v497_v20 = vld [vmem:[%s9803_s8 + $0x490] sm:$0xff] }
 0x18a   : > { %3851 = vmatprep.subr.bf16.mxu0 %v8230_v25  ;;  %v8325_v25 = vcombine.low %v505_v11, %v509_v12  ;;  %v8318_v27 = vcombine.high %v497_v20, %v501_v21  ;;  %v597_v61 = vld [vmem:[%s9803_s8 + $0x7b0] sm:$0xff] }
 0x18b   : > { %3841 = vmatpush2.bf16.msra.mxu1 %v8619_v22  ;;  %v8197_v22 = vcombine.low %v377_v8, %v381_v9  ;;  %v8285_v8 = vcombine.low %v465_v58, %v469_v59 }
 0x18c   : > { %3892 = vmatprep.subr.bf16.mxu1 %v8358_v26  ;;  %v3557_v42 = vpop.f32.mrf.mxu0  ;;  %3802 = vmatmul.mubr.bf16.vlgmr.msra.gmra.mxu0 %v9891_v33  ;;  %v8190_v26 = vcombine.high %v369_v18, %v373_v19 }
 0x18d   : > { %v3558_v46 = vadd.f32 %v3557_v42, %v868_v34  ;;  %3852 = vmatpush1.bf16.msra.mxu0 %v8229_v35  ;;  %3883 = vmatprep.mubr.bf16.mxu0 %v9868_v10  ;;  %v8189_v34 = vcombine.low %v369_v18, %v373_v19  ;;  %v8317_v35 = vcombine.low %v497_v20, %v501_v21 }
 0x18e   : > { %v3598_v47 = vpop.f32.mrf.mxu1  ;;  %3843 = vmatmul.mubr.bf16.vlgmr.msra.gmra.mxu1 %v10008_v51  ;;  %v3559_v49 = vpop.f32.mrf.mxu0  ;;  %3853 = vmatprep.subr.bf16.mxu0 %v8222_v37  ;;  %v8310_v37 = vcombine.high %v489_v31, %v493_v29  ;;  %v8181_v42 = vcombine.low %v361_v28, %v365_v30 }
 0x18f   : > { %3893 = vmatpush1.bf16.msra.mxu1 %v8357_v36  ;;  %v10159_v53 = vadd.f32 %v3598_v47, %v3558_v46  ;;  %v3560_v55 = vadd.f32 %v3559_v49, %v872_v38  ;;  %3924 = vmatprep.mubr.bf16.mxu1 %v9875_v14  ;;  %v8182_v36 = vcombine.high %v361_v28, %v365_v30  ;;  %v353_v38 = vld [vmem:[%s9803_s8 + $0x10] sm:$0xff] }
 0x190   : > { %v3600_v56 = vpop.f32.mrf.mxu1  ;;  %3894 = vmatprep.subr.bf16.mxu1 %v8350_v39  ;;  %v3561_v60 = vpop.f32.mrf.mxu0  ;;  %v357_v39 = vld [vmem:[%s9803_s8 + $0x30] sm:$0xff]  ;;  %v8302_v46 = vcombine.high %v481_v54, %v485_v40 }
 0x191   : > { %v10167_v63 = vadd.f32 %v3600_v56, %v3560_v55  ;;  %3854 = vmatpush1.bf16.msra.mxu0 %v8221_v48  ;;  %v8174_v45 = vcombine.high %v353_v38, %v357_v39  ;;  %v473_v47 = vld [vmem:[%s9803_s8 + $0x3d0] sm:$0xff]  ;;  %v8301_v55 = vcombine.low %v481_v54, %v485_v40 }
 0x192   : > { %v3602_v1 = vpop.f32.mrf.mxu1  ;;  %v3562_v3 = vpop.f32.mrf.mxu0  ;;  %3855 = vmatprep.subr.bf16.mxu0 %v8214_v52  ;;  %v477_v48 = vld [vmem:[%s9803_s8 + $0x3f0] sm:$0xff]  ;;  %v8173_v52 = vcombine.low %v353_v38, %v357_v39 }
 0x193   : > { %3895 = vmatpush1.bf16.msra.mxu1 %v8349_v50  ;;  %v601_v49 = vld [vmem:[%s9803_s8 + $0x7d0] sm:$0xff]  ;;  %v8294_v56 = vcombine.high %v473_v47, %v477_v48  ;;  %v8293_v62 = vcombine.low %v473_v47, %v477_v48 }
 0x194   : > { %v3603_v6 = vpop.f32.mrf.mxu1  ;;  %3896 = vmatprep.subr.bf16.mxu1 %v8342_v57  ;;  %v605_v50 = vld [vmem:[%s9803_s8 + $0x7f0] sm:$0xff] }
 0x195   : > { %3856 = vmatpush1.bf16.msra.mxu0 %v8213_v2  ;;  %v8422_v57 = vcombine.high %v601_v49, %v605_v50  ;;  %v593_v60 = vld [vmem:[%s9803_s8 + $0x790] sm:$0xff]  ;;  %v8421_v1 = vcombine.low %v601_v49, %v605_v50  ;;  %v8286_v2 = vcombine.high %v465_v58, %v469_v59 }
 0x196   : > { %3857 = vmatprep.subr.bf16.mxu0 %v8206_v5  ;;  %v8414_v3 = vcombine.high %v593_v60, %v597_v61  ;;  %v461_v5 = vld [vmem:[%s9803_s8 + $0x370] sm:$0xff]  ;;  %v8413_v9 = vcombine.low %v593_v60, %v597_v61 }
 0x197   : > { %3897 = vmatpush1.bf16.msra.mxu1 %v8341_v4  ;;  %v457_v4 = vld [vmem:[%s9803_s8 + $0x350] sm:$0xff] }
 0x198   : > { %3898 = vmatprep.subr.bf16.mxu1 %v8334_v7  ;;  %v585_v6 = vld [vmem:[%s9803_s8 + $0x750] sm:$0xff]  ;;  %v8278_v11 = vcombine.high %v457_v4, %v461_v5  ;;  %v8277_v18 = vcombine.low %v457_v4, %v461_v5 }
 0x199   : > { %3858 = vmatpush1.bf16.msra.mxu0 %v8205_v13  ;;  %v589_v7 = vld [vmem:[%s9803_s8 + $0x770] sm:$0xff] }
 0x19a   : > { %3859 = vmatprep.subr.bf16.mxu0 %v8198_v16  ;;  %v8406_v12 = vcombine.high %v585_v6, %v589_v7  ;;  %v449_v13 = vld [vmem:[%s9803_s8 + $0x310] sm:$0xff]  ;;  %v8405_v19 = vcombine.low %v585_v6, %v589_v7 }
 0x19b   : > { %3899 = vmatpush1.bf16.msra.mxu1 %v8333_v15  ;;  %v453_v15 = vld [vmem:[%s9803_s8 + $0x330] sm:$0xff] }
 0x19c   : > { %3900 = vmatprep.subr.bf16.mxu1 %v8326_v17  ;;  %v577_v16 = vld [vmem:[%s9803_s8 + $0x710] sm:$0xff]  ;;  %v8270_v20 = vcombine.high %v449_v13, %v453_v15  ;;  %v8269_v28 = vcombine.low %v449_v13, %v453_v15 }
 0x19d   : > { %3860 = vmatpush1.bf16.msra.mxu0 %v8197_v22  ;;  %v581_v17 = vld [vmem:[%s9803_s8 + $0x730] sm:$0xff] }
 0x19e   : > { %3861 = vmatprep.subr.bf16.mxu0 %v8190_v26  ;;  %v8398_v21 = vcombine.high %v577_v16, %v581_v17  ;;  %v441_v22 = vld [vmem:[%s9803_s8 + $0x2d0] sm:$0xff]  ;;  %v8397_v30 = vcombine.low %v577_v16, %v581_v17 }
 0x19f   : > { %3901 = vmatpush1.bf16.msra.mxu1 %v8325_v25  ;;  %v445_v25 = vld [vmem:[%s9803_s8 + $0x2f0] sm:$0xff] }
 0x1a0   : > { %3902 = vmatprep.subr.bf16.mxu1 %v8318_v27  ;;  %v569_v26 = vld [vmem:[%s9803_s8 + $0x6d0] sm:$0xff]  ;;  %v8262_v31 = vcombine.high %v441_v22, %v445_v25  ;;  %v8261_v38 = vcombine.low %v441_v22, %v445_v25 }
 0x1a1   : > { %3862 = vmatpush1.bf16.msra.mxu0 %v8189_v34  ;;  %v573_v27 = vld [vmem:[%s9803_s8 + $0x6f0] sm:$0xff] }
 0x1a2   : > { %3863 = vmatprep.subr.bf16.mxu0 %v8182_v36  ;;  %v8390_v29 = vcombine.high %v569_v26, %v573_v27  ;;  %v433_v34 = vld [vmem:[%s9803_s8 + $0x290] sm:$0xff]  ;;  %v8389_v39 = vcombine.low %v569_v26, %v573_v27 }
 0x1a3   : > { %3903 = vmatpush1.bf16.msra.mxu1 %v8317_v35  ;;  %v437_v35 = vld [vmem:[%s9803_s8 + $0x2b0] sm:$0xff] }
 0x1a4   : > { %3904 = vmatprep.subr.bf16.mxu1 %v8310_v37  ;;  %v561_v36 = vld [vmem:[%s9803_s8 + $0x690] sm:$0xff]  ;;  %v8254_v54 = vcombine.high %v433_v34, %v437_v35  ;;  %v8253_v47 = vcombine.low %v433_v34, %v437_v35 }
 0x1a5   : > { %3864 = vmatpush1.bf16.msra.mxu0 %v8181_v42  ;;  %v565_v37 = vld [vmem:[%s9803_s8 + $0x6b0] sm:$0xff] }
 0x1a6   : > { %3865 = vmatprep.subr.bf16.mxu0 %v8174_v45  ;;  %v8382_v40 = vcombine.high %v561_v36, %v565_v37  ;;  %v425_v42 = vld [vmem:[%s9803_s8 + $0x250] sm:$0xff]  ;;  %v8381_v48 = vcombine.low %v561_v36, %v565_v37 }
 0x1a7   : > { %3905 = vmatpush1.bf16.msra.mxu1 %v8309_v43  ;;  %v429_v43 = vld [vmem:[%s9803_s8 + $0x270] sm:$0xff] }
 0x1a8   : > { %3906 = vmatprep.subr.bf16.mxu1 %v8302_v46  ;;  %v553_v45 = vld [vmem:[%s9803_s8 + $0x650] sm:$0xff]  ;;  %v8246_v49 = vcombine.high %v425_v42, %v429_v43  ;;  %v8245_v58 = vcombine.low %v425_v42, %v429_v43 }
 0x1a9   : > { %3866 = vmatpush1.bf16.msra.mxu0 %v8173_v52  ;;  %v557_v46 = vld [vmem:[%s9803_s8 + $0x670] sm:$0xff] }
 0x1aa   : > { %3867 = vmatprep.subr.bf16.mxu0 %v8294_v56  ;;  %v8374_v50 = vcombine.high %v553_v45, %v557_v46  ;;  %v417_v52 = vld [vmem:[%s9803_s8 + $0x210] sm:$0xff]  ;;  %v8373_v59 = vcombine.low %v553_v45, %v557_v46 }
 0x1ab   : > { %3907 = vmatpush1.bf16.msra.mxu1 %v8301_v55  ;;  %v421_v55 = vld [vmem:[%s9803_s8 + $0x230] sm:$0xff] }
 0x1ac   : > { %3908 = vmatprep.subr.bf16.mxu1 %v8422_v57  ;;  %v545_v56 = vld [vmem:[%s9803_s8 + $0x610] sm:$0xff]  ;;  %v8238_v60 = vcombine.high %v417_v52, %v421_v55  ;;  %v8237_v4 = vcombine.low %v417_v52, %v421_v55 }
 0x1ad   : > { %3868 = vmatpush2.bf16.msra.mxu0 %v8293_v62  ;;  %v549_v57 = vld [vmem:[%s9803_s8 + $0x630] sm:$0xff] }
 0x1ae   : > { %3869 = vmatprep.subr.bf16.mxu0 %v8286_v2  ;;  %v8366_v61 = vcombine.high %v545_v56, %v549_v57  ;;  %v665_v62 = vld [vmem:[%s9803_s8 + $0x9d0] sm:$0xff]  ;;  %v8365_v5 = vcombine.low %v545_v56, %v549_v57 }
 0x1af   : > { %3909 = vmatpush2.bf16.msra.mxu1 %v8421_v1  ;;  %v669_v1 = vld [vmem:[%s9803_s8 + $0x9f0] sm:$0xff] }
 0x1b0   : > { %3910 = vmatprep.subr.bf16.mxu1 %v8414_v3  ;;  %v793_v2 = vld [vmem:[%s9803_s8 + $0xdd0] sm:$0xff]  ;;  %v8486_v6 = vcombine.high %v665_v62, %v669_v1  ;;  %v8485_v13 = vcombine.low %v665_v62, %v669_v1 }
 0x1b1   : > { %3870 = vmatpush2.bf16.msra.mxu0 %v8285_v8  ;;  %v797_v3 = vld [vmem:[%s9803_s8 + $0xdf0] sm:$0xff] }
 0x1b2   : > { %3871 = vmatprep.subr.bf16.mxu0 %v8278_v11  ;;  %v8614_v7 = vcombine.high %v793_v2, %v797_v3  ;;  %v657_v8 = vld [vmem:[%s9803_s8 + $0x990] sm:$0xff]  ;;  %v8613_v15 = vcombine.low %v793_v2, %v797_v3 }
 0x1b3   : > { %3911 = vmatpush2.bf16.msra.mxu1 %v8413_v9  ;;  %v661_v9 = vld [vmem:[%s9803_s8 + $0x9b0] sm:$0xff] }
 0x1b4   : > { %3912 = vmatprep.subr.bf16.mxu1 %v8406_v12  ;;  %v785_v11 = vld [vmem:[%s9803_s8 + $0xd90] sm:$0xff]  ;;  %v8478_v16 = vcombine.high %v657_v8, %v661_v9  ;;  %v8477_v27 = vcombine.low %v657_v8, %v661_v9 }
 0x1b5   : > { %3872 = vmatpush2.bf16.msra.mxu0 %v8277_v18  ;;  %v789_v12 = vld [vmem:[%s9803_s8 + $0xdb0] sm:$0xff] }
 0x1b6   : > { %3873 = vmatprep.subr.bf16.mxu0 %v8270_v20  ;;  %v8606_v17 = vcombine.high %v785_v11, %v789_v12  ;;  %v649_v18 = vld [vmem:[%s9803_s8 + $0x950] sm:$0xff] }
 0x1b7   : > { %3913 = vmatpush2.bf16.msra.mxu1 %v8405_v19  ;;  %v653_v19 = vld [vmem:[%s9803_s8 + $0x970] sm:$0xff] }
 0x1b8   : > { %3914 = vmatprep.subr.bf16.mxu1 %v8398_v21  ;;  %v777_v21 = vld [vmem:[%s9803_s8 + $0xd50] sm:$0xff] }
 0x1b9   : > { %3874 = vmatpush2.bf16.msra.mxu0 %v8269_v28  ;;  %v781_v22 = vld [vmem:[%s9803_s8 + $0xd70] sm:$0xff] }
 0x1ba   : > { %3875 = vmatprep.subr.bf16.mxu0 %v8262_v31  ;;  %v8470_v31 = vcombine.high %v649_v18, %v653_v19  ;;  %v641_v36 = vld [vmem:[%s9803_s8 + $0x910] sm:$0xff]  ;;  %v8597_v45 = vcombine.low %v777_v21, %v781_v22 }
 0x1bb   : > { %3915 = vmatpush2.bf16.msra.mxu1 %v8397_v30  ;;  %v8605_v30 = vcombine.low %v785_v11, %v789_v12  ;;  %v645_v37 = vld [vmem:[%s9803_s8 + $0x930] sm:$0xff] }
 0x1bc   : > { %3916 = vmatprep.subr.bf16.mxu1 %v8390_v29  ;;  %v8462_v46 = vcombine.high %v641_v36, %v645_v37  ;;  %v761_v52 = vld [vmem:[%s9803_s8 + $0xcd0] sm:$0xff]  ;;  %v8461_v56 = vcombine.low %v641_v36, %v645_v37 }
 0x1bd   : > { %3876 = vmatpush2.bf16.msra.mxu0 %v8261_v38  ;;  %v765_v55 = vld [vmem:[%s9803_s8 + $0xcf0] sm:$0xff] }
 0x1be   : > { %3877 = vmatprep.subr.bf16.mxu0 %v8254_v54  ;;  %v773_v54 = vld [vmem:[%s9803_s8 + $0xd30] sm:$0xff]  ;;  %v8581_v3 = vcombine.low %v761_v52, %v765_v55 }
 0x1bf   : > { %3917 = vmatpush2.bf16.msra.mxu1 %v8389_v39  ;;  %v769_v39 = vld [vmem:[%s9803_s8 + $0xd10] sm:$0xff] }
 0x1c0   : > { %3918 = vmatprep.subr.bf16.mxu1 %v8382_v40  ;;  %v8589_v57 = vcombine.low %v769_v39, %v773_v54  ;;  %v753_v62 = vld [vmem:[%s9803_s8 + $0xc90] sm:$0xff] }
 0x1c1   : > { %3878 = vmatpush2.bf16.msra.mxu0 %v8253_v47  ;;  %v757_v1 = vld [vmem:[%s9803_s8 + $0xcb0] sm:$0xff] }
 0x1c2   : > { %3879 = vmatprep.subr.bf16.mxu0 %v8246_v49  ;;  %v633_v49 = vld [vmem:[%s9803_s8 + $0x8d0] sm:$0xff]  ;;  %v8573_v12 = vcombine.low %v753_v62, %v757_v1 }
 0x1c3   : > { %3919 = vmatpush2.bf16.msra.mxu1 %v8381_v48  ;;  %v8590_v48 = vcombine.high %v769_v39, %v773_v54  ;;  %v745_v8 = vld [vmem:[%s9803_s8 + $0xc50] sm:$0xff] }
 0x1c4   : > { %3920 = vmatprep.subr.bf16.mxu1 %v8374_v50  ;;  %v637_v50 = vld [vmem:[%s9803_s8 + $0x8f0] sm:$0xff] }
 0x1c5   : > { %3880 = vmatpush2.bf16.msra.mxu0 %v8245_v58  ;;  %v8454_v58 = vcombine.high %v633_v49, %v637_v50  ;;  %v8453_v2 = vcombine.low %v633_v49, %v637_v50  ;;  %v749_v9 = vld [vmem:[%s9803_s8 + $0xc70] sm:$0xff] }
 0x1c6   : > { %3881 = vmatprep.subr.bf16.mxu0 %v8238_v60  ;;  %v625_v60 = vld [vmem:[%s9803_s8 + $0x890] sm:$0xff] }
 0x1c7   : > { %3921 = vmatpush2.bf16.msra.mxu1 %v8373_v59  ;;  %v8582_v59 = vcombine.high %v761_v52, %v765_v55  ;;  %v721_v36 = vld [vmem:[%s9803_s8 + $0xb90] sm:$0xff] }
 0x1c8   : > { %3922 = vmatprep.subr.bf16.mxu1 %v8366_v61  ;;  %v629_v61 = vld [vmem:[%s9803_s8 + $0x8b0] sm:$0xff] }
 0x1c9   : > { %3882 = vmatpush2.bf16.msra.mxu0 %v8237_v4  ;;  %v8446_v4 = vcombine.high %v625_v60, %v629_v61  ;;  %v8445_v11 = vcombine.low %v625_v60, %v629_v61  ;;  %v725_v37 = vld [vmem:[%s9803_s8 + $0xbb0] sm:$0xff] }
 0x1ca   : > { %3933 = vmatprep.subr.bf16.mxu0 %v8486_v6  ;;  %v617_v6 = vld [vmem:[%s9803_s8 + $0x850] sm:$0xff]  ;;  %v8541_v49 = vcombine.low %v721_v36, %v725_v37 }
 0x1cb   : > { %3923 = vmatpush2.bf16.msra.mxu1 %v8365_v5  ;;  %v8574_v5 = vcombine.high %v753_v62, %v757_v1  ;;  %v853_v39 = vld [vmem:[%s9803_s8 + $0xfb0] sm:$0xff] }
 0x1cc   : > { %3974 = vmatprep.subr.bf16.mxu1 %v8614_v7  ;;  %v3639_v20 = vpop.f32.mrf.mxu0  ;;  %3884 = vmatmul.mubr.bf16.vlgmr.msra.gmra.mxu0 %v9921_v24  ;;  %v621_v7 = vld [vmem:[%s9803_s8 + $0x870] sm:$0xff] }
 0x1cd   : > { %v3640_v25 = vadd.f32 %v3639_v20, %v10159_v53  ;;  %3934 = vmatpush1.bf16.msra.mxu0 %v8485_v13  ;;  %v8598_v53 = vcombine.high %v777_v21, %v781_v22  ;;  %3965 = vmatprep.mubr.bf16.mxu0 %v9928_v32  ;;  %v8438_v13 = vcombine.high %v617_v6, %v621_v7 }
 0x1ce   : > { %v3680_v26 = vpop.f32.mrf.mxu1  ;;  %3925 = vmatmul.mubr.bf16.vlgmr.msra.gmra.mxu1 %v9932_v0  ;;  %v3641_v28 = vpop.f32.mrf.mxu0  ;;  %3935 = vmatprep.subr.bf16.mxu0 %v8478_v16  ;;  %v609_v16 = vld [vmem:[%s9803_s8 + $0x810] sm:$0xff]  ;;  %v8437_v20 = vcombine.low %v617_v6, %v621_v7  ;;  %v8565_v21 = vcombine.low %v745_v8, %v749_v9 }
 0x1cf   : > { %3975 = vmatpush1.bf16.msra.mxu1 %v8613_v15  ;;  %v10232_v29 = vadd.f32 %v3680_v26, %v3640_v25  ;;  %v3642_v34 = vadd.f32 %v3641_v28, %v10167_v63  ;;  %4006 = vmatprep.mubr.bf16.mxu1 %v9941_v41  ;;  %v8469_v63 = vcombine.low %v649_v18, %v653_v19  ;;  %v737_v18 = vld [vmem:[%s9803_s8 + $0xc10] sm:$0xff] }
 0x1d0   : > { %v3682_v35 = vpop.f32.mrf.mxu1  ;;  %3976 = vmatprep.subr.bf16.mxu1 %v8606_v17  ;;  %v3643_v38 = vpop.f32.mrf.mxu0  ;;  %v8566_v15 = vcombine.high %v745_v8, %v749_v9  ;;  %v613_v17 = vld [vmem:[%s9803_s8 + $0x830] sm:$0xff] }
 0x1d1   : > { %v10241_v40 = vadd.f32 %v3682_v35, %v3642_v34  ;;  %3936 = vmatpush1.bf16.msra.mxu0 %v8477_v27  ;;  %v741_v19 = vld [vmem:[%s9803_s8 + $0xc30] sm:$0xff]  ;;  %v8430_v22 = vcombine.high %v609_v16, %v613_v17 }
 0x1d2   : > { %v3684_v42 = vpop.f32.mrf.mxu1  ;;  %v3644_v43 = vpop.f32.mrf.mxu0  ;;  %3937 = vmatprep.subr.bf16.mxu0 %v8470_v31  ;;  %v8558_v25 = vcombine.high %v737_v18, %v741_v19  ;;  %v729_v26 = vld [vmem:[%s9803_s8 + $0xbd0] sm:$0xff]  ;;  %v8429_v31 = vcombine.low %v609_v16, %v613_v17  ;;  %v8557_v34 = vcombine.low %v737_v18, %v741_v19 }
 0x1d3   : > { %3977 = vmatpush1.bf16.msra.mxu1 %v8605_v30  ;;  %v733_v27 = vld [vmem:[%s9803_s8 + $0xbf0] sm:$0xff] }
 0x1d4   : > { %v3685_v47 = vpop.f32.mrf.mxu1  ;;  %3978 = vmatprep.subr.bf16.mxu1 %v8598_v53  ;;  %v857_v28 = vld [vmem:[%s9803_s8 + $0xfd0] sm:$0xff]  ;;  %v8550_v35 = vcombine.high %v729_v26, %v733_v27  ;;  %v8549_v54 = vcombine.low %v729_v26, %v733_v27 }
 0x1d5   : > { %3938 = vmatpush1.bf16.msra.mxu0 %v8469_v63  ;;  %v861_v30 = vld [vmem:[%s9803_s8 + $0xff0] sm:$0xff]  ;;  %v8542_v63 = vcombine.high %v721_v36, %v725_v37 }
 0x1d6   : > { %3939 = vmatprep.subr.bf16.mxu0 %v8462_v46  ;;  %v8678_v53 = vcombine.high %v857_v28, %v861_v30  ;;  %v849_v38 = vld [vmem:[%s9803_s8 + $0xf90] sm:$0xff]  ;;  %v8677_v42 = vcombine.low %v857_v28, %v861_v30 }
 0x1d7   : > { %3979 = vmatpush1.bf16.msra.mxu1 %v8597_v45  ;;  %v8670_v43 = vcombine.high %v849_v38, %v853_v39  ;;  %v713_v45 = vld [vmem:[%s9803_s8 + $0xb50] sm:$0xff]  ;;  %v8669_v50 = vcombine.low %v849_v38, %v853_v39 }
 0x1d8   : > { %3980 = vmatprep.subr.bf16.mxu1 %v8590_v48  ;;  %v717_v46 = vld [vmem:[%s9803_s8 + $0xb70] sm:$0xff] }
 0x1d9   : > { %3940 = vmatpush1.bf16.msra.mxu0 %v8461_v56  ;;  %v841_v47 = vld [vmem:[%s9803_s8 + $0xf50] sm:$0xff]  ;;  %v8534_v52 = vcombine.high %v713_v45, %v717_v46  ;;  %v8533_v60 = vcombine.low %v713_v45, %v717_v46  ;;  %v875_v46 = vsub.s32 2, %v9845_v44 }
 0x1da   : > { %3941 = vmatprep.subr.bf16.mxu0 %v8454_v58  ;;  %v845_v48 = vld [vmem:[%s9803_s8 + $0xf70] sm:$0xff] }
 0x1db   : > { %3981 = vmatpush1.bf16.msra.mxu1 %v8589_v57  ;;  %v8662_v55 = vcombine.high %v841_v47, %v845_v48  ;;  %v705_v56 = vld [vmem:[%s9803_s8 + $0xb10] sm:$0xff]  ;;  %v8661_v61 = vcombine.low %v841_v47, %v845_v48 }
 0x1dc   : > { %3982 = vmatprep.subr.bf16.mxu1 %v8582_v59  ;;  %v709_v57 = vld [vmem:[%s9803_s8 + $0xb30] sm:$0xff] }
 0x1dd   : > { %3942 = vmatpush1.bf16.msra.mxu0 %v8453_v2  ;;  %v833_v58 = vld [vmem:[%s9803_s8 + $0xf10] sm:$0xff]  ;;  %v8526_v62 = vcombine.high %v705_v56, %v709_v57  ;;  %v8525_v6 = vcombine.low %v705_v56, %v709_v57  ;;  %v530_v56 = vld [vmem:[%s9803_s8 + $0x598] sm:$0xff] }
 0x1de   : > { %3943 = vmatprep.subr.bf16.mxu0 %v8446_v4  ;;  %v837_v59 = vld [vmem:[%s9803_s8 + $0xf30] sm:$0xff]  ;;  %v534_v57 = vld [vmem:[%s9803_s8 + $0x5b8] sm:$0xff] }
 0x1df   : > { %3983 = vmatpush1.bf16.msra.mxu1 %v8581_v3  ;;  %v8654_v1 = vcombine.high %v833_v58, %v837_v59  ;;  %v697_v2 = vld [vmem:[%s9803_s8 + $0xad0] sm:$0xff]  ;;  %v8653_v7 = vcombine.low %v833_v58, %v837_v59  ;;  %v876_v58 = vrot.slane %v10144_v23, %v875_v46 }
 0x1e0   : > { %3984 = vmatprep.subr.bf16.mxu1 %v8574_v5  ;;  %v701_v3 = vld [vmem:[%s9803_s8 + $0xaf0] sm:$0xff] }
 0x1e1   : > { %3944 = vmatpush1.bf16.msra.mxu0 %v8445_v11  ;;  %v825_v4 = vld [vmem:[%s9803_s8 + $0xed0] sm:$0xff]  ;;  %v8518_v8 = vcombine.high %v697_v2, %v701_v3  ;;  %v8517_v16 = vcombine.low %v697_v2, %v701_v3  ;;  %v394_v2 = vld [vmem:[%s9803_s8 + $0x158] sm:$0xff] }
 0x1e2   : > { %3945 = vmatprep.subr.bf16.mxu0 %v8438_v13  ;;  %v829_v5 = vld [vmem:[%s9803_s8 + $0xef0] sm:$0xff]  ;;  %v398_v3 = vld [vmem:[%s9803_s8 + $0x178] sm:$0xff] }
 0x1e3   : > { %3985 = vmatpush1.bf16.msra.mxu1 %v8573_v12  ;;  %v8646_v9 = vcombine.high %v825_v4, %v829_v5  ;;  %v689_v11 = vld [vmem:[%s9803_s8 + $0xa90] sm:$0xff]  ;;  %v8645_v17 = vcombine.low %v825_v4, %v829_v5  ;;  %v522_v5 = vld [vmem:[%s9803_s8 + $0x558] sm:$0xff] }
 0x1e4   : > { %3986 = vmatprep.subr.bf16.mxu1 %v8566_v15  ;;  %v693_v12 = vld [vmem:[%s9803_s8 + $0xab0] sm:$0xff] }
 0x1e5   : > { %3946 = vmatpush1.bf16.msra.mxu0 %v8437_v20  ;;  %v817_v13 = vld [vmem:[%s9803_s8 + $0xe90] sm:$0xff]  ;;  %v8510_v18 = vcombine.high %v689_v11, %v693_v12  ;;  %v8509_v26 = vcombine.low %v689_v11, %v693_v12  ;;  %v8351_v11 = vcombine.low %v530_v56, %v534_v57  ;;  %v8216_v12 = vcombine.high %v394_v2, %v398_v3 }
 0x1e6   : > { %3947 = vmatprep.subr.bf16.mxu0 %v8430_v22  ;;  %v821_v15 = vld [vmem:[%s9803_s8 + $0xeb0] sm:$0xff] }
 0x1e7   : > { %3987 = vmatpush1.bf16.msra.mxu1 %v8565_v21  ;;  %v8638_v19 = vcombine.high %v817_v13, %v821_v15  ;;  %v681_v20 = vld [vmem:[%s9803_s8 + $0xa50] sm:$0xff]  ;;  %v8637_v27 = vcombine.low %v817_v13, %v821_v15 }
 0x1e8   : > { %3988 = vmatprep.subr.bf16.mxu1 %v8558_v25  ;;  %v685_v21 = vld [vmem:[%s9803_s8 + $0xa70] sm:$0xff] }
 0x1e9   : > { %3948 = vmatpush1.bf16.msra.mxu0 %v8429_v31  ;;  %v809_v22 = vld [vmem:[%s9803_s8 + $0xe50] sm:$0xff]  ;;  %v8502_v28 = vcombine.high %v681_v20, %v685_v21  ;;  %v8501_v36 = vcombine.low %v681_v20, %v685_v21  ;;  %v514_v21 = vld [vmem:[%s9803_s8 + $0x518] sm:$0xff] }
 0x1ea   : > { %3949 = vmatprep.subr.bf16.mxu0 %v8550_v35  ;;  %v813_v25 = vld [vmem:[%s9803_s8 + $0xe70] sm:$0xff] }
 0x1eb   : > { %3989 = vmatpush1.bf16.msra.mxu1 %v8557_v34  ;;  %v8630_v30 = vcombine.high %v809_v22, %v813_v25  ;;  %v673_v31 = vld [vmem:[%s9803_s8 + $0xa10] sm:$0xff]  ;;  %v8629_v37 = vcombine.low %v809_v22, %v813_v25  ;;  %v518_v22 = vld [vmem:[%s9803_s8 + $0x538] sm:$0xff] }
 0x1ec   : > { %3990 = vmatprep.subr.bf16.mxu1 %v8678_v53  ;;  %v677_v34 = vld [vmem:[%s9803_s8 + $0xa30] sm:$0xff] }
 0x1ed   : > { %3950 = vmatpush2.bf16.msra.mxu0 %v8549_v54  ;;  %v801_v35 = vld [vmem:[%s9803_s8 + $0xe10] sm:$0xff]  ;;  %v8494_v38 = vcombine.high %v673_v31, %v677_v34  ;;  %v410_v54 = vld [vmem:[%s9803_s8 + $0x1d8] sm:$0xff]  ;;  %v8493_v45 = vcombine.low %v673_v31, %v677_v34  ;;  %v8336_v34 = vcombine.high %v514_v21, %v518_v22 }
 0x1ee   : > { %3951 = vmatprep.subr.bf16.mxu0 %v8542_v63  ;;  %v805_v53 = vld [vmem:[%s9803_s8 + $0xe30] sm:$0xff]  ;;  %v538_v63 = vld [vmem:[%s9803_s8 + $0x5d8] sm:$0xff] }
 0x1ef   : > { %3991 = vmatpush2.bf16.msra.mxu1 %v8677_v42  ;;  %v8622_v39 = vcombine.high %v801_v35, %v805_v53  ;;  %v414_v42 = vld [vmem:[%s9803_s8 + $0x1f8] sm:$0xff]  ;;  %v8621_v47 = vcombine.low %v801_v35, %v805_v53 }
 0x1f0   : > { %3992 = vmatprep.subr.bf16.mxu1 %v8670_v43  ;;  %v542_v43 = vld [vmem:[%s9803_s8 + $0x5f8] sm:$0xff]  ;;  %v8232_v48 = vcombine.high %v410_v54, %v414_v42  ;;  %v8231_v59 = vcombine.low %v410_v54, %v414_v42 }
 0x1f1   : > { %3952 = vmatpush2.bf16.msra.mxu0 %v8541_v49  ;;  %v8360_v49 = vcombine.high %v538_v63, %v542_v43  ;;  %v378_v35 = vld [vmem:[%s9803_s8 + $0xd8] sm:$0xff] }
 0x1f2   : > { %3953 = vmatprep.subr.bf16.mxu0 %v8534_v52  ;;  %v402_v52 = vld [vmem:[%s9803_s8 + $0x198] sm:$0xff] }
 0x1f3   : > { %3993 = vmatpush2.bf16.msra.mxu1 %v8669_v50  ;;  %v879_v50 = vsub.s32 3, %v9845_v44  ;;  %v506_v53 = vld [vmem:[%s9803_s8 + $0x4d8] sm:$0xff] }
 0x1f4   : > { %3994 = vmatprep.subr.bf16.mxu1 %v8662_v55  ;;  %v406_v55 = vld [vmem:[%s9803_s8 + $0x1b8] sm:$0xff] }
 0x1f5   : > { %3954 = vmatpush2.bf16.msra.mxu0 %v8533_v60  ;;  %v8359_v60 = vcombine.low %v538_v63, %v542_v43  ;;  %v370_v42 = vld [vmem:[%s9803_s8 + $0x98] sm:$0xff] }
 0x1f6   : > { %3955 = vmatprep.subr.bf16.mxu0 %v8526_v62  ;;  %v880_v62 = vrot.slane %v10144_v23, %v879_v50  ;;  %v374_v63 = vld [vmem:[%s9803_s8 + $0xb8] sm:$0xff] }
 0x1f7   : > { %3995 = vmatpush2.bf16.msra.mxu1 %v8661_v61  ;;  %v8224_v61 = vcombine.high %v402_v52, %v406_v55  ;;  %v498_v43 = vld [vmem:[%s9803_s8 + $0x498] sm:$0xff] }
 0x1f8   : > { %3996 = vmatprep.subr.bf16.mxu1 %v8654_v1  ;;  %v8352_v1 = vcombine.high %v530_v56, %v534_v57  ;;  %v362_v50 = vld [vmem:[%s9803_s8 + $0x58] sm:$0xff]  ;;  %v8191_v57 = vcombine.low %v370_v42, %v374_v63 }
 0x1f9   : > { %3956 = vmatpush2.bf16.msra.mxu0 %v8525_v6  ;;  %v526_v6 = vld [vmem:[%s9803_s8 + $0x578] sm:$0xff] }
 0x1fa   : > { %3957 = vmatprep.subr.bf16.mxu0 %v8518_v8  ;;  %v494_v56 = vld [vmem:[%s9803_s8 + $0x478] sm:$0xff] }
 0x1fb   : > { %3997 = vmatpush2.bf16.msra.mxu1 %v8653_v7 }
 0x1fc   : > { %3998 = vmatprep.subr.bf16.mxu1 %v8646_v9  ;;  %v8223_v9 = vcombine.low %v402_v52, %v406_v55  ;;  %v366_v52 = vld [vmem:[%s9803_s8 + $0x78] sm:$0xff] }
 0x1fd   : > { %3958 = vmatpush2.bf16.msra.mxu0 %v8517_v16  ;;  %v490_v55 = vld [vmem:[%s9803_s8 + $0x458] sm:$0xff] }
 0x1fe   : > { %3959 = vmatprep.subr.bf16.mxu0 %v8510_v18  ;;  %v386_v18 = vld [vmem:[%s9803_s8 + $0x118] sm:$0xff] }
 0x1ff   : > { %3999 = vmatpush2.bf16.msra.mxu1 %v8645_v17  ;;  %v8344_v17 = vcombine.high %v522_v5, %v526_v6 }
 0x200   : > { %4000 = vmatprep.subr.bf16.mxu1 %v8638_v19  ;;  %v390_v19 = vld [vmem:[%s9803_s8 + $0x138] sm:$0xff] }
 0x201   : > { %3960 = vmatpush2.bf16.msra.mxu0 %v8509_v26  ;;  %v8208_v31 = vcombine.high %v386_v18, %v390_v19 }
 0x202   : > { %3961 = vmatprep.subr.bf16.mxu0 %v8502_v28 }
 0x203   : > { %4001 = vmatpush2.bf16.msra.mxu1 %v8637_v27  ;;  %v8215_v27 = vcombine.low %v394_v2, %v398_v3  ;;  %v486_v2 = vld [vmem:[%s9803_s8 + $0x438] sm:$0xff]  ;;  %v8183_v3 = vcombine.low %v362_v50, %v366_v52 }
 0x204   : > { %4002 = vmatprep.subr.bf16.mxu1 %v8630_v30  ;;  %v8343_v30 = vcombine.low %v522_v5, %v526_v6 }
 0x205   : > { %3962 = vmatpush2.bf16.msra.mxu0 %v8501_v36  ;;  %v510_v36 = vld [vmem:[%s9803_s8 + $0x4f8] sm:$0xff] }
 0x206   : > { %3963 = vmatprep.subr.bf16.mxu0 %v8494_v38  ;;  %v8335_v38 = vcombine.low %v514_v21, %v518_v22  ;;  %v8328_v54 = vcombine.high %v506_v53, %v510_v36 }
 0x207   : > { %4003 = vmatpush2.bf16.msra.mxu1 %v8629_v37  ;;  %v8207_v37 = vcombine.low %v386_v18, %v390_v19  ;;  %v470_v18 = vld [vmem:[%s9803_s8 + $0x3b8] sm:$0xff] }
 0x208   : > { %4004 = vmatprep.subr.bf16.mxu1 %v8622_v39  ;;  %v594_v19 = vld [vmem:[%s9803_s8 + $0x798] sm:$0xff] }
 0x209   : > { %3964 = vmatpush2.bf16.msra.mxu0 %v8493_v45  ;;  %v502_v45 = vld [vmem:[%s9803_s8 + $0x4b8] sm:$0xff] }
 0x20a   : > { %4015 = vmatprep.subr.bf16.mxu0 %v8232_v48  ;;  %v8192_v48 = vcombine.high %v370_v42, %v374_v63 }
 0x20b   : > { %4005 = vmatpush2.bf16.msra.mxu1 %v8621_v47  ;;  %v8327_v47 = vcombine.low %v506_v53, %v510_v36  ;;  %v450_v36 = vld [vmem:[%s9803_s8 + $0x318] sm:$0xff] }
 0x20c   : > { %4056 = vmatprep.subr.bf16.mxu1 %v8360_v49  ;;  %v3721_v4 = vpop.f32.mrf.mxu0  ;;  %3966 = vmatmul.mubr.bf16.vlgmr.msra.gmra.mxu0 %v9891_v33  ;;  %v8320_v49 = vcombine.high %v498_v43, %v502_v45 }
 0x20d   : > { %v3722_v7 = vadd.f32 %v3721_v4, %v876_v58  ;;  %4016 = vmatpush1.bf16.msra.mxu0 %v8231_v59  ;;  %4047 = vmatprep.mubr.bf16.mxu0 %v9868_v10  ;;  %v8319_v58 = vcombine.low %v498_v43, %v502_v45  ;;  %v8184_v59 = vcombine.high %v362_v50, %v366_v52  ;;  %v442_v45 = vld [vmem:[%s9803_s8 + $0x2d8] sm:$0xff] }
 0x20e   : > { %v3762_v8 = vpop.f32.mrf.mxu1  ;;  %4007 = vmatmul.mubr.bf16.vlgmr.msra.gmra.mxu1 %v10008_v51  ;;  %v3723_v23 = vpop.f32.mrf.mxu0  ;;  %4017 = vmatprep.subr.bf16.mxu0 %v8224_v61  ;;  %v354_v61 = vld [vmem:[%s9803_s8 + $0x18] sm:$0xff]  ;;  %v8311_v4 = vcombine.low %v490_v55, %v494_v56 }
 0x20f   : > { %4057 = vmatpush1.bf16.msra.mxu1 %v8359_v60  ;;  %v10309_v13 = vadd.f32 %v3762_v8, %v3722_v7  ;;  %v3724_v15 = vadd.f32 %v3723_v23, %v880_v62  ;;  %4088 = vmatprep.mubr.bf16.mxu1 %v9875_v14  ;;  %v382_v14 = vld [vmem:[%s9803_s8 + $0xf8] sm:$0xff]  ;;  %v8312_v60 = vcombine.high %v490_v55, %v494_v56 }
 0x210   : > { %v3764_v16 = vpop.f32.mrf.mxu1  ;;  %4058 = vmatprep.subr.bf16.mxu1 %v8352_v1  ;;  %v3725_v20 = vpop.f32.mrf.mxu0  ;;  %v8200_v39 = vcombine.high %v378_v35, %v382_v14  ;;  %v8199_v46 = vcombine.low %v378_v35, %v382_v14  ;;  %v358_v62 = vld [vmem:[%s9803_s8 + $0x38] sm:$0xff] }
 0x211   : > { %v10317_v25 = vadd.f32 %v3764_v16, %v3724_v15  ;;  %4018 = vmatpush1.bf16.msra.mxu0 %v8223_v9  ;;  %v482_v1 = vld [vmem:[%s9803_s8 + $0x418] sm:$0xff]  ;;  %v8176_v5 = vcombine.high %v354_v61, %v358_v62 }
 0x212   : > { %v3766_v26 = vpop.f32.mrf.mxu1  ;;  %v3726_v28 = vpop.f32.mrf.mxu0  ;;  %4019 = vmatprep.subr.bf16.mxu0 %v8216_v12  ;;  %v8304_v6 = vcombine.high %v482_v1, %v486_v2  ;;  %v474_v7 = vld [vmem:[%s9803_s8 + $0x3d8] sm:$0xff]  ;;  %v8303_v12 = vcombine.low %v482_v1, %v486_v2 }
 0x213   : > { %4059 = vmatpush1.bf16.msra.mxu1 %v8351_v11  ;;  %v478_v8 = vld [vmem:[%s9803_s8 + $0x3f8] sm:$0xff]  ;;  %v8175_v11 = vcombine.low %v354_v61, %v358_v62 }
 0x214   : > { %v3767_v10 = vpop.f32.mrf.mxu1  ;;  %4060 = vmatprep.subr.bf16.mxu1 %v8344_v17  ;;  %v602_v9 = vld [vmem:[%s9803_s8 + $0x7d8] sm:$0xff]  ;;  %v8296_v15 = vcombine.high %v474_v7, %v478_v8  ;;  %v8295_v21 = vcombine.low %v474_v7, %v478_v8 }
 0x215   : > { %4020 = vmatpush1.bf16.msra.mxu0 %v8215_v27  ;;  %v606_v23 = vld [vmem:[%s9803_s8 + $0x7f8] sm:$0xff] }
 0x216   : > { %4021 = vmatprep.subr.bf16.mxu0 %v8208_v31  ;;  %v8424_v16 = vcombine.high %v602_v9, %v606_v23  ;;  %v466_v17 = vld [vmem:[%s9803_s8 + $0x398] sm:$0xff]  ;;  %v8423_v22 = vcombine.low %v602_v9, %v606_v23 }
 0x217   : > { %4061 = vmatpush1.bf16.msra.mxu1 %v8343_v30  ;;  %v598_v20 = vld [vmem:[%s9803_s8 + $0x7b8] sm:$0xff]  ;;  %v8288_v26 = vcombine.high %v466_v17, %v470_v18 }
 0x218   : > { %4062 = vmatprep.subr.bf16.mxu1 %v8336_v34  ;;  %v8416_v27 = vcombine.high %v594_v19, %v598_v20  ;;  %v458_v28 = vld [vmem:[%s9803_s8 + $0x358] sm:$0xff]  ;;  %v8287_v34 = vcombine.low %v466_v17, %v470_v18  ;;  %v8415_v35 = vcombine.low %v594_v19, %v598_v20 }
 0x219   : > { %4022 = vmatpush1.bf16.msra.mxu0 %v8207_v37  ;;  %v462_v30 = vld [vmem:[%s9803_s8 + $0x378] sm:$0xff] }
 0x21a   : > { %4023 = vmatprep.subr.bf16.mxu0 %v8200_v39  ;;  %v586_v31 = vld [vmem:[%s9803_s8 + $0x758] sm:$0xff]  ;;  %v8280_v14 = vcombine.high %v458_v28, %v462_v30 }
 0x21b   : > { %4063 = vmatpush1.bf16.msra.mxu1 %v8335_v38  ;;  %v590_v10 = vld [vmem:[%s9803_s8 + $0x778] sm:$0xff] }
 0x21c   : > { %4064 = vmatprep.subr.bf16.mxu1 %v8328_v54  ;;  %v8408_v53 = vcombine.high %v586_v31, %v590_v10  ;;  %v454_v37 = vld [vmem:[%s9803_s8 + $0x338] sm:$0xff]  ;;  %v8279_v54 = vcombine.low %v458_v28, %v462_v30  ;;  %v8407_v42 = vcombine.low %v586_v31, %v590_v10 }
 0x21d   : > { %4024 = vmatpush1.bf16.msra.mxu0 %v8199_v46  ;;  %v578_v38 = vld [vmem:[%s9803_s8 + $0x718] sm:$0xff]  ;;  %v8272_v63 = vcombine.high %v450_v36, %v454_v37 }
 0x21e   : > { %4025 = vmatprep.subr.bf16.mxu0 %v8192_v48  ;;  %v582_v39 = vld [vmem:[%s9803_s8 + $0x738] sm:$0xff] }
 0x21f   : > { %4065 = vmatpush1.bf16.msra.mxu1 %v8327_v47  ;;  %v8400_v43 = vcombine.high %v578_v38, %v582_v39  ;;  %v446_v46 = vld [vmem:[%s9803_s8 + $0x2f8] sm:$0xff]  ;;  %v8399_v50 = vcombine.low %v578_v38, %v582_v39 }
 0x220   : > { %4066 = vmatprep.subr.bf16.mxu1 %v8320_v49  ;;  %v570_v47 = vld [vmem:[%s9803_s8 + $0x6d8] sm:$0xff]  ;;  %v8271_v49 = vcombine.low %v450_v36, %v454_v37  ;;  %v8264_v52 = vcombine.high %v442_v45, %v446_v46 }
 0x221   : > { %4026 = vmatpush1.bf16.msra.mxu0 %v8191_v57  ;;  %v574_v48 = vld [vmem:[%s9803_s8 + $0x6f8] sm:$0xff] }
 0x222   : > { %4027 = vmatprep.subr.bf16.mxu0 %v8184_v59  ;;  %v8392_v55 = vcombine.high %v570_v47, %v574_v48  ;;  %v434_v56 = vld [vmem:[%s9803_s8 + $0x298] sm:$0xff]  ;;  %v8391_v61 = vcombine.low %v570_v47, %v574_v48 }
 0x223   : > { %4067 = vmatpush1.bf16.msra.mxu1 %v8319_v58  ;;  %v438_v57 = vld [vmem:[%s9803_s8 + $0x2b8] sm:$0xff] }
 0x224   : > { %4068 = vmatprep.subr.bf16.mxu1 %v8312_v60  ;;  %v562_v58 = vld [vmem:[%s9803_s8 + $0x698] sm:$0xff]  ;;  %v8263_v60 = vcombine.low %v442_v45, %v446_v46  ;;  %v8256_v62 = vcombine.high %v434_v56, %v438_v57 }
 0x225   : > { %4028 = vmatpush1.bf16.msra.mxu0 %v8183_v3  ;;  %v566_v59 = vld [vmem:[%s9803_s8 + $0x6b8] sm:$0xff] }
 0x226   : > { %4029 = vmatprep.subr.bf16.mxu0 %v8176_v5  ;;  %v8384_v1 = vcombine.high %v562_v58, %v566_v59  ;;  %v426_v2 = vld [vmem:[%s9803_s8 + $0x258] sm:$0xff]  ;;  %v8383_v7 = vcombine.low %v562_v58, %v566_v59 }
 0x227   : > { %4069 = vmatpush1.bf16.msra.mxu1 %v8311_v4  ;;  %v430_v3 = vld [vmem:[%s9803_s8 + $0x278] sm:$0xff] }
 0x228   : > { %4070 = vmatprep.subr.bf16.mxu1 %v8304_v6  ;;  %v554_v4 = vld [vmem:[%s9803_s8 + $0x658] sm:$0xff]  ;;  %v8255_v6 = vcombine.low %v434_v56, %v438_v57  ;;  %v8248_v8 = vcombine.high %v426_v2, %v430_v3 }
 0x229   : > { %4030 = vmatpush1.bf16.msra.mxu0 %v8175_v11  ;;  %v558_v5 = vld [vmem:[%s9803_s8 + $0x678] sm:$0xff] }
 0x22a   : > { %4031 = vmatprep.subr.bf16.mxu0 %v8296_v15  ;;  %v8376_v9 = vcombine.high %v554_v4, %v558_v5  ;;  %v418_v23 = vld [vmem:[%s9803_s8 + $0x218] sm:$0xff]  ;;  %v8375_v17 = vcombine.low %v554_v4, %v558_v5 }
 0x22b   : > { %4071 = vmatpush1.bf16.msra.mxu1 %v8303_v12  ;;  %v422_v11 = vld [vmem:[%s9803_s8 + $0x238] sm:$0xff] }
 0x22c   : > { %4072 = vmatprep.subr.bf16.mxu1 %v8424_v16  ;;  %v546_v12 = vld [vmem:[%s9803_s8 + $0x618] sm:$0xff]  ;;  %v8247_v16 = vcombine.low %v426_v2, %v430_v3  ;;  %v8240_v18 = vcombine.high %v418_v23, %v422_v11 }
 0x22d   : > { %4032 = vmatpush2.bf16.msra.mxu0 %v8295_v21  ;;  %v550_v15 = vld [vmem:[%s9803_s8 + $0x638] sm:$0xff] }
 0x22e   : > { %4033 = vmatprep.subr.bf16.mxu0 %v8288_v26  ;;  %v8368_v19 = vcombine.high %v546_v12, %v550_v15  ;;  %v666_v20 = vld [vmem:[%s9803_s8 + $0x9d8] sm:$0xff]  ;;  %v8367_v28 = vcombine.low %v546_v12, %v550_v15 }
 0x22f   : > { %4073 = vmatpush2.bf16.msra.mxu1 %v8423_v22  ;;  %v670_v21 = vld [vmem:[%s9803_s8 + $0x9f8] sm:$0xff] }
 0x230   : > { %4074 = vmatprep.subr.bf16.mxu1 %v8416_v27  ;;  %v794_v22 = vld [vmem:[%s9803_s8 + $0xdd8] sm:$0xff]  ;;  %v8239_v27 = vcombine.low %v418_v23, %v422_v11  ;;  %v8488_v30 = vcombine.high %v666_v20, %v670_v21 }
 0x231   : > { %4034 = vmatpush2.bf16.msra.mxu0 %v8287_v34  ;;  %v798_v26 = vld [vmem:[%s9803_s8 + $0xdf8] sm:$0xff] }
 0x232   : > { %4035 = vmatprep.subr.bf16.mxu0 %v8280_v14  ;;  %v8616_v31 = vcombine.high %v794_v22, %v798_v26  ;;  %v658_v10 = vld [vmem:[%s9803_s8 + $0x998] sm:$0xff]  ;;  %v8615_v36 = vcombine.low %v794_v22, %v798_v26 }
 0x233   : > { %4075 = vmatpush2.bf16.msra.mxu1 %v8415_v35  ;;  %v662_v34 = vld [vmem:[%s9803_s8 + $0x9b8] sm:$0xff] }
 0x234   : > { %4076 = vmatprep.subr.bf16.mxu1 %v8408_v53  ;;  %v786_v35 = vld [vmem:[%s9803_s8 + $0xd98] sm:$0xff]  ;;  %v8487_v53 = vcombine.low %v666_v20, %v670_v21  ;;  %v8480_v37 = vcombine.high %v658_v10, %v662_v34  ;;  %v8479_v47 = vcombine.low %v658_v10, %v662_v34 }
 0x235   : > { %4036 = vmatpush2.bf16.msra.mxu0 %v8279_v54  ;;  %v790_v14 = vld [vmem:[%s9803_s8 + $0xdb8] sm:$0xff] }
 0x236   : > { %4037 = vmatprep.subr.bf16.mxu0 %v8272_v63  ;;  %v8608_v38 = vcombine.high %v786_v35, %v790_v14  ;;  %v650_v39 = vld [vmem:[%s9803_s8 + $0x958] sm:$0xff] }
 0x237   : > { %4077 = vmatpush2.bf16.msra.mxu1 %v8407_v42  ;;  %v654_v54 = vld [vmem:[%s9803_s8 + $0x978] sm:$0xff] }
 0x238   : > { %4078 = vmatprep.subr.bf16.mxu1 %v8400_v43  ;;  %v778_v63 = vld [vmem:[%s9803_s8 + $0xd58] sm:$0xff] }
 0x239   : > { %4038 = vmatpush2.bf16.msra.mxu0 %v8271_v49  ;;  %v782_v43 = vld [vmem:[%s9803_s8 + $0xd78] sm:$0xff]  ;;  %v8607_v49 = vcombine.low %v786_v35, %v790_v14 }
 0x23a   : > { %4039 = vmatprep.subr.bf16.mxu0 %v8264_v52  ;;  %v646_v56 = vld [vmem:[%s9803_s8 + $0x938] sm:$0xff] }
 0x23b   : > { %4079 = vmatpush2.bf16.msra.mxu1 %v8399_v50  ;;  %v8472_v50 = vcombine.high %v650_v39, %v654_v54  ;;  %v770_v57 = vld [vmem:[%s9803_s8 + $0xd18] sm:$0xff] }
 0x23c   : > { %4080 = vmatprep.subr.bf16.mxu1 %v8392_v55  ;;  %v8600_v55 = vcombine.high %v778_v63, %v782_v43  ;;  %v774_v58 = vld [vmem:[%s9803_s8 + $0xd38] sm:$0xff] }
 0x23d   : > { %4040 = vmatpush2.bf16.msra.mxu0 %v8263_v60  ;;  %v8471_v60 = vcombine.low %v650_v39, %v654_v54  ;;  %v634_v3 = vld [vmem:[%s9803_s8 + $0x8d8] sm:$0xff] }
 0x23e   : > { %4041 = vmatprep.subr.bf16.mxu0 %v8256_v62  ;;  %v8599_v62 = vcombine.low %v778_v63, %v782_v43  ;;  %v638_v4 = vld [vmem:[%s9803_s8 + $0x8f8] sm:$0xff] }
 0x23f   : > { %4081 = vmatpush2.bf16.msra.mxu1 %v8391_v61  ;;  %v762_v5 = vld [vmem:[%s9803_s8 + $0xcd8] sm:$0xff] }
 0x240   : > { %4082 = vmatprep.subr.bf16.mxu1 %v8384_v1  ;;  %v626_v23 = vld [vmem:[%s9803_s8 + $0x898] sm:$0xff] }
 0x241   : > { %4042 = vmatpush2.bf16.msra.mxu0 %v8255_v6  ;;  %v766_v6 = vld [vmem:[%s9803_s8 + $0xcf8] sm:$0xff] }
 0x242   : > { %4043 = vmatprep.subr.bf16.mxu0 %v8248_v8  ;;  %v8456_v8 = vcombine.high %v634_v3, %v638_v4  ;;  %v630_v11 = vld [vmem:[%s9803_s8 + $0x8b8] sm:$0xff] }
 0x243   : > { %4083 = vmatpush2.bf16.msra.mxu1 %v8383_v7  ;;  %v8591_v7 = vcombine.low %v770_v57, %v774_v58  ;;  %v754_v12 = vld [vmem:[%s9803_s8 + $0xc98] sm:$0xff] }
 0x244   : > { %4084 = vmatprep.subr.bf16.mxu1 %v8376_v9  ;;  %v8584_v9 = vcombine.high %v762_v5, %v766_v6  ;;  %v758_v15 = vld [vmem:[%s9803_s8 + $0xcb8] sm:$0xff] }
 0x245   : > { %4044 = vmatpush2.bf16.msra.mxu0 %v8247_v16  ;;  %v8455_v16 = vcombine.low %v634_v3, %v638_v4  ;;  %v618_v20 = vld [vmem:[%s9803_s8 + $0x858] sm:$0xff] }
 0x246   : > { %4045 = vmatprep.subr.bf16.mxu0 %v8240_v18  ;;  %v8448_v18 = vcombine.high %v626_v23, %v630_v11  ;;  %v622_v21 = vld [vmem:[%s9803_s8 + $0x878] sm:$0xff] }
 0x247   : > { %4085 = vmatpush2.bf16.msra.mxu1 %v8375_v17  ;;  %v8583_v17 = vcombine.low %v762_v5, %v766_v6  ;;  %v746_v22 = vld [vmem:[%s9803_s8 + $0xc58] sm:$0xff] }
 0x248   : > { %4086 = vmatprep.subr.bf16.mxu1 %v8368_v19  ;;  %v8576_v19 = vcombine.high %v754_v12, %v758_v15  ;;  %v750_v26 = vld [vmem:[%s9803_s8 + $0xc78] sm:$0xff] }
 0x249   : > { %4046 = vmatpush2.bf16.msra.mxu0 %v8239_v27  ;;  %v8447_v27 = vcombine.low %v626_v23, %v630_v11  ;;  %v610_v10 = vld [vmem:[%s9803_s8 + $0x818] sm:$0xff] }
 0x24a   : > { %4097 = vmatprep.subr.bf16.mxu0 %v8488_v30  ;;  %v8440_v30 = vcombine.high %v618_v20, %v622_v21  ;;  %v614_v34 = vld [vmem:[%s9803_s8 + $0x838] sm:$0xff] }
 0x24b   : > { %4087 = vmatpush2.bf16.msra.mxu1 %v8367_v28  ;;  %v8575_v28 = vcombine.low %v754_v12, %v758_v15  ;;  %v738_v35 = vld [vmem:[%s9803_s8 + $0xc18] sm:$0xff]  ;;  %v8431_v43 = vcombine.low %v610_v10, %v614_v34 }
 0x24c   : > { %4138 = vmatprep.subr.bf16.mxu1 %v8616_v31  ;;  %v3803_v42 = vpop.f32.mrf.mxu0  ;;  %4048 = vmatmul.mubr.bf16.vlgmr.msra.gmra.mxu0 %v9921_v24  ;;  %v8568_v31 = vcombine.high %v746_v22, %v750_v26  ;;  %v742_v14 = vld [vmem:[%s9803_s8 + $0xc38] sm:$0xff] }
 0x24d   : > { %v3804_v45 = vadd.f32 %v3803_v42, %v10309_v13  ;;  %4098 = vmatpush1.bf16.msra.mxu0 %v8487_v53  ;;  %v642_v13 = vld [vmem:[%s9803_s8 + $0x918] sm:$0xff]  ;;  %4129 = vmatprep.mubr.bf16.mxu0 %v9928_v32  ;;  %v8592_v32 = vcombine.high %v770_v57, %v774_v58  ;;  %v8439_v53 = vcombine.low %v618_v20, %v622_v21 }
 0x24e   : > { %v3844_v46 = vpop.f32.mrf.mxu1  ;;  %4089 = vmatmul.mubr.bf16.vlgmr.msra.gmra.mxu1 %v9932_v0  ;;  %v10382_v48 = vpop.f32.mrf.mxu0  ;;  %4099 = vmatprep.subr.bf16.mxu0 %v8480_v37  ;;  %v8464_v1 = vcombine.high %v642_v13, %v646_v56  ;;  %v8432_v37 = vcombine.high %v610_v10, %v614_v34  ;;  %v730_v39 = vld [vmem:[%s9803_s8 + $0xbd8] sm:$0xff] }
 0x24f   : > { %4139 = vmatpush1.bf16.msra.mxu1 %v8615_v36  ;;  %v10384_v24 = vadd.f32 %v3844_v46, %v3804_v45  ;;  %4170 = vmatprep.mubr.bf16.mxu1 %v9941_v41  ;;  %v8463_v41 = vcombine.low %v642_v13, %v646_v56  ;;  %v8567_v36 = vcombine.low %v746_v22, %v750_v26  ;;  %v734_v54 = vld [vmem:[%s9803_s8 + $0xbf8] sm:$0xff] }
 0x250   : > { %v10386_v52 = vpop.f32.mrf.mxu1  ;;  %4140 = vmatprep.subr.bf16.mxu1 %v8608_v38  ;;  %v3807_v0 = vpop.f32.mrf.mxu0  ;;  %v8560_v38 = vcombine.high %v738_v35, %v742_v14  ;;  %v858_v42 = vld [vmem:[%s9803_s8 + $0xfd8] sm:$0xff]  ;;  %v8559_v45 = vcombine.low %v738_v35, %v742_v14  ;;  %v8552_v46 = vcombine.high %v730_v39, %v734_v54  ;;  %v8551_v56 = vcombine.low %v730_v39, %v734_v54 }
 0x251   : > { %4100 = vmatpush1.bf16.msra.mxu0 %v8479_v47  ;;  %v862_v63 = vld [vmem:[%s9803_s8 + $0xff8] sm:$0xff] }
 0x252   : > { %v3848_v59 = vpop.f32.mrf.mxu1  ;;  %v3808_v61 = vpop.f32.mrf.mxu0  ;;  %4101 = vmatprep.subr.bf16.mxu0 %v8472_v50  ;;  %v8680_v47 = vcombine.high %v858_v42, %v862_v63  ;;  %v726_v50 = vld [vmem:[%s9803_s8 + $0xbb8] sm:$0xff]  ;;  %v8679_v0 = vcombine.low %v858_v42, %v862_v63 }
 0x253   : > { %4141 = vmatpush1.bf16.msra.mxu1 %v8607_v49  ;;  %v722_v49 = vld [vmem:[%s9803_s8 + $0xb98] sm:$0xff] }
 0x254   : > { %v3849_v2 = vpop.f32.mrf.mxu1  ;;  %4142 = vmatprep.subr.bf16.mxu1 %v8600_v55  ;;  %v850_v55 = vld [vmem:[%s9803_s8 + $0xf98] sm:$0xff]  ;;  %v8544_v57 = vcombine.high %v722_v49, %v726_v50 }
 0x255   : > { %4102 = vmatpush1.bf16.msra.mxu0 %v8471_v60  ;;  %v854_v13 = vld [vmem:[%s9803_s8 + $0xfb8] sm:$0xff] }
 0x256   : > { %4103 = vmatprep.subr.bf16.mxu0 %v8464_v1  ;;  %v8672_v58 = vcombine.high %v850_v55, %v854_v13  ;;  %v714_v59 = vld [vmem:[%s9803_s8 + $0xb58] sm:$0xff]  ;;  %v8543_v1 = vcombine.low %v722_v49, %v726_v50  ;;  %v8671_v2 = vcombine.low %v850_v55, %v854_v13  ;;  %v4253_v55 = vld [vmem:[%s9811_s9 + $0x1c0] sm:$0xff] }
 0x257   : > { %4143 = vmatpush1.bf16.msra.mxu1 %v8599_v62  ;;  %v718_v60 = vld [vmem:[%s9803_s8 + $0xb78] sm:$0xff]  ;;  %v4257_v13 = vld [vmem:[%s9811_s9 + $0x1e0] sm:$0xff] }
 0x258   : > { %4144 = vmatprep.subr.bf16.mxu1 %v8592_v32  ;;  %v842_v61 = vld [vmem:[%s9803_s8 + $0xf58] sm:$0xff]  ;;  %v8536_v32 = vcombine.high %v714_v59, %v718_v60 }
 0x259   : > { %4104 = vmatpush1.bf16.msra.mxu0 %v8463_v41  ;;  %v846_v62 = vld [vmem:[%s9803_s8 + $0xf78] sm:$0xff] }
 0x25a   : > { %4105 = vmatprep.subr.bf16.mxu0 %v8456_v8  ;;  %v8664_v3 = vcombine.high %v842_v61, %v846_v62  ;;  %v706_v4 = vld [vmem:[%s9803_s8 + $0xb18] sm:$0xff]  ;;  %v8663_v8 = vcombine.low %v842_v61, %v846_v62  ;;  %v4180_v61 = vmax.f32 %v10241_v40, 0.0  ;;  %v4245_v62 = vld [vmem:[%s9811_s9 + $0x180] sm:$0xff] }
 0x25b   : > { %4145 = vmatpush1.bf16.msra.mxu1 %v8591_v7  ;;  %v710_v5 = vld [vmem:[%s9803_s8 + $0xb38] sm:$0xff]  ;;  %v8535_v7 = vcombine.low %v714_v59, %v718_v60  ;;  %v8738_v59 = vcombine.high %v4253_v55, %v4257_v13  ;;  %v4237_v40 = vld [vmem:[%s9811_s9 + $0x140] sm:$0xff] }
 0x25c   : > { %4146 = vmatprep.subr.bf16.mxu1 %v8584_v9  ;;  %v834_v6 = vld [vmem:[%s9803_s8 + $0xf18] sm:$0xff]  ;;  %v8528_v9 = vcombine.high %v706_v4, %v710_v5 }
 0x25d   : > { %4106 = vmatpush1.bf16.msra.mxu0 %v8455_v16  ;;  %v838_v41 = vld [vmem:[%s9803_s8 + $0xf38] sm:$0xff] }
 0x25e   : > { %4107 = vmatprep.subr.bf16.mxu0 %v8448_v18  ;;  %v8656_v23 = vcombine.high %v834_v6, %v838_v41  ;;  %v698_v11 = vld [vmem:[%s9803_s8 + $0xad8] sm:$0xff]  ;;  %v8655_v18 = vcombine.low %v834_v6, %v838_v41 }
 0x25f   : > { %4147 = vmatpush1.bf16.msra.mxu1 %v8583_v17  ;;  %v702_v12 = vld [vmem:[%s9803_s8 + $0xaf8] sm:$0xff]  ;;  %v8527_v17 = vcombine.low %v706_v4, %v710_v5  ;;  %v4373_v4 = vld [vmem:[%s9811_s9 + $0x580] sm:$0xff] }
 0x260   : > { %4148 = vmatprep.subr.bf16.mxu1 %v8576_v19  ;;  %v826_v15 = vld [vmem:[%s9803_s8 + $0xed8] sm:$0xff]  ;;  %v8520_v19 = vcombine.high %v698_v11, %v702_v12  ;;  %v4377_v5 = vld [vmem:[%s9811_s9 + $0x5a0] sm:$0xff] }
 0x261   : > { %4108 = vmatpush1.bf16.msra.mxu0 %v8447_v27  ;;  %v830_v16 = vld [vmem:[%s9803_s8 + $0xef8] sm:$0xff] }
 0x262   : > { %4109 = vmatprep.subr.bf16.mxu0 %v8440_v30  ;;  %v8648_v20 = vcombine.high %v826_v15, %v830_v16  ;;  %v690_v21 = vld [vmem:[%s9803_s8 + $0xa98] sm:$0xff]  ;;  %v8647_v30 = vcombine.low %v826_v15, %v830_v16 }
 0x263   : > { %4149 = vmatpush1.bf16.msra.mxu1 %v8575_v28  ;;  %v694_v22 = vld [vmem:[%s9803_s8 + $0xab8] sm:$0xff]  ;;  %v8519_v28 = vcombine.low %v698_v11, %v702_v12  ;;  %v4365_v11 = vld [vmem:[%s9811_s9 + $0x540] sm:$0xff] }
 0x264   : > { %4150 = vmatprep.subr.bf16.mxu1 %v8568_v31  ;;  %v818_v26 = vld [vmem:[%s9803_s8 + $0xe98] sm:$0xff]  ;;  %v8512_v31 = vcombine.high %v690_v21, %v694_v22  ;;  %v4369_v12 = vld [vmem:[%s9811_s9 + $0x560] sm:$0xff] }
 0x265   : > { %4110 = vmatpush1.bf16.msra.mxu0 %v8439_v53  ;;  %v822_v27 = vld [vmem:[%s9803_s8 + $0xeb8] sm:$0xff] }
 0x266   : > { %4111 = vmatprep.subr.bf16.mxu0 %v8432_v37  ;;  %v8640_v10 = vcombine.high %v818_v26, %v822_v27  ;;  %v682_v34 = vld [vmem:[%s9803_s8 + $0xa58] sm:$0xff]  ;;  %v8639_v37 = vcombine.low %v818_v26, %v822_v27  ;;  %v8850_v26 = vcombine.high %v4365_v11, %v4369_v12  ;;  %v4233_v27 = vld [vmem:[%s9811_s9 + $0x120] sm:$0xff] }
 0x267   : > { %4151 = vmatpush1.bf16.msra.mxu1 %v8567_v36  ;;  %v686_v35 = vld [vmem:[%s9803_s8 + $0xa78] sm:$0xff]  ;;  %v8511_v36 = vcombine.low %v690_v21, %v694_v22 }
 0x268   : > { %4152 = vmatprep.subr.bf16.mxu1 %v8560_v38  ;;  %v810_v14 = vld [vmem:[%s9803_s8 + $0xe58] sm:$0xff]  ;;  %v8504_v38 = vcombine.high %v682_v34, %v686_v35 }
 0x269   : > { %4112 = vmatpush1.bf16.msra.mxu0 %v8431_v43  ;;  %v814_v53 = vld [vmem:[%s9803_s8 + $0xe78] sm:$0xff] }
 0x26a   : > { %4113 = vmatprep.subr.bf16.mxu0 %v8552_v46  ;;  %v8632_v39 = vcombine.high %v810_v14, %v814_v53  ;;  %v674_v54 = vld [vmem:[%s9803_s8 + $0xa18] sm:$0xff]  ;;  %v8503_v46 = vcombine.low %v682_v34, %v686_v35 }
 0x26b   : > { %4153 = vmatpush1.bf16.msra.mxu1 %v8559_v45  ;;  %v678_v42 = vld [vmem:[%s9803_s8 + $0xa38] sm:$0xff]  ;;  %v3806_v45 = vadd.f32 %v10382_v48, %v10317_v25  ;;  %v883_v25 = vsub.s32 4, %v9845_v44 }
 0x26c   : > { %4154 = vmatprep.subr.bf16.mxu1 %v8680_v47  ;;  %v802_v63 = vld [vmem:[%s9803_s8 + $0xe18] sm:$0xff]  ;;  %v8631_v47 = vcombine.low %v810_v14, %v814_v53  ;;  %v8496_v49 = vcombine.high %v674_v54, %v678_v42  ;;  %v8849_v14 = vcombine.low %v4365_v11, %v4369_v12  ;;  %v4449_v11 = vld [vmem:[%s9811_s9 + $0x7e0] sm:$0xff] }
 0x26d   : > { %4114 = vmatpush2.bf16.msra.mxu0 %v8551_v56  ;;  %v806_v43 = vld [vmem:[%s9803_s8 + $0xe38] sm:$0xff]  ;;  %v4381_v56 = vld [vmem:[%s9811_s9 + $0x5c0] sm:$0xff] }
 0x26e   : > { %4115 = vmatprep.subr.bf16.mxu0 %v8544_v57  ;;  %v8624_v50 = vcombine.high %v802_v63, %v806_v43  ;;  %v3847_v57 = vadd.f32 %v10386_v52, %v3806_v45  ;;  %v8623_v48 = vcombine.low %v802_v63, %v806_v43  ;;  %v10454_v52 = vld [vmem:[%s9809_s14] sm:$0xff] }
 0x26f   : > { %4155 = vmatpush2.bf16.msra.mxu1 %v8679_v0  ;;  %v4385_v0 = vld [vmem:[%s9811_s9 + $0x5e0] sm:$0xff] }
 0x270   : > { %4156 = vmatprep.subr.bf16.mxu1 %v8672_v58  ;;  %v8495_v58 = vcombine.low %v674_v54, %v678_v42  ;;  %v8866_v60 = vcombine.high %v4381_v56, %v4385_v0  ;;  %v8865_v6 = vcombine.low %v4381_v56, %v4385_v0  ;;  %v4349_v54 = vld [vmem:[%s9811_s9 + $0x4c0] sm:$0xff] }
 0x271   : > { %4116 = vmatpush2.bf16.msra.mxu0 %v8543_v1  ;;  %v4249_v1 = vld [vmem:[%s9811_s9 + $0x1a0] sm:$0xff] }
 0x272   : > { %4117 = vmatprep.subr.bf16.mxu0 %v8536_v32  ;;  %v884_v32 = vrot.slane %v10454_v52, %v883_v25  ;;  %v8730_v41 = vcombine.high %v4245_v62, %v4249_v1  ;;  %v4353_v42 = vld [vmem:[%s9811_s9 + $0x4e0] sm:$0xff] }
 0x273   : > { %4157 = vmatpush2.bf16.msra.mxu1 %v8671_v2  ;;  %v4182_v2 = vmax.f32 %v3847_v57, 0.0  ;;  %v8833_v56 = vcombine.low %v4349_v54, %v4353_v42  ;;  %v4209_v25 = vld [vmem:[%s9811_s9 + $0x60] sm:$0xff] }
 0x274   : > { %4158 = vmatprep.subr.bf16.mxu1 %v8664_v3  ;;  %v8737_v3 = vcombine.low %v4253_v55, %v4257_v13  ;;  %v4345_v55 = vld [vmem:[%s9811_s9 + $0x4a0] sm:$0xff] }
 0x275   : > { %4118 = vmatpush2.bf16.msra.mxu0 %v8535_v7  ;;  %v4241_v7 = vld [vmem:[%s9811_s9 + $0x160] sm:$0xff]  ;;  %v10466_v15 = vpack.c.bf16 %v4182_v2, %v4182_v2 }
 0x276   : > { %4119 = vmatprep.subr.bf16.mxu0 %v8528_v9  ;;  %v8721_v34 = vcombine.low %v4237_v40, %v4241_v7  ;;  %v4197_v2 = vld [vmem:[%s9811_s9] sm:$0xff] }
 0x277   : > { %4159 = vmatpush2.bf16.msra.mxu1 %v8663_v8  ;;  %v10461_v8 = vpack.c.bf16 %v4180_v61, %v4180_v61 }
 0x278   : > { %4160 = vmatprep.subr.bf16.mxu1 %v8656_v23  ;;  %v8858_v23 = vcombine.high %v4373_v4, %v4377_v5 }
 0x279   : > { %4120 = vmatpush2.bf16.msra.mxu0 %v8527_v17 }
 0x27a   : > { %4121 = vmatprep.subr.bf16.mxu0 %v8520_v19 }
 0x27b   : > { %4161 = vmatpush2.bf16.msra.mxu1 %v8655_v18  ;;  %v8729_v18 = vcombine.low %v4245_v62, %v4249_v1 }
 0x27c   : > { %4162 = vmatprep.subr.bf16.mxu1 %v8648_v20  ;;  %v8722_v20 = vcombine.high %v4237_v40, %v4241_v7  ;;  %v4317_v7 = vld [vmem:[%s9811_s9 + $0x3c0] sm:$0xff] }
 0x27d   : > { %4122 = vmatpush2.bf16.msra.mxu0 %v8519_v28 }
 0x27e   : > { %4123 = vmatprep.subr.bf16.mxu0 %v8512_v31  ;;  %v4361_v31 = vld [vmem:[%s9811_s9 + $0x520] sm:$0xff] }
 0x27f   : > { %4163 = vmatpush2.bf16.msra.mxu1 %v8647_v30  ;;  %v4357_v30 = vld [vmem:[%s9811_s9 + $0x500] sm:$0xff] }
 0x280   : > { %4164 = vmatprep.subr.bf16.mxu1 %v8640_v10  ;;  %v8841_v43 = vcombine.low %v4357_v30, %v4361_v31 }
 0x281   : > { %4124 = vmatpush2.bf16.msra.mxu0 %v8511_v36 }
 0x282   : > { %4125 = vmatprep.subr.bf16.mxu0 %v8504_v38  ;;  %v4221_v38 = vld [vmem:[%s9811_s9 + $0xc0] sm:$0xff] }
 0x283   : > { %4165 = vmatpush2.bf16.msra.mxu1 %v8639_v37  ;;  %v8842_v37 = vcombine.high %v4357_v30, %v4361_v31 }
 0x284   : > { %4166 = vmatprep.subr.bf16.mxu1 %v8632_v39  ;;  %v4225_v39 = vld [vmem:[%s9811_s9 + $0xe0] sm:$0xff] }
 0x285   : > { %4126 = vmatpush2.bf16.msra.mxu0 %v8503_v46  ;;  %v8706_v45 = vcombine.high %v4221_v38, %v4225_v39  ;;  %v8834_v46 = vcombine.high %v4349_v54, %v4353_v42  ;;  %v8705_v13 = vcombine.low %v4221_v38, %v4225_v39  ;;  %v4293_v39 = vld [vmem:[%s9811_s9 + $0x300] sm:$0xff] }
 0x286   : > { %4127 = vmatprep.subr.bf16.mxu0 %v8496_v49  ;;  %v4217_v49 = vld [vmem:[%s9811_s9 + $0xa0] sm:$0xff] }
 0x287   : > { %4167 = vmatpush2.bf16.msra.mxu1 %v8631_v47  ;;  %v4213_v47 = vld [vmem:[%s9811_s9 + $0x80] sm:$0xff] }
 0x288   : > { %4168 = vmatprep.subr.bf16.mxu1 %v8624_v50  ;;  %v4341_v50 = vld [vmem:[%s9811_s9 + $0x480] sm:$0xff]  ;;  %v8698_v0 = vcombine.high %v4213_v47, %v4217_v49 }
 0x289   : > { %4128 = vmatpush2.bf16.msra.mxu0 %v8495_v58  ;;  %v8826_v57 = vcombine.high %v4341_v50, %v4345_v55  ;;  %v4205_v58 = vld [vmem:[%s9811_s9 + $0x40] sm:$0xff]  ;;  %v8825_v61 = vcombine.low %v4341_v50, %v4345_v55 }
 0x28a   : > { %7269 = vmatprep.subr.bf16.mxu0 %v8738_v59  ;;  %v4337_v59 = vld [vmem:[%s9811_s9 + $0x460] sm:$0xff]  ;;  %v8690_v62 = vcombine.high %v4205_v58, %v4209_v25 }
 0x28b   : > { %4169 = vmatpush2.bf16.msra.mxu1 %v8623_v48  ;;  %v4333_v48 = vld [vmem:[%s9811_s9 + $0x440] sm:$0xff] }
 0x28c   : > { %7310 = vmatprep.subr.bf16.mxu1 %v8866_v60  ;;  %v3885_v9 = vpop.f32.mrf.mxu0  ;;  %4130 = vmatmul.mubr.bf16.vlgmr.msra.gmra.mxu0 %v9891_v33  ;;  %v8857_v33 = vcombine.low %v4373_v4, %v4377_v5  ;;  %v8697_v60 = vcombine.low %v4213_v47, %v4217_v49  ;;  %v8818_v1 = vcombine.high %v4333_v48, %v4337_v59  ;;  %v4329_v4 = vld [vmem:[%s9811_s9 + $0x420] sm:$0xff] }
 0x28d   : > { %v3886_v16 = vadd.f32 %v3885_v9, %v884_v32  ;;  %7270 = vmatpush1.bf16.msra.mxu0 %v8737_v3  ;;  %7301 = vmatprep.mubr.bf16.mxu0 %v10461_v8  ;;  %v4201_v32 = vld [vmem:[%s9811_s9 + $0x20] sm:$0xff]  ;;  %v8689_v5 = vcombine.low %v4205_v58, %v4209_v25 }
 0x28e   : > { %v3926_v17 = vpop.f32.mrf.mxu1  ;;  %4171 = vmatmul.mubr.bf16.vlgmr.msra.gmra.mxu1 %v10008_v51  ;;  %v10470_v19 = vpop.f32.mrf.mxu0  ;;  %7271 = vmatprep.subr.bf16.mxu0 %v8730_v41  ;;  %v4229_v51 = vld [vmem:[%s9811_s9 + $0x100] sm:$0xff]  ;;  %v8682_v41 = vcombine.high %v4197_v2, %v4201_v32  ;;  %v8681_v12 = vcombine.low %v4197_v2, %v4201_v32 }
 0x28f   : > { %7311 = vmatpush1.bf16.msra.mxu1 %v8865_v6  ;;  %v10472_v21 = vadd.f32 %v3926_v17, %v3886_v16  ;;  %7342 = vmatprep.mubr.bf16.mxu1 %v10466_v15  ;;  %v8714_v53 = vcombine.high %v4229_v51, %v4233_v27  ;;  %v8713_v63 = vcombine.low %v4229_v51, %v4233_v27  ;;  %v4325_v3 = vld [vmem:[%s9811_s9 + $0x400] sm:$0xff] }
 0x290   : > { %v10475_v22 = vpop.f32.mrf.mxu1  ;;  %v3889_v28 = vpop.f32.mrf.mxu0  ;;  %7312 = vmatprep.subr.bf16.mxu1 %v8858_v23  ;;  %v8817_v6 = vcombine.low %v4333_v48, %v4337_v59  ;;  %v8810_v40 = vcombine.high %v4325_v3, %v4329_v4  ;;  %v4321_v9 = vld [vmem:[%s9811_s9 + $0x3e0] sm:$0xff]  ;;  %v8809_v16 = vcombine.low %v4325_v3, %v4329_v4 }
 0x291   : > { %7272 = vmatpush1.bf16.msra.mxu0 %v8729_v18  ;;  %v4445_v23 = vld [vmem:[%s9811_s9 + $0x7c0] sm:$0xff]  ;;  %v8802_v17 = vcombine.high %v4317_v7, %v4321_v9  ;;  %v8801_v27 = vcombine.low %v4317_v7, %v4321_v9 }
 0x292   : > { %v3930_v10 = vpop.f32.mrf.mxu1  ;;  %v3890_v35 = vpop.f32.mrf.mxu0  ;;  %7273 = vmatprep.subr.bf16.mxu0 %v8722_v20  ;;  %v8930_v18 = vcombine.high %v4445_v23, %v4449_v11  ;;  %v4313_v20 = vld [vmem:[%s9811_s9 + $0x3a0] sm:$0xff]  ;;  %v8929_v28 = vcombine.low %v4445_v23, %v4449_v11 }
 0x293   : > { %7313 = vmatpush1.bf16.msra.mxu1 %v8857_v33  ;;  %v4309_v33 = vld [vmem:[%s9811_s9 + $0x380] sm:$0xff] }
 0x294   : > { %v3931_v36 = vpop.f32.mrf.mxu1  ;;  %7314 = vmatprep.subr.bf16.mxu1 %v8850_v26  ;;  %v4437_v26 = vld [vmem:[%s9811_s9 + $0x780] sm:$0xff]  ;;  %v8794_v30 = vcombine.high %v4309_v33, %v4313_v20 }
 0x295   : > { %7274 = vmatpush1.bf16.msra.mxu0 %v8721_v34  ;;  %v4441_v51 = vld [vmem:[%s9811_s9 + $0x7a0] sm:$0xff] }
 0x296   : > { %7275 = vmatprep.subr.bf16.mxu0 %v8714_v53  ;;  %v8922_v31 = vcombine.high %v4437_v26, %v4441_v51  ;;  %v4301_v10 = vld [vmem:[%s9811_s9 + $0x340] sm:$0xff]  ;;  %v8793_v53 = vcombine.low %v4309_v33, %v4313_v20  ;;  %v8921_v36 = vcombine.low %v4437_v26, %v4441_v51 }
 0x297   : > { %7315 = vmatpush1.bf16.msra.mxu1 %v8849_v14  ;;  %v4305_v34 = vld [vmem:[%s9811_s9 + $0x360] sm:$0xff] }
 0x298   : > { %7316 = vmatprep.subr.bf16.mxu1 %v8842_v37  ;;  %v4429_v35 = vld [vmem:[%s9811_s9 + $0x740] sm:$0xff]  ;;  %v8786_v37 = vcombine.high %v4301_v10, %v4305_v34 }
 0x299   : > { %7276 = vmatpush1.bf16.msra.mxu0 %v8713_v63  ;;  %v4433_v14 = vld [vmem:[%s9811_s9 + $0x760] sm:$0xff] }
 0x29a   : > { %7277 = vmatprep.subr.bf16.mxu0 %v8706_v45  ;;  %v8914_v38 = vcombine.high %v4429_v35, %v4433_v14  ;;  %v4297_v54 = vld [vmem:[%s9811_s9 + $0x320] sm:$0xff]  ;;  %v8913_v45 = vcombine.low %v4429_v35, %v4433_v14  ;;  %v4181_v14 = vmax.f32 %v10384_v24, 0.0 }
 0x29b   : > { %7317 = vmatpush1.bf16.msra.mxu1 %v8841_v43  ;;  %v4421_v42 = vld [vmem:[%s9811_s9 + $0x700] sm:$0xff]  ;;  %v8785_v43 = vcombine.low %v4301_v10, %v4305_v34  ;;  %v4179_v10 = vmax.f32 %v10232_v29, 0.0 }
 0x29c   : > { %7318 = vmatprep.subr.bf16.mxu1 %v8834_v46  ;;  %v4425_v63 = vld [vmem:[%s9811_s9 + $0x720] sm:$0xff]  ;;  %v8778_v46 = vcombine.high %v4293_v39, %v4297_v54 }
 0x29d   : > { %7278 = vmatpush1.bf16.msra.mxu0 %v8705_v13  ;;  %v8906_v47 = vcombine.high %v4421_v42, %v4425_v63  ;;  %v4285_v49 = vld [vmem:[%s9811_s9 + $0x2c0] sm:$0xff] }
 0x29e   : > { %7279 = vmatprep.subr.bf16.mxu0 %v8698_v0  ;;  %v4289_v50 = vld [vmem:[%s9811_s9 + $0x2e0] sm:$0xff]  ;;  %v8905_v0 = vcombine.low %v4421_v42, %v4425_v63  ;;  %v10544_v63 = vpack.c.bf16 %v4181_v14, %v4181_v14 }
 0x29f   : > { %7319 = vmatpush1.bf16.msra.mxu1 %v8833_v56  ;;  %v4413_v55 = vld [vmem:[%s9811_s9 + $0x6c0] sm:$0xff]  ;;  %v8777_v56 = vcombine.low %v4293_v39, %v4297_v54  ;;  %v10542_v54 = vpack.c.bf16 %v4179_v10, %v4179_v10 }
 0x2a0   : > { %7320 = vmatprep.subr.bf16.mxu1 %v8826_v57  ;;  %v4417_v13 = vld [vmem:[%s9811_s9 + $0x6e0] sm:$0xff]  ;;  %v8770_v57 = vcombine.high %v4285_v49, %v4289_v50 }
 0x2a1   : > { %7280 = vmatpush1.bf16.msra.mxu0 %v8697_v60  ;;  %v8898_v58 = vcombine.high %v4413_v55, %v4417_v13  ;;  %v4277_v25 = vld [vmem:[%s9811_s9 + $0x280] sm:$0xff] }
 0x2a2   : > { %7281 = vmatprep.subr.bf16.mxu0 %v8690_v62  ;;  %v4281_v48 = vld [vmem:[%s9811_s9 + $0x2a0] sm:$0xff]  ;;  %v8897_v62 = vcombine.low %v4413_v55, %v4417_v13 }
 0x2a3   : > { %7321 = vmatpush1.bf16.msra.mxu1 %v8825_v61  ;;  %v4405_v59 = vld [vmem:[%s9811_s9 + $0x680] sm:$0xff]  ;;  %v8769_v61 = vcombine.low %v4285_v49, %v4289_v50 }
 0x2a4   : > { %7322 = vmatprep.subr.bf16.mxu1 %v8818_v1  ;;  %v4409_v60 = vld [vmem:[%s9811_s9 + $0x6a0] sm:$0xff]  ;;  %v8762_v1 = vcombine.high %v4277_v25, %v4281_v48 }
 0x2a5   : > { %7282 = vmatpush1.bf16.msra.mxu0 %v8689_v5  ;;  %v8890_v2 = vcombine.high %v4405_v59, %v4409_v60  ;;  %v4269_v32 = vld [vmem:[%s9811_s9 + $0x240] sm:$0xff] }
 0x2a6   : > { %7283 = vmatprep.subr.bf16.mxu0 %v8682_v41  ;;  %v4273_v3 = vld [vmem:[%s9811_s9 + $0x260] sm:$0xff]  ;;  %v8889_v41 = vcombine.low %v4405_v59, %v4409_v60 }
 0x2a7   : > { %7323 = vmatpush1.bf16.msra.mxu1 %v8817_v6  ;;  %v4397_v4 = vld [vmem:[%s9811_s9 + $0x640] sm:$0xff]  ;;  %v8761_v6 = vcombine.low %v4277_v25, %v4281_v48 }
 0x2a8   : > { %7324 = vmatprep.subr.bf16.mxu1 %v8810_v40  ;;  %v4401_v5 = vld [vmem:[%s9811_s9 + $0x660] sm:$0xff]  ;;  %v8754_v40 = vcombine.high %v4269_v32, %v4273_v3 }
 0x2a9   : > { %7284 = vmatpush1.bf16.msra.mxu0 %v8681_v12  ;;  %v8882_v7 = vcombine.high %v4397_v4, %v4401_v5  ;;  %v4261_v9 = vld [vmem:[%s9811_s9 + $0x200] sm:$0xff] }
 0x2aa   : > { %7285 = vmatprep.subr.bf16.mxu0 %v8802_v17  ;;  %v4265_v23 = vld [vmem:[%s9811_s9 + $0x220] sm:$0xff]  ;;  %v8753_v17 = vcombine.low %v4269_v32, %v4273_v3 }
 0x2ab   : > { %7325 = vmatpush1.bf16.msra.mxu1 %v8809_v16  ;;  %v4389_v11 = vld [vmem:[%s9811_s9 + $0x600] sm:$0xff]  ;;  %v887_v16 = vsub.s32 5, %v9845_v44  ;;  %v8746_v33 = vcombine.high %v4261_v9, %v4265_v23 }
 0x2ac   : > { %7326 = vmatprep.subr.bf16.mxu1 %v8930_v18  ;;  %v4393_v12 = vld [vmem:[%s9811_s9 + $0x620] sm:$0xff]  ;;  %v8881_v18 = vcombine.low %v4397_v4, %v4401_v5 }
 0x2ad   : > { %7286 = vmatpush2.bf16.msra.mxu0 %v8801_v27  ;;  %v8874_v20 = vcombine.high %v4389_v11, %v4393_v12  ;;  %v4509_v26 = vld [vmem:[%s9811_s9 + $0x9c0] sm:$0xff]  ;;  %v8873_v34 = vcombine.low %v4389_v11, %v4393_v12 }
 0x2ae   : > { %7287 = vmatprep.subr.bf16.mxu0 %v8794_v30  ;;  %v4513_v51 = vld [vmem:[%s9811_s9 + $0x9e0] sm:$0xff]  ;;  %v888_v30 = vrot.slane %v10454_v52, %v887_v16 }
 0x2af   : > { %7327 = vmatpush2.bf16.msra.mxu1 %v8929_v28  ;;  %v4637_v27 = vld [vmem:[%s9811_s9 + $0xdc0] sm:$0xff]  ;;  %v8994_v35 = vcombine.high %v4509_v26, %v4513_v51  ;;  %v8993_v29 = vcombine.low %v4509_v26, %v4513_v51 }
 0x2b0   : > { %7328 = vmatprep.subr.bf16.mxu1 %v8922_v31  ;;  %v4641_v28 = vld [vmem:[%s9811_s9 + $0xde0] sm:$0xff]  ;;  %v8745_v31 = vcombine.low %v4261_v9, %v4265_v23  ;;  %v3888_v52 = vadd.f32 %v10470_v19, %v888_v30 }
 0x2b1   : > { %7288 = vmatpush2.bf16.msra.mxu0 %v8793_v53  ;;  %v4501_v53 = vld [vmem:[%s9811_s9 + $0x980] sm:$0xff]  ;;  %v9121_v24 = vcombine.low %v4637_v27, %v4641_v28 }
 0x2b2   : > { %7289 = vmatprep.subr.bf16.mxu0 %v8786_v37  ;;  %v9122_v37 = vcombine.high %v4637_v27, %v4641_v28  ;;  %v4633_v39 = vld [vmem:[%s9811_s9 + $0xda0] sm:$0xff]  ;;  %v3929_v50 = vadd.f32 %v10475_v22, %v3888_v52 }
 0x2b3   : > { %7329 = vmatpush2.bf16.msra.mxu1 %v8921_v36  ;;  %v4505_v36 = vld [vmem:[%s9811_s9 + $0x9a0] sm:$0xff] }
 0x2b4   : > { %7330 = vmatprep.subr.bf16.mxu1 %v8914_v38  ;;  %v4629_v38 = vld [vmem:[%s9811_s9 + $0xd80] sm:$0xff]  ;;  %v8986_v42 = vcombine.high %v4501_v53, %v4505_v36  ;;  %v8985_v13 = vcombine.low %v4501_v53, %v4505_v36 }
 0x2b5   : > { %7290 = vmatpush2.bf16.msra.mxu0 %v8785_v43  ;;  %v4493_v43 = vld [vmem:[%s9811_s9 + $0x940] sm:$0xff] }
 0x2b6   : > { %7291 = vmatprep.subr.bf16.mxu0 %v8778_v46  ;;  %v9114_v46 = vcombine.high %v4629_v38, %v4633_v39  ;;  %v4621_v19 = vld [vmem:[%s9811_s9 + $0xd40] sm:$0xff] }
 0x2b7   : > { %7331 = vmatpush2.bf16.msra.mxu1 %v8913_v45  ;;  %v4497_v45 = vld [vmem:[%s9811_s9 + $0x960] sm:$0xff] }
 0x2b8   : > { %7332 = vmatprep.subr.bf16.mxu1 %v8906_v47  ;;  %v4625_v49 = vld [vmem:[%s9811_s9 + $0xd60] sm:$0xff]  ;;  %v8977_v32 = vcombine.low %v4493_v43, %v4497_v45 }
 0x2b9   : > { %7292 = vmatpush2.bf16.msra.mxu0 %v8777_v56  ;;  %v4485_v48 = vld [vmem:[%s9811_s9 + $0x900] sm:$0xff]  ;;  %v9106_v22 = vcombine.high %v4621_v19, %v4625_v49  ;;  %v9105_v5 = vcombine.low %v4621_v19, %v4625_v49 }
 0x2ba   : > { %7293 = vmatprep.subr.bf16.mxu0 %v8770_v57  ;;  %v9113_v57 = vcombine.low %v4629_v38, %v4633_v39  ;;  %v4489_v59 = vld [vmem:[%s9811_s9 + $0x920] sm:$0xff] }
 0x2bb   : > { %7333 = vmatpush2.bf16.msra.mxu1 %v8905_v0  ;;  %v8978_v0 = vcombine.high %v4493_v43, %v4497_v45  ;;  %v8970_v4 = vcombine.high %v4485_v48, %v4489_v59  ;;  %v4605_v23 = vld [vmem:[%s9811_s9 + $0xcc0] sm:$0xff]  ;;  %v8969_v16 = vcombine.low %v4485_v48, %v4489_v59 }
 0x2bc   : > { %7334 = vmatprep.subr.bf16.mxu1 %v8898_v58  ;;  %v4609_v11 = vld [vmem:[%s9811_s9 + $0xce0] sm:$0xff] }
 0x2bd   : > { %7294 = vmatpush2.bf16.msra.mxu0 %v8769_v61  ;;  %v4613_v61 = vld [vmem:[%s9811_s9 + $0xd00] sm:$0xff]  ;;  %v9090_v27 = vcombine.high %v4605_v23, %v4609_v11 }
 0x2be   : > { %7295 = vmatprep.subr.bf16.mxu0 %v8762_v1  ;;  %v4469_v26 = vld [vmem:[%s9811_s9 + $0x880] sm:$0xff] }
 0x2bf   : > { %7335 = vmatpush2.bf16.msra.mxu1 %v8897_v62  ;;  %v4617_v62 = vld [vmem:[%s9811_s9 + $0xd20] sm:$0xff] }
 0x2c0   : > { %7336 = vmatprep.subr.bf16.mxu1 %v8890_v2  ;;  %v9098_v9 = vcombine.high %v4613_v61, %v4617_v62  ;;  %v4473_v51 = vld [vmem:[%s9811_s9 + $0x8a0] sm:$0xff] }
 0x2c1   : > { %7296 = vmatpush2.bf16.msra.mxu0 %v8761_v6  ;;  %v4597_v30 = vld [vmem:[%s9811_s9 + $0xc80] sm:$0xff]  ;;  %v8953_v39 = vcombine.low %v4469_v26, %v4473_v51 }
 0x2c2   : > { %7297 = vmatprep.subr.bf16.mxu0 %v8754_v40  ;;  %v4477_v40 = vld [vmem:[%s9811_s9 + $0x8c0] sm:$0xff] }
 0x2c3   : > { %7337 = vmatpush2.bf16.msra.mxu1 %v8889_v41  ;;  %v4461_v14 = vld [vmem:[%s9811_s9 + $0x840] sm:$0xff] }
 0x2c4   : > { %7338 = vmatprep.subr.bf16.mxu1 %v8882_v7  ;;  %v4481_v7 = vld [vmem:[%s9811_s9 + $0x8e0] sm:$0xff] }
 0x2c5   : > { %7298 = vmatpush2.bf16.msra.mxu0 %v8753_v17  ;;  %v8962_v17 = vcombine.high %v4477_v40, %v4481_v7  ;;  %v8961_v10 = vcombine.low %v4477_v40, %v4481_v7  ;;  %v4465_v53 = vld [vmem:[%s9811_s9 + $0x860] sm:$0xff] }
 0x2c6   : > { %7299 = vmatprep.subr.bf16.mxu0 %v8746_v33  ;;  %v10568_v33 = vld [vmem:[%s9811_s9 + $0x5c8] sm:$0xff]  ;;  %v4593_v38 = vld [vmem:[%s9811_s9 + $0xc60] sm:$0xff]  ;;  %v8946_v52 = vcombine.high %v4461_v14, %v4465_v53  ;;  %v8945_v19 = vcombine.low %v4461_v14, %v4465_v53 }
 0x2c7   : > { %7339 = vmatpush2.bf16.msra.mxu1 %v8881_v18  ;;  %v9097_v18 = vcombine.low %v4613_v61, %v4617_v62  ;;  %v4581_v45 = vld [vmem:[%s9811_s9 + $0xc00] sm:$0xff] }
 0x2c8   : > { %7340 = vmatprep.subr.bf16.mxu1 %v8874_v20  ;;  %v10571_v20 = vld [vmem:[%s9811_s9 + $0x5e8] sm:$0xff]  ;;  %v4693_v62 = vld [vmem:[%s9811_s9 + $0xf80] sm:$0xff] }
 0x2c9   : > { %7300 = vmatpush2.bf16.msra.mxu0 %v8745_v31  ;;  %v8867_v28 = vcombine.low %v10568_v33, %v10571_v20  ;;  %v4601_v31 = vld [vmem:[%s9811_s9 + $0xca0] sm:$0xff] }
 0x2ca   : > { %7351 = vmatprep.subr.bf16.mxu0 %v8994_v35  ;;  %v9089_v35 = vcombine.low %v4605_v23, %v4609_v11  ;;  %v9082_v36 = vcombine.high %v4597_v30, %v4601_v31  ;;  %v4689_v40 = vld [vmem:[%s9811_s9 + $0xf60] sm:$0xff] }
 0x2cb   : > { %7341 = vmatpush2.bf16.msra.mxu1 %v8873_v34  ;;  %v8954_v34 = vcombine.high %v4469_v26, %v4473_v51  ;;  %v4549_v11 = vld [vmem:[%s9811_s9 + $0xb00] sm:$0xff] }
 0x2cc   : > { %7392 = vmatprep.subr.bf16.mxu1 %v9122_v37  ;;  %v10548_v47 = vpop.f32.mrf.mxu0  ;;  %7302 = vmatmul.mubr.bf16.vlgmr.msra.gmra.mxu0 %v10542_v54  ;;  %v4589_v37 = vld [vmem:[%s9811_s9 + $0xc40] sm:$0xff] }
 0x2cd   : > { %7352 = vmatpush1.bf16.msra.mxu0 %v8993_v29  ;;  %v9081_v29 = vcombine.low %v4597_v30, %v4601_v31  ;;  %v9074_v43 = vcombine.high %v4589_v37, %v4593_v38  ;;  %v4681_v26 = vld [vmem:[%s9811_s9 + $0xf20] sm:$0xff] }
 0x2ce   : > { %v10554_v55 = vpop.f32.mrf.mxu1  ;;  %7343 = vmatmul.mubr.bf16.vlgmr.msra.gmra.mxu1 %v10544_v63  ;;  %v3969_v56 = vpop.f32.mrf.mxu0  ;;  %7353 = vmatprep.subr.bf16.mxu0 %v8986_v42  ;;  %v4453_v42 = vld [vmem:[%s9811_s9 + $0x800] sm:$0xff] }
 0x2cf   : > { %7393 = vmatpush1.bf16.msra.mxu1 %v9121_v24  ;;  %v3970_v58 = vadd.f32 %v3969_v56, %v3929_v50  ;;  %v4457_v24 = vld [vmem:[%s9811_s9 + $0x820] sm:$0xff]  ;;  %v9073_v50 = vcombine.low %v4589_v37, %v4593_v38 }
 0x2d0   : > { %v4010_v25 = vpop.f32.mrf.mxu1  ;;  %7394 = vmatprep.subr.bf16.mxu1 %v9114_v46  ;;  %v3971_v60 = vpop.f32.mrf.mxu0  ;;  %v4585_v46 = vld [vmem:[%s9811_s9 + $0xc20] sm:$0xff]  ;;  %v8938_v49 = vcombine.high %v4453_v42, %v4457_v24 }
 0x2d1   : > { %v4011_v1 = vadd.f32 %v4010_v25, %v3970_v58  ;;  %7354 = vmatpush1.bf16.msra.mxu0 %v8985_v13  ;;  %v4573_v13 = vld [vmem:[%s9811_s9 + $0xbc0] sm:$0xff]  ;;  %v8937_v25 = vcombine.low %v4453_v42, %v4457_v24  ;;  %v9065_v59 = vcombine.low %v4581_v45, %v4585_v46 }
 0x2d2   : > { %v4012_v2 = vpop.f32.mrf.mxu1  ;;  %v3972_v3 = vpop.f32.mrf.mxu0  ;;  %7355 = vmatprep.subr.bf16.mxu0 %v8978_v0  ;;  %v4577_v56 = vld [vmem:[%s9811_s9 + $0xbe0] sm:$0xff]  ;;  %v9066_v0 = vcombine.high %v4581_v45, %v4585_v46 }
 0x2d3   : > { %7395 = vmatpush1.bf16.msra.mxu1 %v9113_v57  ;;  %v4184_v6 = vmax.f32 %v4011_v1, 0.0  ;;  %v4701_v57 = vld [vmem:[%s9811_s9 + $0xfc0] sm:$0xff]  ;;  %v9058_v48 = vcombine.high %v4573_v13, %v4577_v56  ;;  %v9057_v2 = vcombine.low %v4573_v13, %v4577_v56 }
 0x2d4   : > { %v4013_v41 = vpop.f32.mrf.mxu1  ;;  %7396 = vmatprep.subr.bf16.mxu1 %v9106_v22  ;;  %v4705_v58 = vld [vmem:[%s9811_s9 + $0xfe0] sm:$0xff] }
 0x2d5   : > { %v10565_v12 = vpack.c.bf16 %v4184_v6, %v4184_v6  ;;  %7356 = vmatpush1.bf16.msra.mxu0 %v8977_v32  ;;  %v4565_v22 = vld [vmem:[%s9811_s9 + $0xb80] sm:$0xff]  ;;  %v9186_v61 = vcombine.high %v4701_v57, %v4705_v58  ;;  %v9185_v3 = vcombine.low %v4701_v57, %v4705_v58 }
 0x2d6   : > { %7357 = vmatprep.subr.bf16.mxu0 %v8970_v4  ;;  %v4569_v60 = vld [vmem:[%s9811_s9 + $0xba0] sm:$0xff] }
 0x2d7   : > { %7397 = vmatpush1.bf16.msra.mxu1 %v9105_v5  ;;  %7383 = vmatprep.mubr.bf16.mxu0 %v10565_v12  ;;  %v4697_v1 = vld [vmem:[%s9811_s9 + $0xfa0] sm:$0xff]  ;;  %v9050_v32 = vcombine.high %v4565_v22, %v4569_v60  ;;  %v9049_v7 = vcombine.low %v4565_v22, %v4569_v60 }
 0x2d8   : > { %7398 = vmatprep.subr.bf16.mxu1 %v9098_v9  ;;  %v4557_v4 = vld [vmem:[%s9811_s9 + $0xb40] sm:$0xff]  ;;  %v9178_v6 = vcombine.high %v4693_v62, %v4697_v1  ;;  %v9177_v23 = vcombine.low %v4693_v62, %v4697_v1  ;;  %v4254_v1 = vld [vmem:[%s9811_s9 + $0x1c8] sm:$0xff] }
 0x2d9   : > { %7358 = vmatpush1.bf16.msra.mxu0 %v8969_v16  ;;  %v4561_v5 = vld [vmem:[%s9811_s9 + $0xb60] sm:$0xff] }
 0x2da   : > { %7359 = vmatprep.subr.bf16.mxu0 %v8962_v17  ;;  %v4685_v41 = vld [vmem:[%s9811_s9 + $0xf40] sm:$0xff]  ;;  %v9042_v9 = vcombine.high %v4557_v4, %v4561_v5  ;;  %v9041_v51 = vcombine.low %v4557_v4, %v4561_v5 }
 0x2db   : > { %7399 = vmatpush1.bf16.msra.mxu1 %v9097_v18  ;;  %v4553_v16 = vld [vmem:[%s9811_s9 + $0xb20] sm:$0xff]  ;;  %v9170_v17 = vcombine.high %v4685_v41, %v4689_v40  ;;  %v9169_v30 = vcombine.low %v4685_v41, %v4689_v40  ;;  %v4250_v41 = vld [vmem:[%s9811_s9 + $0x1a8] sm:$0xff]  ;;  %v8868_v40 = vcombine.high %v10568_v33, %v10571_v20 }
 0x2dc   : > { %7400 = vmatprep.subr.bf16.mxu1 %v9090_v27  ;;  %v4677_v18 = vld [vmem:[%s9811_s9 + $0xf00] sm:$0xff]  ;;  %v9034_v27 = vcombine.high %v4549_v11, %v4553_v16  ;;  %v9033_v53 = vcombine.low %v4549_v11, %v4553_v16  ;;  %v4238_v11 = vld [vmem:[%s9811_s9 + $0x148] sm:$0xff] }
 0x2dd   : > { %7360 = vmatpush1.bf16.msra.mxu0 %v8961_v10  ;;  %v4541_v31 = vld [vmem:[%s9811_s9 + $0xac0] sm:$0xff]  ;;  %v9161_v37 = vcombine.low %v4677_v18, %v4681_v26  ;;  %v4242_v16 = vld [vmem:[%s9811_s9 + $0x168] sm:$0xff] }
 0x2de   : > { %7361 = vmatprep.subr.bf16.mxu0 %v8954_v34  ;;  %v4545_v10 = vld [vmem:[%s9811_s9 + $0xae0] sm:$0xff]  ;;  %v9162_v34 = vcombine.high %v4677_v18, %v4681_v26 }
 0x2df   : > { %7401 = vmatpush1.bf16.msra.mxu1 %v9089_v35  ;;  %v4669_v35 = vld [vmem:[%s9811_s9 + $0xec0] sm:$0xff]  ;;  %v9025_v24 = vcombine.low %v4541_v31, %v4545_v10 }
 0x2e0   : > { %7402 = vmatprep.subr.bf16.mxu1 %v9082_v36  ;;  %v4673_v14 = vld [vmem:[%s9811_s9 + $0xee0] sm:$0xff]  ;;  %v9026_v36 = vcombine.high %v4541_v31, %v4545_v10  ;;  %v4230_v31 = vld [vmem:[%s9811_s9 + $0x108] sm:$0xff] }
 0x2e1   : > { %7362 = vmatpush1.bf16.msra.mxu0 %v8953_v39  ;;  %v4533_v38 = vld [vmem:[%s9811_s9 + $0xa80] sm:$0xff]  ;;  %v9153_v45 = vcombine.low %v4669_v35, %v4673_v14  ;;  %v4234_v10 = vld [vmem:[%s9811_s9 + $0x128] sm:$0xff] }
 0x2e2   : > { %7363 = vmatprep.subr.bf16.mxu0 %v8946_v52  ;;  %v4537_v39 = vld [vmem:[%s9811_s9 + $0xaa0] sm:$0xff]  ;;  %v9154_v52 = vcombine.high %v4669_v35, %v4673_v14  ;;  %v8723_v14 = vcombine.low %v4238_v11, %v4242_v16 }
 0x2e3   : > { %7403 = vmatpush1.bf16.msra.mxu1 %v9081_v29  ;;  %v4661_v29 = vld [vmem:[%s9811_s9 + $0xe80] sm:$0xff]  ;;  %v9017_v56 = vcombine.low %v4533_v38, %v4537_v39 }
 0x2e4   : > { %7404 = vmatprep.subr.bf16.mxu1 %v9074_v43  ;;  %v4665_v42 = vld [vmem:[%s9811_s9 + $0xea0] sm:$0xff]  ;;  %v9018_v43 = vcombine.high %v4533_v38, %v4537_v39  ;;  %v4222_v38 = vld [vmem:[%s9811_s9 + $0xc8] sm:$0xff] }
 0x2e5   : > { %7364 = vmatpush1.bf16.msra.mxu0 %v8945_v19  ;;  %v4525_v46 = vld [vmem:[%s9811_s9 + $0xa40] sm:$0xff]  ;;  %v9145_v58 = vcombine.low %v4661_v29, %v4665_v42  ;;  %v4226_v39 = vld [vmem:[%s9811_s9 + $0xe8] sm:$0xff] }
 0x2e6   : > { %7365 = vmatprep.subr.bf16.mxu0 %v8938_v49  ;;  %v4529_v19 = vld [vmem:[%s9811_s9 + $0xa60] sm:$0xff]  ;;  %v9146_v49 = vcombine.high %v4661_v29, %v4665_v42  ;;  %v8708_v29 = vcombine.high %v4222_v38, %v4226_v39  ;;  %v4214_v42 = vld [vmem:[%s9811_s9 + $0x88] sm:$0xff] }
 0x2e7   : > { %7405 = vmatpush1.bf16.msra.mxu1 %v9073_v50  ;;  %v4653_v50 = vld [vmem:[%s9811_s9 + $0xe40] sm:$0xff]  ;;  %v9010_v57 = vcombine.high %v4525_v46, %v4529_v19 }
 0x2e8   : > { %7406 = vmatprep.subr.bf16.mxu1 %v9066_v0  ;;  %v4657_v13 = vld [vmem:[%s9811_s9 + $0xe60] sm:$0xff]  ;;  %v3968_v0 = vadd.f32 %v10548_v47, %v10472_v21 }
 0x2e9   : > { %7366 = vmatpush1.bf16.msra.mxu0 %v8937_v25  ;;  %v4517_v25 = vld [vmem:[%s9811_s9 + $0xa00] sm:$0xff]  ;;  %v9137_v47 = vcombine.low %v4653_v50, %v4657_v13 }
 0x2ea   : > { %7367 = vmatprep.subr.bf16.mxu0 %v9058_v48  ;;  %v4521_v48 = vld [vmem:[%s9811_s9 + $0xa20] sm:$0xff]  ;;  %v4009_v62 = vadd.f32 %v10554_v55, %v3968_v0  ;;  %v4246_v55 = vld [vmem:[%s9811_s9 + $0x188] sm:$0xff] }
 0x2eb   : > { %7407 = vmatpush1.bf16.msra.mxu1 %v9065_v59  ;;  %v9138_v59 = vcombine.high %v4653_v50, %v4657_v13  ;;  %v4645_v22 = vld [vmem:[%s9811_s9 + $0xe00] sm:$0xff]  ;;  %v9002_v21 = vcombine.high %v4517_v25, %v4521_v48  ;;  %v8731_v26 = vcombine.low %v4246_v55, %v4250_v41  ;;  %v4198_v13 = vld [vmem:[%s9811_s9 + $0x8] sm:$0xff] }
 0x2ec   : > { %7408 = vmatprep.subr.bf16.mxu1 %v9186_v61  ;;  %v4649_v60 = vld [vmem:[%s9811_s9 + $0xe20] sm:$0xff]  ;;  %v9009_v61 = vcombine.low %v4525_v46, %v4529_v19  ;;  %v4183_v4 = vmax.f32 %v4009_v62, 0.0  ;;  %v4206_v46 = vld [vmem:[%s9811_s9 + $0x48] sm:$0xff] }
 0x2ed   : > { %7368 = vmatpush2.bf16.msra.mxu0 %v9057_v2  ;;  %v4258_v2 = vld [vmem:[%s9811_s9 + $0x1e8] sm:$0xff] }
 0x2ee   : > { %7369 = vmatprep.subr.bf16.mxu0 %v9050_v32  ;;  %v9130_v32 = vcombine.high %v4645_v22, %v4649_v60  ;;  %v8740_v5 = vcombine.high %v4254_v1, %v4258_v2  ;;  %v4210_v19 = vld [vmem:[%s9811_s9 + $0x68] sm:$0xff] }
 0x2ef   : > { %7409 = vmatpush2.bf16.msra.mxu1 %v9185_v3  ;;  %v9001_v3 = vcombine.low %v4517_v25, %v4521_v48  ;;  %v8692_v50 = vcombine.high %v4206_v46, %v4210_v19  ;;  %v8691_v0 = vcombine.low %v4206_v46, %v4210_v19  ;;  %v4322_v25 = vld [vmem:[%s9811_s9 + $0x3e8] sm:$0xff] }
 0x2f0   : > { %7410 = vmatprep.subr.bf16.mxu1 %v9178_v6  ;;  %v9129_v6 = vcombine.low %v4645_v22, %v4649_v60  ;;  %v4310_v22 = vld [vmem:[%s9811_s9 + $0x388] sm:$0xff] }
 0x2f1   : > { %7370 = vmatpush2.bf16.msra.mxu0 %v9049_v7  ;;  %v8739_v7 = vcombine.low %v4254_v1, %v4258_v2  ;;  %v4314_v60 = vld [vmem:[%s9811_s9 + $0x3a8] sm:$0xff] }
 0x2f2   : > { %7371 = vmatprep.subr.bf16.mxu0 %v9042_v9  ;;  %v10629_v9 = vpack.c.bf16 %v4183_v4, %v4183_v4  ;;  %v8796_v62 = vcombine.high %v4310_v22, %v4314_v60  ;;  %v8795_v1 = vcombine.low %v4310_v22, %v4314_v60  ;;  %v4502_v46 = vld [vmem:[%s9811_s9 + $0x988] sm:$0xff] }
 0x2f3   : > { %7411 = vmatpush2.bf16.msra.mxu1 %v9177_v23  ;;  %v8732_v23 = vcombine.high %v4246_v55, %v4250_v41  ;;  %v4290_v55 = vld [vmem:[%s9811_s9 + $0x2e8] sm:$0xff] }
 0x2f4   : > { %7412 = vmatprep.subr.bf16.mxu1 %v9170_v17  ;;  %v4506_v19 = vld [vmem:[%s9811_s9 + $0x9a8] sm:$0xff] }
 0x2f5   : > { %7372 = vmatpush2.bf16.msra.mxu0 %v9041_v51 }
 0x2f6   : > { %7373 = vmatprep.subr.bf16.mxu0 %v9034_v27  ;;  %v8724_v27 = vcombine.high %v4238_v11, %v4242_v16 }
 0x2f7   : > { %7413 = vmatpush2.bf16.msra.mxu1 %v9169_v30 }
 0x2f8   : > { %7414 = vmatprep.subr.bf16.mxu1 %v9162_v34 }
 0x2f9   : > { %7374 = vmatpush2.bf16.msra.mxu0 %v9033_v53 }
 0x2fa   : > { %7375 = vmatprep.subr.bf16.mxu0 %v9026_v36  ;;  %v8716_v36 = vcombine.high %v4230_v31, %v4234_v10 }
 0x2fb   : > { %7415 = vmatpush2.bf16.msra.mxu1 %v9161_v37 }
 0x2fc   : > { %7416 = vmatprep.subr.bf16.mxu1 %v9154_v52  ;;  %v8715_v52 = vcombine.low %v4230_v31, %v4234_v10 }
 0x2fd   : > { %7376 = vmatpush2.bf16.msra.mxu0 %v9025_v24  ;;  %v4218_v24 = vld [vmem:[%s9811_s9 + $0xa8] sm:$0xff] }
 0x2fe   : > { %7377 = vmatprep.subr.bf16.mxu0 %v9018_v43  ;;  %v8707_v43 = vcombine.low %v4222_v38, %v4226_v39  ;;  %v9335_v38 = vld [vmem:[%s9809_s14] sm:$0xff] }
 0x2ff   : > { %7417 = vmatpush2.bf16.msra.mxu1 %v9153_v45  ;;  %v8700_v45 = vcombine.high %v4214_v42, %v4218_v24 }
 0x300   : > { %7418 = vmatprep.subr.bf16.mxu1 %v9146_v49  ;;  %v8699_v49 = vcombine.low %v4214_v42, %v4218_v24 }
 0x301   : > { %7378 = vmatpush2.bf16.msra.mxu0 %v9017_v56  ;;  %v4202_v56 = vld [vmem:[%s9811_s9 + $0x28] sm:$0xff] }
 0x302   : > { %7379 = vmatprep.subr.bf16.mxu0 %v9010_v57  ;;  %v8684_v57 = vcombine.high %v4198_v13, %v4202_v56  ;;  %v8683_v48 = vcombine.low %v4198_v13, %v4202_v56  ;;  %v8988_v13 = vcombine.high %v4502_v46, %v4506_v19 }
 0x303   : > { %7419 = vmatpush2.bf16.msra.mxu1 %v9145_v58  ;;  %v4318_v58 = vld [vmem:[%s9811_s9 + $0x3c8] sm:$0xff] }
 0x304   : > { %7420 = vmatprep.subr.bf16.mxu1 %v9138_v59  ;;  %v8804_v59 = vcombine.high %v4318_v58, %v4322_v25 }
 0x305   : > { %7380 = vmatpush2.bf16.msra.mxu0 %v9009_v61  ;;  %v8803_v61 = vcombine.low %v4318_v58, %v4322_v25 }
 0x306   : > { %7381 = vmatprep.subr.bf16.mxu0 %v9002_v21  ;;  %v4302_v21 = vld [vmem:[%s9811_s9 + $0x348] sm:$0xff] }
 0x307   : > { %7421 = vmatpush2.bf16.msra.mxu1 %v9137_v47  ;;  %v4306_v47 = vld [vmem:[%s9811_s9 + $0x368] sm:$0xff] }
 0x308   : > { %7422 = vmatprep.subr.bf16.mxu1 %v9130_v32  ;;  %v8788_v2 = vcombine.high %v4302_v21, %v4306_v47  ;;  %v4294_v32 = vld [vmem:[%s9811_s9 + $0x308] sm:$0xff]  ;;  %v8787_v4 = vcombine.low %v4302_v21, %v4306_v47 }
 0x309   : > { %7382 = vmatpush2.bf16.msra.mxu0 %v9001_v3  ;;  %v4298_v3 = vld [vmem:[%s9811_s9 + $0x328] sm:$0xff] }
 0x30a   : > { %7433 = vmatprep.subr.bf16.mxu0 %v8740_v5  ;;  %v8780_v5 = vcombine.high %v4294_v32, %v4298_v3  ;;  %v8779_v41 = vcombine.low %v4294_v32, %v4298_v3  ;;  %v4490_v21 = vld [vmem:[%s9811_s9 + $0x928] sm:$0xff] }
 0x30b   : > { %7423 = vmatpush2.bf16.msra.mxu1 %v9129_v6  ;;  %v4286_v6 = vld [vmem:[%s9811_s9 + $0x2c8] sm:$0xff] }
 0x30c   : > { %7474 = vmatprep.subr.bf16.mxu1 %v8868_v40  ;;  %v10633_v17 = vpop.f32.mrf.mxu0  ;;  %7384 = vmatmul.mubr.bf16.vlgmr.msra.gmra.mxu0 %v10629_v9  ;;  %v8772_v40 = vcombine.high %v4286_v6, %v4290_v55  ;;  %v8771_v11 = vcombine.low %v4286_v6, %v4290_v55  ;;  %v4374_v55 = vld [vmem:[%s9811_s9 + $0x588] sm:$0xff] }
 0x30d   : > { %7434 = vmatpush1.bf16.msra.mxu0 %v8739_v7  ;;  %7465 = vmatprep.mubr.bf16.mxu0 %v10461_v8  ;;  %v4278_v7 = vld [vmem:[%s9811_s9 + $0x288] sm:$0xff] }
 0x30e   : > { %v10636_v18 = vpop.f32.mrf.mxu1  ;;  %v10639_v51 = vpop.f32.mrf.mxu0  ;;  %7435 = vmatprep.subr.bf16.mxu0 %v8732_v23  ;;  %v4282_v23 = vld [vmem:[%s9811_s9 + $0x2a8] sm:$0xff] }
 0x30f   : > { %v8764_v16 = vcombine.high %v4278_v7, %v4282_v23  ;;  %v8763_v31 = vcombine.low %v4278_v7, %v4282_v23  ;;  %v4482_v7 = vld [vmem:[%s9811_s9 + $0x8e8] sm:$0xff] }
 0x310   : > { %v10641_v30 = vpop.f32.mrf.mxu1  ;;  %v4053_v34 = vpop.f32.mrf.mxu0 }
 0x311   : > { %7436 = vmatpush1.bf16.msra.mxu0 %v8731_v26  ;;  %v4270_v26 = vld [vmem:[%s9811_s9 + $0x248] sm:$0xff]  ;;  %v891_v34 = vsub.s32 6, %v9845_v44 }
 0x312   : > { %v4094_v35 = vpop.f32.mrf.mxu1  ;;  %v4054_v53 = vpop.f32.mrf.mxu0  ;;  %7437 = vmatprep.subr.bf16.mxu0 %v8724_v27  ;;  %v4274_v27 = vld [vmem:[%s9811_s9 + $0x268] sm:$0xff] }
 0x313   : > { %v8756_v10 = vcombine.high %v4270_v26, %v4274_v27  ;;  %v4262_v35 = vld [vmem:[%s9811_s9 + $0x208] sm:$0xff]  ;;  %v895_v53 = vsub.s32 7, %v9845_v44  ;;  %v892_v39 = vrot.slane %v9335_v38, %v891_v34 }
 0x314   : > { %v4095_v37 = vpop.f32.mrf.mxu1  ;;  %v4470_v34 = vld [vmem:[%s9811_s9 + $0x888] sm:$0xff] }
 0x315   : > { %7438 = vmatpush1.bf16.msra.mxu0 %v8723_v14  ;;  %v4266_v14 = vld [vmem:[%s9811_s9 + $0x228] sm:$0xff]  ;;  %v896_v42 = vrot.slane %v9335_v38, %v895_v53 }
 0x316   : > { %7439 = vmatprep.subr.bf16.mxu0 %v8716_v36  ;;  %v8755_v36 = vcombine.low %v4270_v26, %v4274_v27  ;;  %v8748_v37 = vcombine.high %v4262_v35, %v4266_v14  ;;  %v8747_v24 = vcombine.low %v4262_v35, %v4266_v14  ;;  %v4474_v35 = vld [vmem:[%s9811_s9 + $0x8a8] sm:$0xff] }
 0x317   : > { %v4358_v38 = vld [vmem:[%s9811_s9 + $0x508] sm:$0xff]  ;;  %v8955_v20 = vcombine.low %v4470_v34, %v4474_v35 }
 0x319   : > { %7440 = vmatpush1.bf16.msra.mxu0 %v8715_v52  ;;  %v4510_v52 = vld [vmem:[%s9811_s9 + $0x9c8] sm:$0xff] }
 0x31a   : > { %7441 = vmatprep.subr.bf16.mxu0 %v8708_v29  ;;  %v4514_v29 = vld [vmem:[%s9811_s9 + $0x9e8] sm:$0xff] }
 0x31d   : > { %7442 = vmatpush1.bf16.msra.mxu0 %v8707_v43  ;;  %v8996_v43 = vcombine.high %v4510_v52, %v4514_v29 }
 0x31e   : > { %7443 = vmatprep.subr.bf16.mxu0 %v8700_v45  ;;  %v4050_v45 = vadd.f32 %v10633_v17, %v892_v39  ;;  %v4362_v39 = vld [vmem:[%s9811_s9 + $0x528] sm:$0xff] }
 0x320   : > { %v4091_v56 = vadd.f32 %v10636_v18, %v4050_v45  ;;  %v4454_v45 = vld [vmem:[%s9811_s9 + $0x808] sm:$0xff] }
 0x321   : > { %7444 = vmatpush1.bf16.msra.mxu0 %v8699_v49  ;;  %v4052_v49 = vadd.f32 %v10639_v51, %v896_v42  ;;  %v8987_v51 = vcombine.low %v4502_v46, %v4506_v19  ;;  %v4458_v46 = vld [vmem:[%s9811_s9 + $0x828] sm:$0xff]  ;;  %v8843_v19 = vcombine.low %v4358_v38, %v4362_v39 }
 0x322   : > { %7445 = vmatprep.subr.bf16.mxu0 %v8692_v50  ;;  %v8995_v50 = vcombine.low %v4510_v52, %v4514_v29  ;;  %v4462_v52 = vld [vmem:[%s9811_s9 + $0x848] sm:$0xff] }
 0x323   : > { %v4093_v25 = vadd.f32 %v10641_v30, %v4052_v49  ;;  %v4466_v29 = vld [vmem:[%s9811_s9 + $0x868] sm:$0xff] }
 0x324   : > { %v8948_v42 = vcombine.high %v4462_v52, %v4466_v29  ;;  %v8947_v49 = vcombine.low %v4462_v52, %v4466_v29  ;;  %v4434_v52 = vld [vmem:[%s9811_s9 + $0x768] sm:$0xff] }
 0x325   : > { %7446 = vmatpush1.bf16.msra.mxu0 %v8691_v0  ;;  %v4494_v0 = vld [vmem:[%s9811_s9 + $0x948] sm:$0xff] }
 0x326   : > { %7447 = vmatprep.subr.bf16.mxu0 %v8684_v57  ;;  %v4498_v57 = vld [vmem:[%s9811_s9 + $0x968] sm:$0xff] }
 0x327   : > { %v8980_v22 = vcombine.high %v4494_v0, %v4498_v57  ;;  %v4534_v29 = vld [vmem:[%s9811_s9 + $0xa88] sm:$0xff] }
 0x329   : > { %7448 = vmatpush1.bf16.msra.mxu0 %v8683_v48 }
 0x32a   : > { %7449 = vmatprep.subr.bf16.mxu0 %v8804_v59 }
 0x32d   : > { %7450 = vmatpush2.bf16.msra.mxu0 %v8803_v61 }
 0x32e   : > { %7451 = vmatprep.subr.bf16.mxu0 %v8796_v62  ;;  %v4486_v62 = vld [vmem:[%s9811_s9 + $0x908] sm:$0xff] }
 0x331   : > { %7452 = vmatpush2.bf16.msra.mxu0 %v8795_v1 }
 0x332   : > { %7453 = vmatprep.subr.bf16.mxu0 %v8788_v2  ;;  %v8979_v2 = vcombine.low %v4494_v0, %v4498_v57  ;;  %v4346_v0 = vld [vmem:[%s9811_s9 + $0x4a8] sm:$0xff] }
 0x333   : > { %v4574_v57 = vld [vmem:[%s9811_s9 + $0xbc8] sm:$0xff] }
 0x335   : > { %7454 = vmatpush2.bf16.msra.mxu0 %v8787_v4  ;;  %v8972_v4 = vcombine.high %v4486_v62, %v4490_v21 }
 0x336   : > { %7455 = vmatprep.subr.bf16.mxu0 %v8780_v5 }
 0x339   : > { %7456 = vmatpush2.bf16.msra.mxu0 %v8779_v41  ;;  %v4378_v41 = vld [vmem:[%s9811_s9 + $0x5a8] sm:$0xff] }
 0x33a   : > { %7457 = vmatprep.subr.bf16.mxu0 %v8772_v40  ;;  %v4478_v40 = vld [vmem:[%s9811_s9 + $0x8c8] sm:$0xff]  ;;  %v8860_v26 = vcombine.high %v4374_v55, %v4378_v41  ;;  %v8859_v14 = vcombine.low %v4374_v55, %v4378_v41 }
 0x33b   : > { %v8964_v27 = vcombine.high %v4478_v40, %v4482_v7  ;;  %v8963_v53 = vcombine.low %v4478_v40, %v4482_v7  ;;  %v4446_v55 = vld [vmem:[%s9811_s9 + $0x7c8] sm:$0xff] }
 0x33c   : > { %v4450_v41 = vld [vmem:[%s9811_s9 + $0x7e8] sm:$0xff] }
 0x33d   : > { %7458 = vmatpush2.bf16.msra.mxu0 %v8771_v11  ;;  %v4550_v40 = vld [vmem:[%s9811_s9 + $0xb08] sm:$0xff] }
 0x33e   : > { %7459 = vmatprep.subr.bf16.mxu0 %v8764_v16  ;;  %v8971_v16 = vcombine.low %v4486_v62, %v4490_v21  ;;  %v4554_v7 = vld [vmem:[%s9811_s9 + $0xb28] sm:$0xff] }
 0x341   : > { %7460 = vmatpush2.bf16.msra.mxu0 %v8763_v31  ;;  %v4366_v31 = vld [vmem:[%s9811_s9 + $0x548] sm:$0xff] }
 0x342   : > { %7461 = vmatprep.subr.bf16.mxu0 %v8756_v10  ;;  %v4370_v10 = vld [vmem:[%s9811_s9 + $0x568] sm:$0xff] }
 0x343   : > { %v8851_v33 = vcombine.low %v4366_v31, %v4370_v10 }
 0x345   : > { %7462 = vmatpush2.bf16.msra.mxu0 %v8755_v36  ;;  %v8852_v36 = vcombine.high %v4366_v31, %v4370_v10  ;;  %v9036_v31 = vcombine.high %v4550_v40, %v4554_v7  ;;  %v4438_v10 = vld [vmem:[%s9811_s9 + $0x788] sm:$0xff] }
 0x346   : > { %7463 = vmatprep.subr.bf16.mxu0 %v8748_v37  ;;  %v8956_v37 = vcombine.high %v4470_v34, %v4474_v35  ;;  %v4442_v34 = vld [vmem:[%s9811_s9 + $0x7a8] sm:$0xff] }
 0x347   : > { %v4542_v35 = vld [vmem:[%s9811_s9 + $0xac8] sm:$0xff] }
 0x349   : > { %7464 = vmatpush2.bf16.msra.mxu0 %v8747_v24  ;;  %v4350_v24 = vld [vmem:[%s9811_s9 + $0x4c8] sm:$0xff] }
 0x34a   : > { %7515 = vmatprep.subr.bf16.mxu0 %v8996_v43  ;;  %v4354_v43 = vld [vmem:[%s9811_s9 + $0x4e8] sm:$0xff] }
 0x34c   : > { %v4131_v58 = vpop.f32.mrf.mxu0  ;;  %7466 = vmatmul.mubr.bf16.vlgmr.msra.gmra.mxu0 %v10542_v54 }
 0x34d   : > { %v4132_v17 = vadd.f32 %v4131_v58, %v4091_v56  ;;  %7516 = vmatpush1.bf16.msra.mxu0 %v8995_v50  ;;  %7547 = vmatprep.mubr.bf16.mxu0 %v10565_v12  ;;  %v8836_v50 = vcombine.high %v4350_v24, %v4354_v43  ;;  %v4342_v56 = vld [vmem:[%s9811_s9 + $0x488] sm:$0xff] }
 0x34e   : > { %v4172_v48 = vpop.f32.mrf.mxu1  ;;  %v4133_v59 = vpop.f32.mrf.mxu0  ;;  %7517 = vmatprep.subr.bf16.mxu0 %v8988_v13  ;;  %v8940_v13 = vcombine.high %v4454_v45, %v4458_v46  ;;  %v4578_v58 = vld [vmem:[%s9811_s9 + $0xbe8] sm:$0xff] }
 0x34f   : > { %v4173_v60 = vadd.f32 %v4172_v48, %v4132_v17  ;;  %v4134_v18 = vadd.f32 %v4133_v59, %v4093_v25  ;;  %v8835_v25 = vcombine.low %v4350_v24, %v4354_v43  ;;  %v8939_v17 = vcombine.low %v4454_v45, %v4458_v46  ;;  %v4334_v59 = vld [vmem:[%s9811_s9 + $0x448] sm:$0xff] }
 0x350   : > { %v4174_v61 = vpop.f32.mrf.mxu1  ;;  %v4135_v47 = vpop.f32.mrf.mxu0  ;;  %v8828_v48 = vcombine.high %v4342_v56, %v4346_v0  ;;  %v9059_v62 = vcombine.low %v4574_v57, %v4578_v58  ;;  %v4422_v43 = vld [vmem:[%s9811_s9 + $0x708] sm:$0xff] }
 0x351   : > { %v4175_v30 = vadd.f32 %v4174_v61, %v4134_v18  ;;  %7518 = vmatpush1.bf16.msra.mxu0 %v8987_v51  ;;  %v4185_v32 = vmax.f32 %v4173_v60, 0.0  ;;  %v9060_v51 = vcombine.high %v4574_v57, %v4578_v58  ;;  %v4566_v60 = vld [vmem:[%s9811_s9 + $0xb88] sm:$0xff]  ;;  %v8827_v61 = vcombine.low %v4342_v56, %v4346_v0 }
 0x352   : > { %v4176_v1 = vpop.f32.mrf.mxu1  ;;  %v4136_v3 = vpop.f32.mrf.mxu0  ;;  %7519 = vmatprep.subr.bf16.mxu0 %v8980_v22  ;;  %v4338_v22 = vld [vmem:[%s9811_s9 + $0x468] sm:$0xff] }
 0x353   : > { %v4186_v5 = vmax.f32 %v4175_v30, 0.0  ;;  %v10692_v11 = vpack.c.bf16 %v4185_v32, %v4185_v32  ;;  %v4570_v18 = vld [vmem:[%s9811_s9 + $0xba8] sm:$0xff]  ;;  %v8820_v21 = vcombine.high %v4334_v59, %v4338_v22  ;;  %v8819_v3 = vcombine.low %v4334_v59, %v4338_v22 }
 0x354   : > { %v4177_v6 = vpop.f32.mrf.mxu1  ;;  %v9052_v47 = vcombine.high %v4566_v60, %v4570_v18  ;;  %v4326_v30 = vld [vmem:[%s9811_s9 + $0x408] sm:$0xff] }
 0x355   : > { %v10690_v23 = vpack.c.bf16 %v4186_v5, %v4186_v5  ;;  %7520 = vmatpush1.bf16.msra.mxu0 %v8979_v2  ;;  %v4330_v1 = vld [vmem:[%s9811_s9 + $0x428] sm:$0xff] }
 0x356   : > { %7521 = vmatprep.subr.bf16.mxu0 %v8972_v4  ;;  %v4558_v2 = vld [vmem:[%s9811_s9 + $0xb48] sm:$0xff]  ;;  %v9051_v4 = vcombine.low %v4566_v60, %v4570_v18  ;;  %v8812_v5 = vcombine.high %v4326_v30, %v4330_v1  ;;  %v4255_v18 = vld [vmem:[%s9811_s9 + $0x1d0] sm:$0xff] }
 0x357   : > { %7424 = vmatprep.mubr.bf16.mxu1 %v10690_v23  ;;  %v4562_v32 = vld [vmem:[%s9811_s9 + $0xb68] sm:$0xff] }
 0x358   : > { %7425 = vmatmul.mubr.bf16.vlgmr.msra.gmra.mxu1 %v10692_v11  ;;  %v9044_v6 = vcombine.high %v4558_v2, %v4562_v32  ;;  %v4426_v45 = vld [vmem:[%s9811_s9 + $0x728] sm:$0xff] }
 0x359   : > { %7475 = vmatpush1.bf16.msra.mxu1 %v8867_v28  ;;  %7506 = vmatprep.mubr.bf16.mxu1 %v10466_v15  ;;  %v8844_v28 = vcombine.high %v4358_v38, %v4362_v39  ;;  %v4430_v39 = vld [vmem:[%s9811_s9 + $0x748] sm:$0xff] }
 0x35a   : > { %7522 = vmatpush1.bf16.msra.mxu0 %v8971_v16  ;;  %7476 = vmatprep.subr.bf16.mxu1 %v8860_v26  ;;  %v8811_v16 = vcombine.low %v4326_v30, %v4330_v1  ;;  %v9043_v26 = vcombine.low %v4558_v2, %v4562_v32  ;;  %v4526_v46 = vld [vmem:[%s9811_s9 + $0xa48] sm:$0xff]  ;;  %v4247_v32 = vld [vmem:[%s9811_s9 + $0x190] sm:$0xff] }
 0x35b   : > { %7523 = vmatprep.subr.bf16.mxu0 %v8964_v27  ;;  %v8932_v27 = vcombine.high %v4446_v55, %v4450_v41  ;;  %v4414_v0 = vld [vmem:[%s9811_s9 + $0x6c8] sm:$0xff] }
 0x35c   : > { %v4418_v57 = vld [vmem:[%s9811_s9 + $0x6e8] sm:$0xff] }
 0x35d   : > { %7477 = vmatpush1.bf16.msra.mxu1 %v8859_v14  ;;  %v4546_v14 = vld [vmem:[%s9811_s9 + $0xae8] sm:$0xff] }
 0x35e   : > { %7524 = vmatpush1.bf16.msra.mxu0 %v8963_v53  ;;  %7478 = vmatprep.subr.bf16.mxu1 %v8852_v36  ;;  %v8931_v53 = vcombine.low %v4446_v55, %v4450_v41  ;;  %v9035_v36 = vcombine.low %v4550_v40, %v4554_v7  ;;  %v9028_v38 = vcombine.high %v4542_v35, %v4546_v14  ;;  %v4518_v58 = vld [vmem:[%s9811_s9 + $0xa08] sm:$0xff] }
 0x35f   : > { %7525 = vmatprep.subr.bf16.mxu0 %v8956_v37  ;;  %v8924_v37 = vcombine.high %v4438_v10, %v4442_v34  ;;  %v4406_v22 = vld [vmem:[%s9811_s9 + $0x688] sm:$0xff] }
 0x360   : > { %v4410_v60 = vld [vmem:[%s9811_s9 + $0x6a8] sm:$0xff] }
 0x361   : > { %7479 = vmatpush1.bf16.msra.mxu1 %v8851_v33  ;;  %v4538_v33 = vld [vmem:[%s9811_s9 + $0xaa8] sm:$0xff] }
 0x362   : > { %7526 = vmatpush1.bf16.msra.mxu0 %v8955_v20  ;;  %7480 = vmatprep.subr.bf16.mxu1 %v8844_v28  ;;  %v8923_v20 = vcombine.low %v4438_v10, %v4442_v34  ;;  %v9027_v28 = vcombine.low %v4542_v35, %v4546_v14  ;;  %v9020_v24 = vcombine.high %v4534_v29, %v4538_v33  ;;  %v4398_v1 = vld [vmem:[%s9811_s9 + $0x648] sm:$0xff] }
 0x363   : > { %7527 = vmatprep.subr.bf16.mxu0 %v8948_v42  ;;  %v8916_v42 = vcombine.high %v4430_v39, %v4434_v52  ;;  %v4402_v2 = vld [vmem:[%s9811_s9 + $0x668] sm:$0xff] }
 0x364   : > { %v4390_v41 = vld [vmem:[%s9811_s9 + $0x608] sm:$0xff] }
 0x365   : > { %7481 = vmatpush1.bf16.msra.mxu1 %v8843_v19  ;;  %v4530_v19 = vld [vmem:[%s9811_s9 + $0xa68] sm:$0xff] }
 0x366   : > { %7528 = vmatpush1.bf16.msra.mxu0 %v8947_v49  ;;  %7482 = vmatprep.subr.bf16.mxu1 %v8836_v50  ;;  %v8915_v49 = vcombine.low %v4430_v39, %v4434_v52  ;;  %v9019_v50 = vcombine.low %v4534_v29, %v4538_v33  ;;  %v9012_v56 = vcombine.high %v4526_v46, %v4530_v19  ;;  %v4394_v40 = vld [vmem:[%s9811_s9 + $0x628] sm:$0xff]  ;;  %v4231_v29 = vld [vmem:[%s9811_s9 + $0x110] sm:$0xff] }
 0x367   : > { %7529 = vmatprep.subr.bf16.mxu0 %v8940_v13  ;;  %v8908_v13 = vcombine.high %v4422_v43, %v4426_v45  ;;  %v8876_v14 = vcombine.high %v4390_v41, %v4394_v40  ;;  %v4235_v33 = vld [vmem:[%s9811_s9 + $0x130] sm:$0xff] }
 0x369   : > { %7483 = vmatpush1.bf16.msra.mxu1 %v8835_v25  ;;  %v4522_v25 = vld [vmem:[%s9811_s9 + $0xa28] sm:$0xff] }
 0x36a   : > { %7530 = vmatpush1.bf16.msra.mxu0 %v8939_v17  ;;  %7484 = vmatprep.subr.bf16.mxu1 %v8828_v48  ;;  %v8907_v17 = vcombine.low %v4422_v43, %v4426_v45  ;;  %v9011_v48 = vcombine.low %v4526_v46, %v4530_v19  ;;  %v9004_v59 = vcombine.high %v4518_v58, %v4522_v25  ;;  %v4630_v19 = vld [vmem:[%s9811_s9 + $0xd88] sm:$0xff] }
 0x36b   : > { %7531 = vmatprep.subr.bf16.mxu0 %v9060_v51  ;;  %v8900_v51 = vcombine.high %v4414_v0, %v4418_v57  ;;  %v8718_v46 = vcombine.high %v4231_v29, %v4235_v33 }
 0x36d   : > { %7485 = vmatpush1.bf16.msra.mxu1 %v8827_v61  ;;  %v4259_v61 = vld [vmem:[%s9811_s9 + $0x1f0] sm:$0xff] }
 0x36e   : > { %7532 = vmatpush2.bf16.msra.mxu0 %v9059_v62  ;;  %7486 = vmatprep.subr.bf16.mxu1 %v8820_v21  ;;  %v8899_v62 = vcombine.low %v4414_v0, %v4418_v57  ;;  %v9003_v21 = vcombine.low %v4518_v58, %v4522_v25  ;;  %v8742_v30 = vcombine.high %v4255_v18, %v4259_v61  ;;  %v4622_v25 = vld [vmem:[%s9811_s9 + $0xd48] sm:$0xff] }
 0x36f   : > { %7533 = vmatprep.subr.bf16.mxu0 %v9052_v47  ;;  %v8892_v47 = vcombine.high %v4406_v22, %v4410_v60  ;;  %v8717_v0 = vcombine.low %v4231_v29, %v4235_v33 }
 0x371   : > { %7487 = vmatpush1.bf16.msra.mxu1 %v8819_v3  ;;  %v4251_v3 = vld [vmem:[%s9811_s9 + $0x1b0] sm:$0xff] }
 0x372   : > { %7534 = vmatpush2.bf16.msra.mxu0 %v9051_v4  ;;  %7488 = vmatprep.subr.bf16.mxu1 %v8812_v5  ;;  %v8891_v4 = vcombine.low %v4406_v22, %v4410_v60  ;;  %v8741_v5 = vcombine.low %v4255_v18, %v4259_v61  ;;  %v8734_v55 = vcombine.high %v4247_v32, %v4251_v3  ;;  %v4614_v61 = vld [vmem:[%s9811_s9 + $0xd08] sm:$0xff] }
 0x373   : > { %7535 = vmatprep.subr.bf16.mxu0 %v9044_v6  ;;  %v8884_v6 = vcombine.high %v4398_v1, %v4402_v2  ;;  %v8733_v35 = vcombine.low %v4247_v32, %v4251_v3  ;;  %v4606_v3 = vld [vmem:[%s9811_s9 + $0xcc8] sm:$0xff] }
 0x375   : > { %7489 = vmatpush1.bf16.msra.mxu1 %v8811_v16  ;;  %v4239_v16 = vld [vmem:[%s9811_s9 + $0x150] sm:$0xff] }
 0x376   : > { %7536 = vmatpush2.bf16.msra.mxu0 %v9043_v26  ;;  %7490 = vmatprep.subr.bf16.mxu1 %v8932_v27  ;;  %v4243_v26 = vld [vmem:[%s9811_s9 + $0x170] sm:$0xff] }
 0x377   : > { %7537 = vmatprep.subr.bf16.mxu0 %v9036_v31  ;;  %v8883_v31 = vcombine.low %v4398_v1, %v4402_v2 }
 0x379   : > { %7491 = vmatpush2.bf16.msra.mxu1 %v8931_v53 }
 0x37a   : > { %7538 = vmatpush2.bf16.msra.mxu0 %v9035_v36  ;;  %7492 = vmatprep.subr.bf16.mxu1 %v8924_v37  ;;  %v8726_v36 = vcombine.high %v4239_v16, %v4243_v26  ;;  %v4638_v37 = vld [vmem:[%s9811_s9 + $0xdc8] sm:$0xff] }
 0x37b   : > { %7539 = vmatprep.subr.bf16.mxu0 %v9028_v38  ;;  %v4642_v38 = vld [vmem:[%s9811_s9 + $0xde8] sm:$0xff] }
 0x37c   : > { %v9124_v43 = vcombine.high %v4638_v37, %v4642_v38 }
 0x37d   : > { %7493 = vmatpush2.bf16.msra.mxu1 %v8923_v20 }
 0x37e   : > { %7540 = vmatpush2.bf16.msra.mxu0 %v9027_v28  ;;  %7494 = vmatprep.subr.bf16.mxu1 %v8916_v42  ;;  %v8875_v28 = vcombine.low %v4390_v41, %v4394_v40 }
 0x37f   : > { %7541 = vmatprep.subr.bf16.mxu0 %v9020_v24  ;;  %v8725_v24 = vcombine.low %v4239_v16, %v4243_v26  ;;  %v4598_v16 = vld [vmem:[%s9811_s9 + $0xc88] sm:$0xff] }
 0x380   : > { %v4602_v26 = vld [vmem:[%s9811_s9 + $0xca8] sm:$0xff] }
 0x381   : > { %7495 = vmatpush2.bf16.msra.mxu1 %v8915_v49  ;;  %v4634_v49 = vld [vmem:[%s9811_s9 + $0xda8] sm:$0xff]  ;;  %v9083_v29 = vcombine.low %v4598_v16, %v4602_v26 }
 0x382   : > { %7542 = vmatpush2.bf16.msra.mxu0 %v9019_v50  ;;  %7496 = vmatprep.subr.bf16.mxu1 %v8908_v13  ;;  %v4223_v50 = vld [vmem:[%s9811_s9 + $0xd0] sm:$0xff]  ;;  %v9116_v57 = vcombine.high %v4630_v19, %v4634_v49 }
 0x383   : > { %7543 = vmatprep.subr.bf16.mxu0 %v9012_v56  ;;  %v4227_v13 = vld [vmem:[%s9811_s9 + $0xf0] sm:$0xff]  ;;  %v9123_v56 = vcombine.low %v4638_v37, %v4642_v38  ;;  %v4594_v37 = vld [vmem:[%s9811_s9 + $0xc68] sm:$0xff] }
 0x384   : > { %v8710_v58 = vcombine.high %v4223_v50, %v4227_v13  ;;  %v8709_v22 = vcombine.low %v4223_v50, %v4227_v13  ;;  %v4311_v38 = vld [vmem:[%s9811_s9 + $0x390] sm:$0xff]  ;;  %v4702_v13 = vld [vmem:[%s9811_s9 + $0xfc8] sm:$0xff] }
 0x385   : > { %7497 = vmatpush2.bf16.msra.mxu1 %v8907_v17  ;;  %v4626_v17 = vld [vmem:[%s9811_s9 + $0xd68] sm:$0xff] }
 0x386   : > { %7544 = vmatpush2.bf16.msra.mxu0 %v9011_v48  ;;  %7498 = vmatprep.subr.bf16.mxu1 %v8900_v51  ;;  %v4215_v48 = vld [vmem:[%s9811_s9 + $0x90] sm:$0xff]  ;;  %v9108_v60 = vcombine.high %v4622_v25, %v4626_v17 }
 0x387   : > { %7545 = vmatprep.subr.bf16.mxu0 %v9004_v59  ;;  %v4219_v51 = vld [vmem:[%s9811_s9 + $0xb0] sm:$0xff]  ;;  %v9115_v59 = vcombine.low %v4630_v19, %v4634_v49 }
 0x388   : > { %v8702_v18 = vcombine.high %v4215_v48, %v4219_v51  ;;  %v8701_v1 = vcombine.low %v4215_v48, %v4219_v51  ;;  %v4694_v51 = vld [vmem:[%s9811_s9 + $0xf88] sm:$0xff] }
 0x389   : > { %7499 = vmatpush2.bf16.msra.mxu1 %v8899_v62  ;;  %v4618_v62 = vld [vmem:[%s9811_s9 + $0xd28] sm:$0xff] }
 0x38a   : > { %7546 = vmatpush2.bf16.msra.mxu0 %v9003_v21  ;;  %7500 = vmatprep.subr.bf16.mxu1 %v8892_v47  ;;  %v4207_v21 = vld [vmem:[%s9811_s9 + $0x50] sm:$0xff]  ;;  %v9100_v2 = vcombine.high %v4614_v61, %v4618_v62 }
 0x38b   : > { %7597 = vmatprep.subr.bf16.mxu0 %v8742_v30  ;;  %v4211_v47 = vld [vmem:[%s9811_s9 + $0x70] sm:$0xff]  ;;  %v9107_v30 = vcombine.low %v4622_v25, %v4626_v17 }
 0x38c   : > { %v7303_v7 = vpop.f32.mrf.mxu0  ;;  %v8694_v32 = vcombine.high %v4207_v21, %v4211_v47  ;;  %v8693_v41 = vcombine.low %v4207_v21, %v4211_v47  ;;  %v4686_v47 = vld [vmem:[%s9811_s9 + $0xf48] sm:$0xff] }
 0x38d   : > { %7501 = vmatpush2.bf16.msra.mxu1 %v8891_v4  ;;  %7548 = vmatmul.mubr.bf16.vlgmr.msra.gmra.mxu0 %v10629_v9  ;;  %v4610_v4 = vld [vmem:[%s9811_s9 + $0xce8] sm:$0xff] }
 0x38e   : > { %v7344_v27 = vpop.f32.mrf.mxu1  ;;  %7598 = vmatpush1.bf16.msra.mxu0 %v8741_v5  ;;  %7629 = vmatprep.mubr.bf16.mxu0 %v10461_v8  ;;  %v7305_v34 = vpop.f32.mrf.mxu0  ;;  %v4199_v5 = vld [vmem:[%s9811_s9 + $0x10] sm:$0xff]  ;;  %v9092_v40 = vcombine.high %v4606_v3, %v4610_v4 }
 0x38f   : > { %v10757_v10 = vadd.f32 %v7344_v27, %v7303_v7  ;;  %7502 = vmatprep.subr.bf16.mxu1 %v8884_v6  ;;  %7599 = vmatprep.subr.bf16.mxu0 %v8734_v55  ;;  %v4203_v6 = vld [vmem:[%s9811_s9 + $0x30] sm:$0xff]  ;;  %v9099_v55 = vcombine.low %v4614_v61, %v4618_v62 }
 0x390   : > { %v7346_v53 = vpop.f32.mrf.mxu1  ;;  %v7307_v52 = vpop.f32.mrf.mxu0  ;;  %v8686_v7 = vcombine.high %v4199_v5, %v4203_v6  ;;  %v4319_v27 = vld [vmem:[%s9811_s9 + $0x3d0] sm:$0xff] }
 0x391   : > { %v10762_v39 = vadd.f32 %v7346_v53, %v7305_v34  ;;  %7503 = vmatpush2.bf16.msra.mxu1 %v8883_v31  ;;  %v4323_v31 = vld [vmem:[%s9811_s9 + $0x3f0] sm:$0xff]  ;;  %v9091_v34 = vcombine.low %v4606_v3, %v4610_v4 }
 0x392   : > { %v7348_v20 = vpop.f32.mrf.mxu1  ;;  %7600 = vmatpush1.bf16.msra.mxu0 %v8733_v35  ;;  %v7308_v42 = vpop.f32.mrf.mxu0  ;;  %7504 = vmatprep.subr.bf16.mxu1 %v8876_v14  ;;  %v8685_v35 = vcombine.low %v4199_v5, %v4203_v6  ;;  %v9084_v14 = vcombine.high %v4598_v16, %v4602_v26  ;;  %v8806_v53 = vcombine.high %v4319_v27, %v4323_v31  ;;  %v4315_v52 = vld [vmem:[%s9811_s9 + $0x3b0] sm:$0xff]  ;;  %v4678_v6 = vld [vmem:[%s9811_s9 + $0xf08] sm:$0xff] }
 0x393   : > { %7601 = vmatprep.subr.bf16.mxu0 %v8726_v36  ;;  %v4590_v36 = vld [vmem:[%s9811_s9 + $0xc48] sm:$0xff]  ;;  %v8805_v33 = vcombine.low %v4319_v27, %v4323_v31  ;;  %v8797_v19 = vcombine.low %v4311_v38, %v4315_v52 }
 0x394   : > { %v7349_v45 = vpop.f32.mrf.mxu1  ;;  %v9076_v20 = vcombine.high %v4590_v36, %v4594_v37  ;;  %v4582_v42 = vld [vmem:[%s9811_s9 + $0xc08] sm:$0xff] }
 0x395   : > { %7505 = vmatpush2.bf16.msra.mxu1 %v8875_v28  ;;  %v8798_v28 = vcombine.high %v4311_v38, %v4315_v52  ;;  %v4307_v45 = vld [vmem:[%s9811_s9 + $0x370] sm:$0xff]  ;;  %v4670_v31 = vld [vmem:[%s9811_s9 + $0xec8] sm:$0xff] }
 0x396   : > { %7602 = vmatpush1.bf16.msra.mxu0 %v8725_v24  ;;  %7556 = vmatprep.subr.bf16.mxu1 %v9124_v43  ;;  %v4586_v24 = vld [vmem:[%s9811_s9 + $0xc28] sm:$0xff]  ;;  %v4303_v43 = vld [vmem:[%s9811_s9 + $0x350] sm:$0xff] }
 0x397   : > { %7603 = vmatprep.subr.bf16.mxu0 %v8718_v46  ;;  %v9075_v46 = vcombine.low %v4590_v36, %v4594_v37  ;;  %v9068_v49 = vcombine.high %v4582_v42, %v4586_v24  ;;  %v8790_v50 = vcombine.high %v4303_v43, %v4307_v45  ;;  %v8789_v25 = vcombine.low %v4303_v43, %v4307_v45  ;;  %v4662_v52 = vld [vmem:[%s9811_s9 + $0xe88] sm:$0xff] }
 0x398   : > { %7507 = vmatmul.mubr.bf16.vlgmr.msra.gmra.mxu1 %v10544_v63  ;;  %v4654_v45 = vld [vmem:[%s9811_s9 + $0xe48] sm:$0xff] }
 0x399   : > { %7557 = vmatpush1.bf16.msra.mxu1 %v9123_v56  ;;  %7588 = vmatprep.mubr.bf16.mxu1 %v10690_v23  ;;  %v4706_v56 = vld [vmem:[%s9811_s9 + $0xfe8] sm:$0xff] }
 0x39a   : > { %7604 = vmatpush1.bf16.msra.mxu0 %v8717_v0  ;;  %7558 = vmatprep.subr.bf16.mxu1 %v9116_v57  ;;  %v4295_v0 = vld [vmem:[%s9811_s9 + $0x310] sm:$0xff]  ;;  %v9188_v17 = vcombine.high %v4702_v13, %v4706_v56 }
 0x39b   : > { %7605 = vmatprep.subr.bf16.mxu0 %v8710_v58  ;;  %v4299_v57 = vld [vmem:[%s9811_s9 + $0x330] sm:$0xff]  ;;  %v9067_v58 = vcombine.low %v4582_v42, %v4586_v24 }
 0x39c   : > { %v8782_v48 = vcombine.high %v4295_v0, %v4299_v57  ;;  %v8781_v61 = vcombine.low %v4295_v0, %v4299_v57  ;;  %v4646_v57 = vld [vmem:[%s9811_s9 + $0xe08] sm:$0xff] }
 0x39d   : > { %7559 = vmatpush1.bf16.msra.mxu1 %v9115_v59  ;;  %v4698_v59 = vld [vmem:[%s9811_s9 + $0xfa8] sm:$0xff] }
 0x39e   : > { %7606 = vmatpush1.bf16.msra.mxu0 %v8709_v22  ;;  %7560 = vmatprep.subr.bf16.mxu1 %v9108_v60  ;;  %v4287_v22 = vld [vmem:[%s9811_s9 + $0x2d0] sm:$0xff]  ;;  %v9180_v62 = vcombine.high %v4694_v51, %v4698_v59 }
 0x39f   : > { %7607 = vmatprep.subr.bf16.mxu0 %v8702_v18  ;;  %v4291_v60 = vld [vmem:[%s9811_s9 + $0x2f0] sm:$0xff]  ;;  %v9187_v18 = vcombine.low %v4702_v13, %v4706_v56 }
 0x3a0   : > { %v8774_v21 = vcombine.high %v4287_v22, %v4291_v60  ;;  %v8773_v3 = vcombine.low %v4287_v22, %v4291_v60 }
 0x3a1   : > { %7561 = vmatpush1.bf16.msra.mxu1 %v9107_v30  ;;  %v4690_v30 = vld [vmem:[%s9811_s9 + $0xf68] sm:$0xff] }
 0x3a2   : > { %7608 = vmatpush1.bf16.msra.mxu0 %v8701_v1  ;;  %7562 = vmatprep.subr.bf16.mxu1 %v9100_v2  ;;  %v4279_v1 = vld [vmem:[%s9811_s9 + $0x290] sm:$0xff]  ;;  %v9172_v4 = vcombine.high %v4686_v47, %v4690_v30 }
 0x3a3   : > { %7609 = vmatprep.subr.bf16.mxu0 %v8694_v32  ;;  %v4283_v2 = vld [vmem:[%s9811_s9 + $0x2b0] sm:$0xff]  ;;  %v9179_v32 = vcombine.low %v4694_v51, %v4698_v59 }
 0x3a4   : > { %v8766_v5 = vcombine.high %v4279_v1, %v4283_v2  ;;  %v8765_v16 = vcombine.low %v4279_v1, %v4283_v2  ;;  %v4491_v1 = vld [vmem:[%s9811_s9 + $0x930] sm:$0xff] }
 0x3a5   : > { %7563 = vmatpush1.bf16.msra.mxu1 %v9099_v55  ;;  %v4682_v55 = vld [vmem:[%s9811_s9 + $0xf28] sm:$0xff] }
 0x3a6   : > { %7610 = vmatpush1.bf16.msra.mxu0 %v8693_v41  ;;  %7564 = vmatprep.subr.bf16.mxu1 %v9092_v40  ;;  %v4271_v41 = vld [vmem:[%s9811_s9 + $0x250] sm:$0xff]  ;;  %v9164_v26 = vcombine.high %v4678_v6, %v4682_v55 }
 0x3a7   : > { %7611 = vmatprep.subr.bf16.mxu0 %v8686_v7  ;;  %v4275_v40 = vld [vmem:[%s9811_s9 + $0x270] sm:$0xff]  ;;  %v9171_v7 = vcombine.low %v4686_v47, %v4690_v30 }
 0x3a8   : > { %v8758_v27 = vcombine.high %v4271_v41, %v4275_v40  ;;  %v8757_v36 = vcombine.low %v4271_v41, %v4275_v40  ;;  %v4487_v30 = vld [vmem:[%s9811_s9 + $0x910] sm:$0xff] }
 0x3a9   : > { %7565 = vmatpush1.bf16.msra.mxu1 %v9091_v34  ;;  %v4674_v34 = vld [vmem:[%s9811_s9 + $0xee8] sm:$0xff]  ;;  %v4483_v41 = vld [vmem:[%s9811_s9 + $0x8f0] sm:$0xff] }
 0x3aa   : > { %7612 = vmatpush1.bf16.msra.mxu0 %v8685_v35  ;;  %7566 = vmatprep.subr.bf16.mxu1 %v9084_v14  ;;  %v4263_v35 = vld [vmem:[%s9811_s9 + $0x210] sm:$0xff]  ;;  %v9156_v37 = vcombine.high %v4670_v31, %v4674_v34 }
 0x3ab   : > { %7613 = vmatprep.subr.bf16.mxu0 %v8806_v53  ;;  %v4267_v14 = vld [vmem:[%s9811_s9 + $0x230] sm:$0xff]  ;;  %v9163_v53 = vcombine.low %v4678_v6, %v4682_v55 }
 0x3ac   : > { %v8750_v38 = vcombine.high %v4263_v35, %v4267_v14  ;;  %v8749_v42 = vcombine.low %v4263_v35, %v4267_v14  ;;  %v4379_v6 = vld [vmem:[%s9811_s9 + $0x5b0] sm:$0xff] }
 0x3ad   : > { %7567 = vmatpush1.bf16.msra.mxu1 %v9083_v29  ;;  %v4666_v29 = vld [vmem:[%s9811_s9 + $0xea8] sm:$0xff]  ;;  %v4479_v55 = vld [vmem:[%s9811_s9 + $0x8d0] sm:$0xff] }
 0x3ae   : > { %7614 = vmatpush2.bf16.msra.mxu0 %v8805_v33  ;;  %7568 = vmatprep.subr.bf16.mxu1 %v9076_v20  ;;  %v4511_v33 = vld [vmem:[%s9811_s9 + $0x9d0] sm:$0xff]  ;;  %v9148_v24 = vcombine.high %v4662_v52, %v4666_v29 }
 0x3af   : > { %7615 = vmatprep.subr.bf16.mxu0 %v8798_v28  ;;  %v4515_v20 = vld [vmem:[%s9811_s9 + $0x9f0] sm:$0xff]  ;;  %v9155_v28 = vcombine.low %v4670_v31, %v4674_v34 }
 0x3b0   : > { %v8998_v43 = vcombine.high %v4511_v33, %v4515_v20  ;;  %v8997_v13 = vcombine.low %v4511_v33, %v4515_v20  ;;  %v4371_v31 = vld [vmem:[%s9811_s9 + $0x570] sm:$0xff] }
 0x3b1   : > { %7569 = vmatpush1.bf16.msra.mxu1 %v9075_v46  ;;  %v4658_v46 = vld [vmem:[%s9811_s9 + $0xe68] sm:$0xff]  ;;  %v4471_v34 = vld [vmem:[%s9811_s9 + $0x890] sm:$0xff] }
 0x3b2   : > { %7616 = vmatpush2.bf16.msra.mxu0 %v8797_v19  ;;  %7570 = vmatprep.subr.bf16.mxu1 %v9068_v49  ;;  %v4503_v19 = vld [vmem:[%s9811_s9 + $0x990] sm:$0xff]  ;;  %v9140_v56 = vcombine.high %v4654_v45, %v4658_v46  ;;  %v9139_v59 = vcombine.low %v4654_v45, %v4658_v46 }
 0x3b3   : > { %7617 = vmatprep.subr.bf16.mxu0 %v8790_v50  ;;  %v4507_v49 = vld [vmem:[%s9811_s9 + $0x9b0] sm:$0xff]  ;;  %v9147_v50 = vcombine.low %v4662_v52, %v4666_v29 }
 0x3b4   : > { %v8990_v0 = vcombine.high %v4503_v19, %v4507_v49  ;;  %v8989_v60 = vcombine.low %v4503_v19, %v4507_v49  ;;  %v4475_v35 = vld [vmem:[%s9811_s9 + $0x8b0] sm:$0xff] }
 0x3b5   : > { %7571 = vmatpush1.bf16.msra.mxu1 %v9067_v58  ;;  %v4650_v58 = vld [vmem:[%s9811_s9 + $0xe28] sm:$0xff]  ;;  %v4363_v52 = vld [vmem:[%s9811_s9 + $0x530] sm:$0xff] }
 0x3b6   : > { %7618 = vmatpush2.bf16.msra.mxu0 %v8789_v25  ;;  %7572 = vmatprep.subr.bf16.mxu1 %v9188_v17  ;;  %v4495_v17 = vld [vmem:[%s9811_s9 + $0x950] sm:$0xff]  ;;  %v9131_v2 = vcombine.low %v4646_v57, %v4650_v58 }
 0x3b7   : > { %7619 = vmatprep.subr.bf16.mxu0 %v8782_v48  ;;  %v4499_v48 = vld [vmem:[%s9811_s9 + $0x970] sm:$0xff] }
 0x3b8   : > { %v4463_v29 = vld [vmem:[%s9811_s9 + $0x850] sm:$0xff] }
 0x3b9   : > { %7573 = vmatpush2.bf16.msra.mxu1 %v9187_v18  ;;  %v9132_v18 = vcombine.high %v4646_v57, %v4650_v58  ;;  %v4467_v33 = vld [vmem:[%s9811_s9 + $0x870] sm:$0xff] }
 0x3ba   : > { %7620 = vmatpush2.bf16.msra.mxu0 %v8781_v61  ;;  %7574 = vmatprep.subr.bf16.mxu1 %v9180_v62  ;;  %v4383_v62 = vld [vmem:[%s9811_s9 + $0x5d0] sm:$0xff] }
 0x3bb   : > { %7621 = vmatprep.subr.bf16.mxu0 %v8774_v21  ;;  %v4387_v21 = vld [vmem:[%s9811_s9 + $0x5f0] sm:$0xff] }
 0x3bc   : > { %v8869_v40 = vcombine.low %v4383_v62, %v4387_v21  ;;  %v4355_v45 = vld [vmem:[%s9811_s9 + $0x4f0] sm:$0xff] }
 0x3bd   : > { %7575 = vmatpush2.bf16.msra.mxu1 %v9179_v32  ;;  %v4455_v46 = vld [vmem:[%s9811_s9 + $0x810] sm:$0xff] }
 0x3be   : > { %7622 = vmatpush2.bf16.msra.mxu0 %v8773_v3  ;;  %7576 = vmatprep.subr.bf16.mxu1 %v9172_v4  ;;  %v8981_v3 = vcombine.low %v4495_v17, %v4499_v48  ;;  %v8974_v4 = vcombine.high %v4487_v30, %v4491_v1  ;;  %v4459_v19 = vld [vmem:[%s9811_s9 + $0x830] sm:$0xff] }
 0x3bf   : > { %7623 = vmatprep.subr.bf16.mxu0 %v8766_v5  ;;  %v4375_v5 = vld [vmem:[%s9811_s9 + $0x590] sm:$0xff] }
 0x3c0   : > { %v8861_v14 = vcombine.low %v4375_v5, %v4379_v6  ;;  %v4347_v57 = vld [vmem:[%s9811_s9 + $0x4b0] sm:$0xff] }
 0x3c1   : > { %7577 = vmatpush2.bf16.msra.mxu1 %v9171_v7  ;;  %v8973_v7 = vcombine.low %v4487_v30, %v4491_v1  ;;  %v4575_v58 = vld [vmem:[%s9811_s9 + $0xbd0] sm:$0xff] }
 0x3c2   : > { %7624 = vmatpush2.bf16.msra.mxu0 %v8765_v16  ;;  %7578 = vmatprep.subr.bf16.mxu1 %v9164_v26  ;;  %v8862_v16 = vcombine.high %v4375_v5, %v4379_v6  ;;  %v8966_v26 = vcombine.high %v4479_v55, %v4483_v41 }
 0x3c3   : > { %7625 = vmatprep.subr.bf16.mxu0 %v8758_v27  ;;  %v4367_v27 = vld [vmem:[%s9811_s9 + $0x550] sm:$0xff] }
 0x3c4   : > { %v8853_v20 = vcombine.low %v4367_v27, %v4371_v31 }
 0x3c5   : > { %7579 = vmatpush2.bf16.msra.mxu1 %v9163_v53  ;;  %v8965_v53 = vcombine.low %v4479_v55, %v4483_v41  ;;  %v4447_v41 = vld [vmem:[%s9811_s9 + $0x7d0] sm:$0xff] }
 0x3c6   : > { %7626 = vmatpush2.bf16.msra.mxu0 %v8757_v36  ;;  %7580 = vmatprep.subr.bf16.mxu1 %v9156_v37  ;;  %v8854_v36 = vcombine.high %v4367_v27, %v4371_v31  ;;  %v8958_v37 = vcombine.high %v4471_v34, %v4475_v35 }
 0x3c7   : > { %7627 = vmatprep.subr.bf16.mxu0 %v8750_v38  ;;  %v4359_v38 = vld [vmem:[%s9811_s9 + $0x510] sm:$0xff] }
 0x3c8   : > { %v8845_v49 = vcombine.low %v4359_v38, %v4363_v52 }
 0x3c9   : > { %7581 = vmatpush2.bf16.msra.mxu1 %v9155_v28  ;;  %v8957_v28 = vcombine.low %v4471_v34, %v4475_v35  ;;  %v4439_v35 = vld [vmem:[%s9811_s9 + $0x790] sm:$0xff] }
 0x3ca   : > { %7628 = vmatpush2.bf16.msra.mxu0 %v8749_v42  ;;  %7582 = vmatprep.subr.bf16.mxu1 %v9148_v24  ;;  %v8846_v42 = vcombine.high %v4359_v38, %v4363_v52  ;;  %v8950_v24 = vcombine.high %v4463_v29, %v4467_v33 }
 0x3cb   : > { %7679 = vmatprep.subr.bf16.mxu0 %v8998_v43  ;;  %v4351_v43 = vld [vmem:[%s9811_s9 + $0x4d0] sm:$0xff] }
 0x3cc   : > { %v7385_v25 = vpop.f32.mrf.mxu0 }
 0x3cd   : > { %v10829_v51 = vadd.f32 %v7385_v25, %v10757_v10  ;;  %7583 = vmatpush2.bf16.msra.mxu1 %v9147_v50  ;;  %7630 = vmatmul.mubr.bf16.vlgmr.msra.gmra.mxu0 %v10542_v54  ;;  %v8982_v10 = vcombine.high %v4495_v17, %v4499_v48  ;;  %v8949_v50 = vcombine.low %v4463_v29, %v4467_v33  ;;  %v4579_v25 = vld [vmem:[%s9811_s9 + $0xbf0] sm:$0xff] }
 0x3ce   : > { %7680 = vmatpush1.bf16.msra.mxu0 %v8997_v13  ;;  %7711 = vmatprep.mubr.bf16.mxu0 %v10565_v12  ;;  %v7387_v22 = vpop.f32.mrf.mxu0  ;;  %v8838_v13 = vcombine.high %v4351_v43, %v4355_v45  ;;  %v8837_v17 = vcombine.low %v4351_v43, %v4355_v45  ;;  %v8941_v48 = vcombine.low %v4455_v46, %v4459_v19  ;;  %v4431_v33 = vld [vmem:[%s9811_s9 + $0x750] sm:$0xff] }
 0x3cf   : > { %v10834_v61 = vadd.f32 %v7387_v22, %v10762_v39  ;;  %7584 = vmatprep.subr.bf16.mxu1 %v9140_v56  ;;  %7681 = vmatprep.subr.bf16.mxu0 %v8990_v0  ;;  %v8870_v39 = vcombine.high %v4383_v62, %v4387_v21  ;;  %v8942_v56 = vcombine.high %v4455_v46, %v4459_v19  ;;  %v4343_v0 = vld [vmem:[%s9811_s9 + $0x490] sm:$0xff] }
 0x3d0   : > { %v7389_v47 = vpop.f32.mrf.mxu0  ;;  %v9062_v22 = vcombine.high %v4575_v58, %v4579_v25  ;;  %v4571_v62 = vld [vmem:[%s9811_s9 + $0xbb0] sm:$0xff]  ;;  %v8829_v21 = vcombine.low %v4343_v0, %v4347_v57 }
 0x3d1   : > { %7585 = vmatpush2.bf16.msra.mxu1 %v9139_v59  ;;  %v8830_v59 = vcombine.high %v4343_v0, %v4347_v57  ;;  %v9061_v47 = vcombine.low %v4575_v58, %v4579_v25  ;;  %v4423_v19 = vld [vmem:[%s9811_s9 + $0x710] sm:$0xff] }
 0x3d2   : > { %7682 = vmatpush1.bf16.msra.mxu0 %v8989_v60  ;;  %v7390_v32 = vpop.f32.mrf.mxu0  ;;  %7586 = vmatprep.subr.bf16.mxu1 %v9132_v18  ;;  %v4335_v60 = vld [vmem:[%s9811_s9 + $0x450] sm:$0xff] }
 0x3d3   : > { %7683 = vmatprep.subr.bf16.mxu0 %v8982_v10  ;;  %v4339_v18 = vld [vmem:[%s9811_s9 + $0x470] sm:$0xff] }
 0x3d4   : > { %v4567_v10 = vld [vmem:[%s9811_s9 + $0xb90] sm:$0xff]  ;;  %v8822_v30 = vcombine.high %v4335_v60, %v4339_v18 }
 0x3d5   : > { %7587 = vmatpush2.bf16.msra.mxu1 %v9131_v2  ;;  %v9054_v1 = vcombine.high %v4567_v10, %v4571_v62  ;;  %v4327_v2 = vld [vmem:[%s9811_s9 + $0x410] sm:$0xff]  ;;  %v9053_v5 = vcombine.low %v4567_v10, %v4571_v62 }
 0x3d6   : > { %7684 = vmatpush1.bf16.msra.mxu0 %v8981_v3  ;;  %7638 = vmatprep.subr.bf16.mxu1 %v8870_v39  ;;  %v4331_v32 = vld [vmem:[%s9811_s9 + $0x430] sm:$0xff] }
 0x3d7   : > { %7685 = vmatprep.subr.bf16.mxu0 %v8974_v4  ;;  %v4559_v3 = vld [vmem:[%s9811_s9 + $0xb50] sm:$0xff]  ;;  %v8821_v4 = vcombine.low %v4335_v60, %v4339_v18  ;;  %v8814_v6 = vcombine.high %v4327_v2, %v4331_v32 }
 0x3d8   : > { %7589 = vmatmul.mubr.bf16.vlgmr.msra.gmra.mxu1 %v10692_v11  ;;  %v4563_v39 = vld [vmem:[%s9811_s9 + $0xb70] sm:$0xff] }
 0x3d9   : > { %7639 = vmatpush1.bf16.msra.mxu1 %v8869_v40  ;;  %7670 = vmatprep.mubr.bf16.mxu1 %v10466_v15  ;;  %v9046_v55 = vcombine.high %v4559_v3, %v4563_v39  ;;  %v4451_v40 = vld [vmem:[%s9811_s9 + $0x7f0] sm:$0xff]  ;;  %v9045_v27 = vcombine.low %v4559_v3, %v4563_v39 }
 0x3da   : > { %7686 = vmatpush1.bf16.msra.mxu0 %v8973_v7  ;;  %7640 = vmatprep.subr.bf16.mxu1 %v8862_v16  ;;  %v4551_v7 = vld [vmem:[%s9811_s9 + $0xb10] sm:$0xff]  ;;  %v8934_v31 = vcombine.high %v4447_v41, %v4451_v40 }
 0x3db   : > { %7687 = vmatprep.subr.bf16.mxu0 %v8966_v26  ;;  %v4555_v16 = vld [vmem:[%s9811_s9 + $0xb30] sm:$0xff]  ;;  %v8813_v26 = vcombine.low %v4327_v2, %v4331_v32 }
 0x3dc   : > { %v9038_v34 = vcombine.high %v4551_v7, %v4555_v16  ;;  %v9037_v38 = vcombine.low %v4551_v7, %v4555_v16  ;;  %v4415_v25 = vld [vmem:[%s9811_s9 + $0x6d0] sm:$0xff] }
 0x3dd   : > { %7641 = vmatpush1.bf16.msra.mxu1 %v8861_v14  ;;  %v4443_v14 = vld [vmem:[%s9811_s9 + $0x7b0] sm:$0xff] }
 0x3de   : > { %7688 = vmatpush1.bf16.msra.mxu0 %v8965_v53  ;;  %7642 = vmatprep.subr.bf16.mxu1 %v8854_v36  ;;  %v4543_v53 = vld [vmem:[%s9811_s9 + $0xad0] sm:$0xff]  ;;  %v8926_v52 = vcombine.high %v4439_v35, %v4443_v14 }
 0x3df   : > { %7689 = vmatprep.subr.bf16.mxu0 %v8958_v37  ;;  %v4547_v36 = vld [vmem:[%s9811_s9 + $0xaf0] sm:$0xff]  ;;  %v8933_v37 = vcombine.low %v4447_v41, %v4451_v40 }
 0x3e0   : > { %v9030_v29 = vcombine.high %v4543_v53, %v4547_v36  ;;  %v9029_v43 = vcombine.low %v4543_v53, %v4547_v36  ;;  %v4407_v62 = vld [vmem:[%s9811_s9 + $0x690] sm:$0xff] }
 0x3e1   : > { %7643 = vmatpush1.bf16.msra.mxu1 %v8853_v20  ;;  %v4435_v20 = vld [vmem:[%s9811_s9 + $0x770] sm:$0xff] }
 0x3e2   : > { %7690 = vmatpush1.bf16.msra.mxu0 %v8957_v28  ;;  %7644 = vmatprep.subr.bf16.mxu1 %v8846_v42  ;;  %v4535_v28 = vld [vmem:[%s9811_s9 + $0xa90] sm:$0xff]  ;;  %v8918_v45 = vcombine.high %v4431_v33, %v4435_v20 }
 0x3e3   : > { %7691 = vmatprep.subr.bf16.mxu0 %v8950_v24  ;;  %v4539_v42 = vld [vmem:[%s9811_s9 + $0xab0] sm:$0xff]  ;;  %v8925_v24 = vcombine.low %v4439_v35, %v4443_v14 }
 0x3e4   : > { %v9022_v46 = vcombine.high %v4535_v28, %v4539_v42  ;;  %v9021_v0 = vcombine.low %v4535_v28, %v4539_v42  ;;  %v4399_v39 = vld [vmem:[%s9811_s9 + $0x650] sm:$0xff] }
 0x3e5   : > { %7645 = vmatpush1.bf16.msra.mxu1 %v8845_v49  ;;  %v4427_v49 = vld [vmem:[%s9811_s9 + $0x730] sm:$0xff] }
 0x3e6   : > { %7692 = vmatpush1.bf16.msra.mxu0 %v8949_v50  ;;  %7646 = vmatprep.subr.bf16.mxu1 %v8838_v13  ;;  %v4527_v50 = vld [vmem:[%s9811_s9 + $0xa50] sm:$0xff]  ;;  %v8910_v57 = vcombine.high %v4423_v19, %v4427_v49 }
 0x3e7   : > { %7693 = vmatprep.subr.bf16.mxu0 %v8942_v56  ;;  %v4531_v13 = vld [vmem:[%s9811_s9 + $0xa70] sm:$0xff]  ;;  %v8917_v56 = vcombine.low %v4431_v33, %v4435_v20  ;;  %v4232_v33 = vld [vmem:[%s9811_s9 + $0x118] sm:$0xff] }
 0x3e8   : > { %v9014_v58 = vcombine.high %v4527_v50, %v4531_v13  ;;  %v9013_v60 = vcombine.low %v4527_v50, %v4531_v13  ;;  %v4391_v16 = vld [vmem:[%s9811_s9 + $0x610] sm:$0xff]  ;;  %v4236_v20 = vld [vmem:[%s9811_s9 + $0x138] sm:$0xff] }
 0x3e9   : > { %7647 = vmatpush1.bf16.msra.mxu1 %v8837_v17  ;;  %v4419_v17 = vld [vmem:[%s9811_s9 + $0x6f0] sm:$0xff]  ;;  %v8719_v13 = vcombine.low %v4232_v33, %v4236_v20 }
 0x3ea   : > { %7694 = vmatpush1.bf16.msra.mxu0 %v8941_v48  ;;  %7648 = vmatprep.subr.bf16.mxu1 %v8830_v59  ;;  %v4519_v48 = vld [vmem:[%s9811_s9 + $0xa10] sm:$0xff]  ;;  %v8902_v18 = vcombine.high %v4415_v25, %v4419_v17 }
 0x3eb   : > { %7695 = vmatprep.subr.bf16.mxu0 %v9062_v22  ;;  %v4523_v59 = vld [vmem:[%s9811_s9 + $0xa30] sm:$0xff]  ;;  %v8909_v22 = vcombine.low %v4423_v19, %v4427_v49  ;;  %v4224_v19 = vld [vmem:[%s9811_s9 + $0xd8] sm:$0xff] }
 0x3ec   : > { %v9006_v10 = vcombine.high %v4519_v48, %v4523_v59  ;;  %v9005_v2 = vcombine.low %v4519_v48, %v4523_v59  ;;  %v4228_v49 = vld [vmem:[%s9811_s9 + $0xf8] sm:$0xff] }
 0x3ed   : > { %7649 = vmatpush1.bf16.msra.mxu1 %v8829_v21  ;;  %v4411_v21 = vld [vmem:[%s9811_s9 + $0x6b0] sm:$0xff]  ;;  %v4220_v48 = vld [vmem:[%s9811_s9 + $0xb8] sm:$0xff] }
 0x3ee   : > { %7696 = vmatpush2.bf16.msra.mxu0 %v9061_v47  ;;  %7650 = vmatprep.subr.bf16.mxu1 %v8822_v30  ;;  %v4256_v47 = vld [vmem:[%s9811_s9 + $0x1d8] sm:$0xff]  ;;  %v8894_v32 = vcombine.high %v4407_v62, %v4411_v21 }
 0x3ef   : > { %7697 = vmatprep.subr.bf16.mxu0 %v9054_v1  ;;  %v4260_v30 = vld [vmem:[%s9811_s9 + $0x1f8] sm:$0xff]  ;;  %v8901_v1 = vcombine.low %v4415_v25, %v4419_v17 }
 0x3f0   : > { %v8744_v3 = vcombine.high %v4256_v47, %v4260_v30  ;;  %v8743_v41 = vcombine.low %v4256_v47, %v4260_v30  ;;  %v4216_v17 = vld [vmem:[%s9811_s9 + $0x98] sm:$0xff]  ;;  %v4615_v47 = vld [vmem:[%s9811_s9 + $0xd10] sm:$0xff] }
 0x3f1   : > { %7651 = vmatpush1.bf16.msra.mxu1 %v8821_v4  ;;  %v4403_v4 = vld [vmem:[%s9811_s9 + $0x670] sm:$0xff] }
 0x3f2   : > { %7698 = vmatpush2.bf16.msra.mxu0 %v9053_v5  ;;  %7652 = vmatprep.subr.bf16.mxu1 %v8814_v6  ;;  %v4248_v5 = vld [vmem:[%s9811_s9 + $0x198] sm:$0xff]  ;;  %v8886_v40 = vcombine.high %v4399_v39, %v4403_v4  ;;  %v8885_v35 = vcombine.low %v4399_v39, %v4403_v4 }
 0x3f3   : > { %7699 = vmatprep.subr.bf16.mxu0 %v9046_v55  ;;  %v4252_v6 = vld [vmem:[%s9811_s9 + $0x1b8] sm:$0xff]  ;;  %v8893_v55 = vcombine.low %v4407_v62, %v4411_v21  ;;  %v8704_v21 = vcombine.high %v4216_v17, %v4220_v48 }
 0x3f4   : > { %v8736_v7 = vcombine.high %v4248_v5, %v4252_v6  ;;  %v8735_v53 = vcombine.low %v4248_v5, %v4252_v6  ;;  %v4607_v6 = vld [vmem:[%s9811_s9 + $0xcd0] sm:$0xff] }
 0x3f5   : > { %7653 = vmatpush1.bf16.msra.mxu1 %v8813_v26  ;;  %v4395_v26 = vld [vmem:[%s9811_s9 + $0x630] sm:$0xff] }
 0x3f6   : > { %7700 = vmatpush2.bf16.msra.mxu0 %v9045_v27  ;;  %7654 = vmatprep.subr.bf16.mxu1 %v8934_v31  ;;  %v4240_v31 = vld [vmem:[%s9811_s9 + $0x158] sm:$0xff]  ;;  %v8878_v36 = vcombine.high %v4391_v16, %v4395_v26  ;;  %v8877_v28 = vcombine.low %v4391_v16, %v4395_v26 }
 0x3f7   : > { %7701 = vmatprep.subr.bf16.mxu0 %v9038_v34  ;;  %v4244_v34 = vld [vmem:[%s9811_s9 + $0x178] sm:$0xff] }
 0x3f8   : > { %v8727_v42 = vcombine.low %v4240_v31, %v4244_v34 }
 0x3f9   : > { %7655 = vmatpush2.bf16.msra.mxu1 %v8933_v37  ;;  %v8728_v37 = vcombine.high %v4240_v31, %v4244_v34  ;;  %v4599_v34 = vld [vmem:[%s9811_s9 + $0xc90] sm:$0xff] }
 0x3fa   : > { %7702 = vmatpush2.bf16.msra.mxu0 %v9037_v38  ;;  %7656 = vmatprep.subr.bf16.mxu1 %v8926_v52  ;;  %v4639_v38 = vld [vmem:[%s9811_s9 + $0xdd0] sm:$0xff] }
 0x3fb   : > { %7703 = vmatprep.subr.bf16.mxu0 %v9030_v29  ;;  %v4643_v52 = vld [vmem:[%s9811_s9 + $0xdf0] sm:$0xff] }
 0x3fc   : > { %v9125_v50 = vcombine.low %v4639_v38, %v4643_v52 }
 0x3fd   : > { %7657 = vmatpush2.bf16.msra.mxu1 %v8925_v24  ;;  %v9126_v24 = vcombine.high %v4639_v38, %v4643_v52 }
 0x3fe   : > { %7704 = vmatpush2.bf16.msra.mxu0 %v9029_v43  ;;  %7658 = vmatprep.subr.bf16.mxu1 %v8918_v45  ;;  %v8720_v43 = vcombine.high %v4232_v33, %v4236_v20  ;;  %v4631_v45 = vld [vmem:[%s9811_s9 + $0xd90] sm:$0xff] }
 0x3ff   : > { %7705 = vmatprep.subr.bf16.mxu0 %v9022_v46  ;;  %v4635_v46 = vld [vmem:[%s9811_s9 + $0xdb0] sm:$0xff] }
 0x400   : > { %v4591_v33 = vld [vmem:[%s9811_s9 + $0xc50] sm:$0xff] }
 0x401   : > { %7659 = vmatpush2.bf16.msra.mxu1 %v8917_v56  ;;  %v9118_v56 = vcombine.high %v4631_v45, %v4635_v46  ;;  %v4595_v20 = vld [vmem:[%s9811_s9 + $0xc70] sm:$0xff] }
 0x402   : > { %7706 = vmatpush2.bf16.msra.mxu0 %v9021_v0  ;;  %7660 = vmatprep.subr.bf16.mxu1 %v8910_v57  ;;  %v8712_v0 = vcombine.high %v4224_v19, %v4228_v49  ;;  %v4623_v57 = vld [vmem:[%s9811_s9 + $0xd50] sm:$0xff] }
 0x403   : > { %7707 = vmatprep.subr.bf16.mxu0 %v9014_v58  ;;  %v4627_v58 = vld [vmem:[%s9811_s9 + $0xd70] sm:$0xff] }
 0x405   : > { %7661 = vmatpush2.bf16.msra.mxu1 %v8909_v22  ;;  %v9117_v22 = vcombine.low %v4631_v45, %v4635_v46  ;;  %v4583_v46 = vld [vmem:[%s9811_s9 + $0xc10] sm:$0xff] }
 0x406   : > { %7708 = vmatpush2.bf16.msra.mxu0 %v9013_v60  ;;  %7662 = vmatprep.subr.bf16.mxu1 %v8902_v18  ;;  %v8711_v18 = vcombine.low %v4224_v19, %v4228_v49  ;;  %v4587_v19 = vld [vmem:[%s9811_s9 + $0xc30] sm:$0xff]  ;;  %v4304_v49 = vld [vmem:[%s9811_s9 + $0x358] sm:$0xff] }
 0x407   : > { %7709 = vmatprep.subr.bf16.mxu0 %v9006_v10  ;;  %v9110_v10 = vcombine.high %v4623_v57, %v4627_v58 }
 0x409   : > { %7663 = vmatpush2.bf16.msra.mxu1 %v8901_v1  ;;  %v4208_v1 = vld [vmem:[%s9811_s9 + $0x58] sm:$0xff] }
 0x40a   : > { %7710 = vmatpush2.bf16.msra.mxu0 %v9005_v2  ;;  %7664 = vmatprep.subr.bf16.mxu1 %v8894_v32  ;;  %v4212_v2 = vld [vmem:[%s9811_s9 + $0x78] sm:$0xff] }
 0x40b   : > { %7761 = vmatprep.subr.bf16.mxu0 %v8744_v3  ;;  %v9109_v3 = vcombine.low %v4623_v57, %v4627_v58  ;;  %v8696_v5 = vcombine.high %v4208_v1, %v4212_v2  ;;  %v8695_v16 = vcombine.low %v4208_v1, %v4212_v2  ;;  %v4703_v58 = vld [vmem:[%s9811_s9 + $0xfd0] sm:$0xff] }
 0x40c   : > { %v10900_v27 = vpop.f32.mrf.mxu0 }
 0x40d   : > { %7665 = vmatpush2.bf16.msra.mxu1 %v8893_v55  ;;  %7712 = vmatmul.mubr.bf16.vlgmr.msra.gmra.mxu0 %v10629_v9  ;;  %v4611_v55 = vld [vmem:[%s9811_s9 + $0xcf0] sm:$0xff] }
 0x40e   : > { %7762 = vmatpush1.bf16.msra.mxu0 %v8743_v41  ;;  %7793 = vmatprep.mubr.bf16.mxu0 %v10461_v8  ;;  %v10906_v14 = vpop.f32.mrf.mxu0  ;;  %v4200_v41 = vld [vmem:[%s9811_s9 + $0x18] sm:$0xff]  ;;  %v9094_v26 = vcombine.high %v4607_v6, %v4611_v55 }
 0x40f   : > { %7666 = vmatprep.subr.bf16.mxu1 %v8886_v40  ;;  %7763 = vmatprep.subr.bf16.mxu0 %v8736_v7  ;;  %v4204_v40 = vld [vmem:[%s9811_s9 + $0x38] sm:$0xff] }
 0x410   : > { %v7471_v29 = vpop.f32.mrf.mxu0  ;;  %v8688_v31 = vcombine.high %v4200_v41, %v4204_v40  ;;  %v8687_v38 = vcombine.low %v4200_v41, %v4204_v40 }
 0x411   : > { %7667 = vmatpush2.bf16.msra.mxu1 %v8885_v35  ;;  %v4603_v35 = vld [vmem:[%s9811_s9 + $0xcb0] sm:$0xff] }
 0x412   : > { %7764 = vmatpush1.bf16.msra.mxu0 %v8735_v53  ;;  %v7472_v8 = vpop.f32.mrf.mxu0  ;;  %7668 = vmatprep.subr.bf16.mxu1 %v8878_v36  ;;  %v4320_v53 = vld [vmem:[%s9811_s9 + $0x3d8] sm:$0xff]  ;;  %v9086_v52 = vcombine.high %v4599_v34, %v4603_v35 }
 0x413   : > { %7765 = vmatprep.subr.bf16.mxu0 %v8728_v37  ;;  %v4324_v36 = vld [vmem:[%s9811_s9 + $0x3f8] sm:$0xff]  ;;  %v9093_v37 = vcombine.low %v4607_v6, %v4611_v55 }
 0x414   : > { %v8808_v29 = vcombine.high %v4320_v53, %v4324_v36  ;;  %v4316_v8 = vld [vmem:[%s9811_s9 + $0x3b8] sm:$0xff] }
 0x415   : > { %7669 = vmatpush2.bf16.msra.mxu1 %v8877_v28  ;;  %v4312_v28 = vld [vmem:[%s9811_s9 + $0x398] sm:$0xff] }
 0x416   : > { %7766 = vmatpush1.bf16.msra.mxu0 %v8727_v42  ;;  %7720 = vmatprep.subr.bf16.mxu1 %v9126_v24  ;;  %v9085_v42 = vcombine.low %v4599_v34, %v4603_v35  ;;  %v8807_v24 = vcombine.low %v4320_v53, %v4324_v36  ;;  %v8800_v45 = vcombine.high %v4312_v28, %v4316_v8  ;;  %v4284_v6 = vld [vmem:[%s9811_s9 + $0x2b8] sm:$0xff] }
 0x417   : > { %7767 = vmatprep.subr.bf16.mxu0 %v8720_v43  ;;  %v9078_v43 = vcombine.high %v4591_v33, %v4595_v20  ;;  %v4276_v34 = vld [vmem:[%s9811_s9 + $0x278] sm:$0xff] }
 0x418   : > { %7671 = vmatmul.mubr.bf16.vlgmr.msra.gmra.mxu1 %v10544_v63  ;;  %v7426_v25 = vpop.f32.mrf.mxu1 }
 0x419   : > { %v10922_v59 = vadd.f32 %v7426_v25, %v10829_v51  ;;  %7721 = vmatpush1.bf16.msra.mxu1 %v9125_v50  ;;  %7752 = vmatprep.mubr.bf16.mxu1 %v10690_v23  ;;  %v4619_v51 = vld [vmem:[%s9811_s9 + $0xd30] sm:$0xff]  ;;  %v4308_v50 = vld [vmem:[%s9811_s9 + $0x378] sm:$0xff] }
 0x41a   : > { %7768 = vmatpush1.bf16.msra.mxu0 %v8719_v13  ;;  %v7428_v60 = vpop.f32.mrf.mxu1  ;;  %7722 = vmatprep.subr.bf16.mxu1 %v9118_v56  ;;  %v9102_v4 = vcombine.high %v4615_v47, %v4619_v51  ;;  %v9101_v7 = vcombine.low %v4615_v47, %v4619_v51  ;;  %v9077_v13 = vcombine.low %v4591_v33, %v4595_v20  ;;  %v4707_v25 = vld [vmem:[%s9811_s9 + $0xff0] sm:$0xff]  ;;  %v4288_v51 = vld [vmem:[%s9811_s9 + $0x2d8] sm:$0xff] }
 0x41b   : > { %v10926_v62 = vadd.f32 %v7428_v60, %v10834_v61  ;;  %7769 = vmatprep.subr.bf16.mxu0 %v8712_v0  ;;  %v8703_v61 = vcombine.low %v4216_v17, %v4220_v48  ;;  %v8799_v56 = vcombine.low %v4312_v28, %v4316_v8  ;;  %v9070_v0 = vcombine.high %v4583_v46, %v4587_v19  ;;  %v4296_v17 = vld [vmem:[%s9811_s9 + $0x318] sm:$0xff]  ;;  %v4699_v47 = vld [vmem:[%s9811_s9 + $0xfb0] sm:$0xff] }
 0x41c   : > { %v7430_v30 = vpop.f32.mrf.mxu1  ;;  %v8792_v57 = vcombine.high %v4304_v49, %v4308_v50  ;;  %v4300_v48 = vld [vmem:[%s9811_s9 + $0x338] sm:$0xff]  ;;  %v8791_v60 = vcombine.low %v4304_v49, %v4308_v50  ;;  %v9189_v1 = vcombine.low %v4703_v58, %v4707_v25 }
 0x41d   : > { %v7933_v32 = vcombine.low %v10922_v59, %v10926_v62  ;;  %7723 = vmatpush1.bf16.msra.mxu1 %v9117_v22  ;;  %v9069_v22 = vcombine.low %v4583_v46, %v4587_v19  ;;  %v4292_v30 = vld [vmem:[%s9811_s9 + $0x2f8] sm:$0xff]  ;;  %v8783_v2 = vcombine.low %v4296_v17, %v4300_v48 }
 0x41e   : > { %7770 = vmatpush1.bf16.msra.mxu0 %v8711_v18  ;;  %v7431_v39 = vpop.f32.mrf.mxu1  ;;  %7724 = vmatprep.subr.bf16.mxu1 %v9110_v10  ;;  %v9190_v18 = vcombine.high %v4703_v58, %v4707_v25  ;;  %v8784_v10 = vcombine.high %v4296_v17, %v4300_v48  ;;  %v8775_v41 = vcombine.low %v4288_v51, %v4292_v30  ;;  %v4268_v33 = vld [vmem:[%s9811_s9 + $0x238] sm:$0xff] }
 0x41f   : > { %7771 = vmatprep.subr.bf16.mxu0 %v8704_v21  ;;  %v4695_v21 = vld [vmem:[%s9811_s9 + $0xf90] sm:$0xff]  ;;  %v8776_v39 = vcombine.high %v4288_v51, %v4292_v30  ;;  %v4516_v46 = vld [vmem:[%s9811_s9 + $0x9f8] sm:$0xff] }
 0x420   : > { %v9181_v55 = vcombine.low %v4695_v21, %v4699_v47  ;;  %v4508_v58 = vld [vmem:[%s9811_s9 + $0x9b8] sm:$0xff] }
 0x421   : > { %7725 = vmatpush1.bf16.msra.mxu1 %v9109_v3  ;;  %v9182_v3 = vcombine.high %v4695_v21, %v4699_v47  ;;  %v4500_v21 = vld [vmem:[%s9811_s9 + $0x978] sm:$0xff] }
 0x422   : > { %7772 = vmatpush1.bf16.msra.mxu0 %v8703_v61  ;;  %7726 = vmatprep.subr.bf16.mxu1 %v9102_v4  ;;  %v4687_v61 = vld [vmem:[%s9811_s9 + $0xf50] sm:$0xff] }
 0x423   : > { %7773 = vmatprep.subr.bf16.mxu0 %v8696_v5  ;;  %v4691_v4 = vld [vmem:[%s9811_s9 + $0xf70] sm:$0xff]  ;;  %v4280_v5 = vld [vmem:[%s9811_s9 + $0x298] sm:$0xff] }
 0x424   : > { %v9174_v40 = vcombine.high %v4687_v61, %v4691_v4  ;;  %v9173_v35 = vcombine.low %v4687_v61, %v4691_v4  ;;  %v8767_v53 = vcombine.low %v4280_v5, %v4284_v6  ;;  %v4388_v61 = vld [vmem:[%s9811_s9 + $0x5f8] sm:$0xff] }
 0x425   : > { %7727 = vmatpush1.bf16.msra.mxu1 %v9101_v7  ;;  %v8768_v7 = vcombine.high %v4280_v5, %v4284_v6  ;;  %v4488_v4 = vld [vmem:[%s9811_s9 + $0x918] sm:$0xff] }
 0x426   : > { %7774 = vmatpush1.bf16.msra.mxu0 %v8695_v16  ;;  %7728 = vmatprep.subr.bf16.mxu1 %v9094_v26  ;;  %v4679_v16 = vld [vmem:[%s9811_s9 + $0xf10] sm:$0xff]  ;;  %v4492_v5 = vld [vmem:[%s9811_s9 + $0x938] sm:$0xff] }
 0x427   : > { %7775 = vmatprep.subr.bf16.mxu0 %v8688_v31  ;;  %v4683_v26 = vld [vmem:[%s9811_s9 + $0xf30] sm:$0xff]  ;;  %v4272_v31 = vld [vmem:[%s9811_s9 + $0x258] sm:$0xff] }
 0x428   : > { %v9166_v36 = vcombine.high %v4679_v16, %v4683_v26  ;;  %v9165_v20 = vcombine.low %v4679_v16, %v4683_v26  ;;  %v8759_v28 = vcombine.low %v4272_v31, %v4276_v34  ;;  %v4380_v16 = vld [vmem:[%s9811_s9 + $0x5b8] sm:$0xff] }
 0x429   : > { %7729 = vmatpush1.bf16.msra.mxu1 %v9093_v37  ;;  %v8760_v37 = vcombine.high %v4272_v31, %v4276_v34  ;;  %v4480_v26 = vld [vmem:[%s9811_s9 + $0x8d8] sm:$0xff] }
 0x42a   : > { %7776 = vmatpush1.bf16.msra.mxu0 %v8687_v38  ;;  %7730 = vmatprep.subr.bf16.mxu1 %v9086_v52  ;;  %v4671_v38 = vld [vmem:[%s9811_s9 + $0xed0] sm:$0xff]  ;;  %v4484_v31 = vld [vmem:[%s9811_s9 + $0x8f8] sm:$0xff] }
 0x42b   : > { %7777 = vmatprep.subr.bf16.mxu0 %v8808_v29  ;;  %v4675_v52 = vld [vmem:[%s9811_s9 + $0xef0] sm:$0xff]  ;;  %v4264_v29 = vld [vmem:[%s9811_s9 + $0x218] sm:$0xff] }
 0x42c   : > { %v9158_v8 = vcombine.high %v4671_v38, %v4675_v52  ;;  %v9157_v19 = vcombine.low %v4671_v38, %v4675_v52  ;;  %v8751_v49 = vcombine.low %v4264_v29, %v4268_v33  ;;  %v4372_v38 = vld [vmem:[%s9811_s9 + $0x578] sm:$0xff] }
 0x42d   : > { %7731 = vmatpush1.bf16.msra.mxu1 %v9085_v42  ;;  %v8752_v42 = vcombine.high %v4264_v29, %v4268_v33  ;;  %v4472_v29 = vld [vmem:[%s9811_s9 + $0x898] sm:$0xff] }
 0x42e   : > { %7778 = vmatpush2.bf16.msra.mxu0 %v8807_v24  ;;  %7732 = vmatprep.subr.bf16.mxu1 %v9078_v43  ;;  %v4663_v24 = vld [vmem:[%s9811_s9 + $0xe90] sm:$0xff]  ;;  %v4476_v33 = vld [vmem:[%s9811_s9 + $0x8b8] sm:$0xff] }
 0x42f   : > { %7779 = vmatprep.subr.bf16.mxu0 %v8800_v45  ;;  %v4667_v43 = vld [vmem:[%s9811_s9 + $0xeb0] sm:$0xff]  ;;  %v4512_v45 = vld [vmem:[%s9811_s9 + $0x9d8] sm:$0xff] }
 0x430   : > { %v9150_v50 = vcombine.high %v4663_v24, %v4667_v43  ;;  %v9149_v25 = vcombine.low %v4663_v24, %v4667_v43  ;;  %v8999_v17 = vcombine.low %v4512_v45, %v4516_v46  ;;  %v8960_v24 = vcombine.high %v4472_v29, %v4476_v33  ;;  %v4360_v43 = vld [vmem:[%s9811_s9 + $0x518] sm:$0xff] }
 0x431   : > { %7733 = vmatpush1.bf16.msra.mxu1 %v9077_v13  ;;  %v9000_v13 = vcombine.high %v4512_v45, %v4516_v46  ;;  %v4364_v45 = vld [vmem:[%s9811_s9 + $0x538] sm:$0xff] }
 0x432   : > { %7780 = vmatpush2.bf16.msra.mxu0 %v8799_v56  ;;  %7734 = vmatprep.subr.bf16.mxu1 %v9070_v0  ;;  %v4655_v56 = vld [vmem:[%s9811_s9 + $0xe50] sm:$0xff] }
 0x433   : > { %7781 = vmatprep.subr.bf16.mxu0 %v8792_v57  ;;  %v4659_v0 = vld [vmem:[%s9811_s9 + $0xe70] sm:$0xff]  ;;  %v4504_v57 = vld [vmem:[%s9811_s9 + $0x998] sm:$0xff] }
 0x434   : > { %v9142_v48 = vcombine.high %v4655_v56, %v4659_v0  ;;  %v9141_v51 = vcombine.low %v4655_v56, %v4659_v0  ;;  %v8991_v30 = vcombine.low %v4504_v57, %v4508_v58  ;;  %v8848_v56 = vcombine.high %v4360_v43, %v4364_v45 }
 0x435   : > { %7735 = vmatpush1.bf16.msra.mxu1 %v9069_v22  ;;  %v8992_v22 = vcombine.high %v4504_v57, %v4508_v58  ;;  %v4352_v57 = vld [vmem:[%s9811_s9 + $0x4d8] sm:$0xff] }
 0x436   : > { %7782 = vmatpush2.bf16.msra.mxu0 %v8791_v60  ;;  %7736 = vmatprep.subr.bf16.mxu1 %v9190_v18  ;;  %v4647_v60 = vld [vmem:[%s9811_s9 + $0xe10] sm:$0xff]  ;;  %v4356_v58 = vld [vmem:[%s9811_s9 + $0x4f8] sm:$0xff] }
 0x437   : > { %7783 = vmatprep.subr.bf16.mxu0 %v8784_v10  ;;  %v4651_v18 = vld [vmem:[%s9811_s9 + $0xe30] sm:$0xff]  ;;  %v4496_v10 = vld [vmem:[%s9811_s9 + $0x958] sm:$0xff] }
 0x438   : > { %v9133_v6 = vcombine.low %v4647_v60, %v4651_v18 }
 0x439   : > { %7737 = vmatpush2.bf16.msra.mxu1 %v9189_v1  ;;  %v9134_v1 = vcombine.high %v4647_v60, %v4651_v18  ;;  %v8840_v60 = vcombine.high %v4352_v57, %v4356_v58 }
 0x43a   : > { %7784 = vmatpush2.bf16.msra.mxu0 %v8783_v2  ;;  %7738 = vmatprep.subr.bf16.mxu1 %v9182_v3  ;;  %v8984_v3 = vcombine.high %v4496_v10, %v4500_v21 }
 0x43b   : > { %7785 = vmatprep.subr.bf16.mxu0 %v8776_v39  ;;  %v4384_v39 = vld [vmem:[%s9811_s9 + $0x5d8] sm:$0xff] }
 0x43c   : > { %v8871_v34 = vcombine.low %v4384_v39, %v4388_v61 }
 0x43d   : > { %7739 = vmatpush2.bf16.msra.mxu1 %v9181_v55  ;;  %v8872_v55 = vcombine.high %v4384_v39, %v4388_v61 }
 0x43e   : > { %7786 = vmatpush2.bf16.msra.mxu0 %v8775_v41  ;;  %7740 = vmatprep.subr.bf16.mxu1 %v9174_v40  ;;  %v8976_v40 = vcombine.high %v4488_v4, %v4492_v5 }
 0x43f   : > { %7787 = vmatprep.subr.bf16.mxu0 %v8768_v7  ;;  %v4376_v7 = vld [vmem:[%s9811_s9 + $0x598] sm:$0xff] }
 0x441   : > { %7741 = vmatpush2.bf16.msra.mxu1 %v9173_v35  ;;  %v8975_v35 = vcombine.low %v4488_v4, %v4492_v5  ;;  %v4336_v4 = vld [vmem:[%s9811_s9 + $0x458] sm:$0xff] }
 0x442   : > { %7788 = vmatpush2.bf16.msra.mxu0 %v8767_v53  ;;  %7742 = vmatprep.subr.bf16.mxu1 %v9166_v36  ;;  %v8864_v53 = vcombine.high %v4376_v7, %v4380_v16  ;;  %v8968_v36 = vcombine.high %v4480_v26, %v4484_v31  ;;  %v4340_v5 = vld [vmem:[%s9811_s9 + $0x478] sm:$0xff] }
 0x443   : > { %7789 = vmatprep.subr.bf16.mxu0 %v8760_v37  ;;  %v4368_v37 = vld [vmem:[%s9811_s9 + $0x558] sm:$0xff] }
 0x445   : > { %7743 = vmatpush2.bf16.msra.mxu1 %v9165_v20  ;;  %v8863_v20 = vcombine.low %v4376_v7, %v4380_v16  ;;  %v4328_v7 = vld [vmem:[%s9811_s9 + $0x418] sm:$0xff] }
 0x446   : > { %7790 = vmatpush2.bf16.msra.mxu0 %v8759_v28  ;;  %7744 = vmatprep.subr.bf16.mxu1 %v9158_v8  ;;  %v8967_v8 = vcombine.low %v4480_v26, %v4484_v31  ;;  %v4332_v16 = vld [vmem:[%s9811_s9 + $0x438] sm:$0xff] }
 0x447   : > { %7791 = vmatprep.subr.bf16.mxu0 %v8752_v42  ;;  %v8856_v42 = vcombine.high %v4368_v37, %v4372_v38  ;;  %v4560_v26 = vld [vmem:[%s9811_s9 + $0xb58] sm:$0xff] }
 0x448   : > { %v4564_v31 = vld [vmem:[%s9811_s9 + $0xb78] sm:$0xff] }
 0x449   : > { %7745 = vmatpush2.bf16.msra.mxu1 %v9157_v19  ;;  %v4464_v19 = vld [vmem:[%s9811_s9 + $0x858] sm:$0xff] }
 0x44a   : > { %7792 = vmatpush2.bf16.msra.mxu0 %v8751_v49  ;;  %7746 = vmatprep.subr.bf16.mxu1 %v9150_v50  ;;  %v4468_v49 = vld [vmem:[%s9811_s9 + $0x878] sm:$0xff] }
 0x44b   : > { %7843 = vmatprep.subr.bf16.mxu0 %v9000_v13  ;;  %v8959_v13 = vcombine.low %v4472_v29, %v4476_v33  ;;  %v8952_v0 = vcombine.high %v4464_v19, %v4468_v49  ;;  %v4552_v29 = vld [vmem:[%s9811_s9 + $0xb18] sm:$0xff] }
 0x44c   : > { %v4556_v33 = vld [vmem:[%s9811_s9 + $0xb38] sm:$0xff] }
 0x44d   : > { %v10982_v47 = vpop.f32.mrf.mxu0  ;;  %7747 = vmatpush2.bf16.msra.mxu1 %v9149_v25  ;;  %7794 = vmatmul.mubr.bf16.vlgmr.msra.gmra.mxu0 %v10542_v54  ;;  %v4456_v25 = vld [vmem:[%s9811_s9 + $0x818] sm:$0xff] }
 0x44e   : > { %7844 = vmatpush1.bf16.msra.mxu0 %v8999_v17  ;;  %7875 = vmatprep.mubr.bf16.mxu0 %v10565_v12  ;;  %v8983_v12 = vcombine.low %v4496_v10, %v4500_v21  ;;  %v4460_v17 = vld [vmem:[%s9811_s9 + $0x838] sm:$0xff] }
 0x44f   : > { %v10986_v2 = vpop.f32.mrf.mxu0  ;;  %7748 = vmatprep.subr.bf16.mxu1 %v9142_v48  ;;  %7845 = vmatprep.subr.bf16.mxu0 %v8992_v22  ;;  %v8847_v48 = vcombine.low %v4360_v43, %v4364_v45  ;;  %v8951_v22 = vcombine.low %v4464_v19, %v4468_v49  ;;  %v8944_v18 = vcombine.high %v4456_v25, %v4460_v17  ;;  %v4344_v10 = vld [vmem:[%s9811_s9 + $0x498] sm:$0xff] }
 0x450   : > { %v4348_v21 = vld [vmem:[%s9811_s9 + $0x4b8] sm:$0xff] }
 0x451   : > { %v7553_v54 = vpop.f32.mrf.mxu0  ;;  %7749 = vmatpush2.bf16.msra.mxu1 %v9141_v51  ;;  %v4576_v51 = vld [vmem:[%s9811_s9 + $0xbd8] sm:$0xff]  ;;  %v8832_v39 = vcombine.high %v4344_v10, %v4348_v21 }
 0x452   : > { %7846 = vmatpush1.bf16.msra.mxu0 %v8991_v30  ;;  %7750 = vmatprep.subr.bf16.mxu1 %v9134_v1  ;;  %v4580_v30 = vld [vmem:[%s9811_s9 + $0xbf8] sm:$0xff]  ;;  %v8839_v1 = vcombine.low %v4352_v57, %v4356_v58 }
 0x453   : > { %v7554_v41 = vpop.f32.mrf.mxu0  ;;  %7847 = vmatprep.subr.bf16.mxu0 %v8984_v3  ;;  %v8943_v3 = vcombine.low %v4456_v25, %v4460_v17  ;;  %v9064_v61 = vcombine.high %v4576_v51, %v4580_v30  ;;  %v4568_v54 = vld [vmem:[%s9811_s9 + $0xb98] sm:$0xff] }
 0x454   : > { %v8824_v41 = vcombine.high %v4336_v4, %v4340_v5  ;;  %v4440_v43 = vld [vmem:[%s9811_s9 + $0x798] sm:$0xff] }
 0x455   : > { %7751 = vmatpush2.bf16.msra.mxu1 %v9133_v6  ;;  %v4572_v6 = vld [vmem:[%s9811_s9 + $0xbb8] sm:$0xff] }
 0x456   : > { %7848 = vmatpush1.bf16.msra.mxu0 %v8983_v12  ;;  %7802 = vmatprep.subr.bf16.mxu1 %v8872_v55  ;;  %v8831_v12 = vcombine.low %v4344_v10, %v4348_v21  ;;  %v9063_v55 = vcombine.low %v4576_v51, %v4580_v30  ;;  %v4444_v45 = vld [vmem:[%s9811_s9 + $0x7b8] sm:$0xff] }
 0x457   : > { %7849 = vmatprep.subr.bf16.mxu0 %v8976_v40  ;;  %v9056_v40 = vcombine.high %v4568_v54, %v4572_v6  ;;  %v4548_v19 = vld [vmem:[%s9811_s9 + $0xaf8] sm:$0xff]  ;;  %v8927_v25 = vcombine.low %v4440_v43, %v4444_v45 }
 0x458   : > { %v10998_v52 = vpop.f32.mrf.mxu1  ;;  %7753 = vmatmul.mubr.bf16.vlgmr.msra.gmra.mxu1 %v10692_v11  ;;  %v4536_v57 = vld [vmem:[%s9811_s9 + $0xa98] sm:$0xff] }
 0x459   : > { %7803 = vmatpush1.bf16.msra.mxu1 %v8871_v34  ;;  %7834 = vmatprep.mubr.bf16.mxu1 %v10466_v15  ;;  %v8855_v15 = vcombine.low %v4368_v37, %v4372_v38  ;;  %v8823_v34 = vcombine.low %v4336_v4, %v4340_v5  ;;  %v4448_v37 = vld [vmem:[%s9811_s9 + $0x7d8] sm:$0xff] }
 0x45a   : > { %v11004_v28 = vpop.f32.mrf.mxu1  ;;  %7850 = vmatpush1.bf16.msra.mxu0 %v8975_v35  ;;  %7804 = vmatprep.subr.bf16.mxu1 %v8864_v53  ;;  %v9055_v35 = vcombine.low %v4568_v54, %v4572_v6  ;;  %v8816_v53 = vcombine.high %v4328_v7, %v4332_v16  ;;  %v4452_v38 = vld [vmem:[%s9811_s9 + $0x7f8] sm:$0xff] }
 0x45b   : > { %7851 = vmatprep.subr.bf16.mxu0 %v8968_v36  ;;  %v9048_v36 = vcombine.high %v4560_v26, %v4564_v31  ;;  %v8935_v49 = vcombine.low %v4448_v37, %v4452_v38  ;;  %v4540_v58 = vld [vmem:[%s9811_s9 + $0xab8] sm:$0xff] }
 0x45c   : > { %v7512_v46 = vpop.f32.mrf.mxu1  ;;  %v4528_v10 = vld [vmem:[%s9811_s9 + $0xa58] sm:$0xff]  ;;  %v9023_v30 = vcombine.low %v4536_v57, %v4540_v58 }
 0x45d   : > { %7805 = vmatpush1.bf16.msra.mxu1 %v8863_v20  ;;  %v8815_v20 = vcombine.low %v4328_v7, %v4332_v16  ;;  %v4544_v46 = vld [vmem:[%s9811_s9 + $0xad8] sm:$0xff] }
 0x45e   : > { %v7513_v50 = vpop.f32.mrf.mxu1  ;;  %7852 = vmatpush1.bf16.msra.mxu0 %v8967_v8  ;;  %7806 = vmatprep.subr.bf16.mxu1 %v8856_v42  ;;  %v9047_v8 = vcombine.low %v4560_v26, %v4564_v31  ;;  %v8936_v42 = vcombine.high %v4448_v37, %v4452_v38  ;;  %v9031_v17 = vcombine.low %v4544_v46, %v4548_v19  ;;  %v4532_v21 = vld [vmem:[%s9811_s9 + $0xa78] sm:$0xff] }
 0x45f   : > { %7853 = vmatprep.subr.bf16.mxu0 %v8960_v24  ;;  %v9040_v24 = vcombine.high %v4552_v29, %v4556_v33  ;;  %v8928_v50 = vcombine.high %v4440_v43, %v4444_v45  ;;  %v4520_v4 = vld [vmem:[%s9811_s9 + $0xa18] sm:$0xff]  ;;  %v9015_v6 = vcombine.low %v4528_v10, %v4532_v21 }
 0x460   : > { %v4524_v5 = vld [vmem:[%s9811_s9 + $0xa38] sm:$0xff] }
 0x461   : > { %7807 = vmatpush1.bf16.msra.mxu1 %v8855_v15  ;;  %v9039_v15 = vcombine.low %v4552_v29, %v4556_v33  ;;  %v9007_v16 = vcombine.low %v4520_v4, %v4524_v5  ;;  %v4400_v31 = vld [vmem:[%s9811_s9 + $0x658] sm:$0xff] }
 0x462   : > { %7854 = vmatpush1.bf16.msra.mxu0 %v8959_v13  ;;  %7808 = vmatprep.subr.bf16.mxu1 %v8848_v56  ;;  %v9032_v13 = vcombine.high %v4544_v46, %v4548_v19  ;;  %v4432_v56 = vld [vmem:[%s9811_s9 + $0x758] sm:$0xff]  ;;  %v9585_v46 = vmov 1983009808  }
 0x463   : > { %7855 = vmatprep.subr.bf16.mxu0 %v8952_v0  ;;  %v4436_v0 = vld [vmem:[%s9811_s9 + $0x778] sm:$0xff]  ;;  %v7936_v19 = vunpack.c.l.s4 %v9585_v46 }
 0x464   : > { %v8919_v51 = vcombine.low %v4432_v56, %v4436_v0  ;;  %v4396_v37 = vld [vmem:[%s9811_s9 + $0x638] sm:$0xff] }
 0x465   : > { %7809 = vmatpush1.bf16.msra.mxu1 %v8847_v48  ;;  %v8920_v48 = vcombine.high %v4432_v56, %v4436_v0  ;;  %v4680_v46 = vld [vmem:[%s9811_s9 + $0xf18] sm:$0xff] }
 0x466   : > { %7856 = vmatpush1.bf16.msra.mxu0 %v8951_v22  ;;  %7810 = vmatprep.subr.bf16.mxu1 %v8840_v60  ;;  %v9024_v22 = vcombine.high %v4536_v57, %v4540_v58  ;;  %v4424_v60 = vld [vmem:[%s9811_s9 + $0x718] sm:$0xff]  ;;  %v7937_v57 = vunpack.c.0.s8 %v7936_v19 }
 0x467   : > { %7857 = vmatprep.subr.bf16.mxu0 %v8944_v18  ;;  %v4428_v18 = vld [vmem:[%s9811_s9 + $0x738] sm:$0xff] }
 0x468   : > { %v8911_v54 = vcombine.low %v4424_v60, %v4428_v18  ;;  %v4624_v58 = vld [vmem:[%s9811_s9 + $0xd58] sm:$0xff] }
 0x469   : > { %7811 = vmatpush1.bf16.msra.mxu1 %v8839_v1  ;;  %v8912_v1 = vcombine.high %v4424_v60, %v4428_v18  ;;  %v4684_v19 = vld [vmem:[%s9811_s9 + $0xf38] sm:$0xff] }
 0x46a   : > { %7858 = vmatpush1.bf16.msra.mxu0 %v8943_v3  ;;  %7812 = vmatprep.subr.bf16.mxu1 %v8832_v39  ;;  %v9016_v3 = vcombine.high %v4528_v10, %v4532_v21  ;;  %v4416_v39 = vld [vmem:[%s9811_s9 + $0x6d8] sm:$0xff] }
 0x46b   : > { %7859 = vmatprep.subr.bf16.mxu0 %v9064_v61  ;;  %v4420_v61 = vld [vmem:[%s9811_s9 + $0x6f8] sm:$0xff] }
 0x46c   : > { %v8903_v7 = vcombine.low %v4416_v39, %v4420_v61  ;;  %v4616_v10 = vld [vmem:[%s9811_s9 + $0xd18] sm:$0xff] }
 0x46d   : > { %7813 = vmatpush1.bf16.msra.mxu1 %v8831_v12  ;;  %v8904_v12 = vcombine.high %v4416_v39, %v4420_v61  ;;  %v4187_v39 = vld [vmem:[#allocation2] sm:$0xff] }
 0x46e   : > { %7860 = vmatpush2.bf16.msra.mxu0 %v9063_v55  ;;  %7814 = vmatprep.subr.bf16.mxu1 %v8824_v41  ;;  %v9008_v55 = vcombine.high %v4520_v4, %v4524_v5  ;;  %v4408_v41 = vld [vmem:[%s9811_s9 + $0x698] sm:$0xff] }
 0x46f   : > { %7861 = vmatprep.subr.bf16.mxu0 %v9056_v40  ;;  %v4412_v40 = vld [vmem:[%s9811_s9 + $0x6b8] sm:$0xff] }
 0x470   : > { %v8896_v26 = vcombine.high %v4408_v41, %v4412_v40 }
 0x471   : > { %7815 = vmatpush1.bf16.msra.mxu1 %v8823_v34  ;;  %v4404_v34 = vld [vmem:[%s9811_s9 + $0x678] sm:$0xff] }
 0x472   : > { %7862 = vmatpush2.bf16.msra.mxu0 %v9055_v35  ;;  %7816 = vmatprep.subr.bf16.mxu1 %v8816_v53  ;;  %v8895_v35 = vcombine.low %v4408_v41, %v4412_v40  ;;  %v8888_v53 = vcombine.high %v4400_v31, %v4404_v34  ;;  %v8887_v29 = vcombine.low %v4400_v31, %v4404_v34  ;;  %v4704_v34 = vld [vmem:[%s9811_s9 + $0xfd8] sm:$0xff] }
 0x473   : > { %7863 = vmatprep.subr.bf16.mxu0 %v9048_v36  ;;  %v4392_v36 = vld [vmem:[%s9811_s9 + $0x618] sm:$0xff] }
 0x474   : > { %v8880_v33 = vcombine.high %v4392_v36, %v4396_v37  ;;  %v8879_v43 = vcombine.low %v4392_v36, %v4396_v37  ;;  %v4696_v37 = vld [vmem:[%s9811_s9 + $0xf98] sm:$0xff] }
 0x475   : > { %7817 = vmatpush1.bf16.msra.mxu1 %v8815_v20 }
 0x476   : > { %7864 = vmatpush2.bf16.msra.mxu0 %v9047_v8  ;;  %7818 = vmatprep.subr.bf16.mxu1 %v8936_v42  ;;  %v4640_v8 = vld [vmem:[%s9811_s9 + $0xdd8] sm:$0xff] }
 0x477   : > { %7865 = vmatprep.subr.bf16.mxu0 %v9040_v24  ;;  %v4644_v42 = vld [vmem:[%s9811_s9 + $0xdf8] sm:$0xff] }
 0x478   : > { %v9128_v45 = vcombine.high %v4640_v8, %v4644_v42  ;;  %v9127_v56 = vcombine.low %v4640_v8, %v4644_v42  ;;  %v4688_v42 = vld [vmem:[%s9811_s9 + $0xf58] sm:$0xff] }
 0x479   : > { %7819 = vmatpush2.bf16.msra.mxu1 %v8935_v49 }
 0x47a   : > { %7866 = vmatpush2.bf16.msra.mxu0 %v9039_v15  ;;  %7820 = vmatprep.subr.bf16.mxu1 %v8928_v50  ;;  %v4632_v15 = vld [vmem:[%s9811_s9 + $0xd98] sm:$0xff]  ;;  %v7509_v50 = vadd.f32 %v10998_v52, %v10900_v27 }
 0x47b   : > { %7867 = vmatprep.subr.bf16.mxu0 %v9032_v13  ;;  %v7511_v13 = vadd.f32 %v11004_v28, %v10906_v14 }
 0x47d   : > { %7821 = vmatpush2.bf16.msra.mxu1 %v8927_v25  ;;  %v4628_v25 = vld [vmem:[%s9811_s9 + $0xd78] sm:$0xff]  ;;  %v7552_v27 = vadd.f32 %v10986_v2, %v7511_v13  ;;  %v9167_v13 = vcombine.low %v4680_v46, %v4684_v19 }
 0x47e   : > { %7868 = vmatpush2.bf16.msra.mxu0 %v9031_v17  ;;  %7822 = vmatprep.subr.bf16.mxu1 %v8920_v48  ;;  %v7550_v48 = vadd.f32 %v10982_v47, %v7509_v50  ;;  %v9112_v28 = vcombine.high %v4624_v58, %v4628_v25  ;;  %v4676_v50 = vld [vmem:[%s9811_s9 + $0xef8] sm:$0xff] }
 0x47f   : > { %7869 = vmatprep.subr.bf16.mxu0 %v9024_v22  ;;  %v11072_v22 = vsub.s32 %v7937_v57, %v9845_v44  ;;  %v4668_v57 = vld [vmem:[%s9811_s9 + $0xeb8] sm:$0xff] }
 0x481   : > { %7823 = vmatpush2.bf16.msra.mxu1 %v8919_v51 }
 0x482   : > { %7870 = vmatpush2.bf16.msra.mxu0 %v9023_v30  ;;  %7824 = vmatprep.subr.bf16.mxu1 %v8912_v1  ;;  %v7941_v30 = vrot.slane %v7933_v32, %v11072_v22  ;;  %v4608_v1 = vld [vmem:[%s9811_s9 + $0xcd8] sm:$0xff] }
 0x483   : > { %7871 = vmatprep.subr.bf16.mxu0 %v9016_v3  ;;  %v4612_v3 = vld [vmem:[%s9811_s9 + $0xcf8] sm:$0xff] }
 0x484   : > { %v9096_v5 = vcombine.high %v4608_v1, %v4612_v3  ;;  %v9095_v59 = vcombine.low %v4608_v1, %v4612_v3  ;;  %v4592_v32 = vld [vmem:[%s9811_s9 + $0xc58] sm:$0xff] }
 0x485   : > { %7825 = vmatpush2.bf16.msra.mxu1 %v8911_v54 }
 0x486   : > { %7872 = vmatpush2.bf16.msra.mxu0 %v9015_v6  ;;  %7826 = vmatprep.subr.bf16.mxu1 %v8904_v12  ;;  %v4600_v6 = vld [vmem:[%s9811_s9 + $0xc98] sm:$0xff] }
 0x487   : > { %7873 = vmatprep.subr.bf16.mxu0 %v9008_v55  ;;  %v4604_v12 = vld [vmem:[%s9811_s9 + $0xcb8] sm:$0xff] }
 0x488   : > { %v9088_v62 = vcombine.high %v4600_v6, %v4604_v12  ;;  %v4596_v55 = vld [vmem:[%s9811_s9 + $0xc78] sm:$0xff]  ;;  %v9087_v41 = vcombine.low %v4600_v6, %v4604_v12 }
 0x489   : > { %7827 = vmatpush2.bf16.msra.mxu1 %v8903_v7  ;;  %v9080_v40 = vcombine.high %v4592_v32, %v4596_v55  ;;  %v4584_v7 = vld [vmem:[%s9811_s9 + $0xc18] sm:$0xff] }
 0x48a   : > { %7874 = vmatpush2.bf16.msra.mxu0 %v9007_v16  ;;  %7828 = vmatprep.subr.bf16.mxu1 %v8896_v26  ;;  %v4588_v16 = vld [vmem:[%s9811_s9 + $0xc38] sm:$0xff]  ;;  %v9079_v26 = vcombine.low %v4592_v32, %v4596_v55 }
 0x48b   : > { %v9072_v31 = vcombine.high %v4584_v7, %v4588_v16 }
 0x48d   : > { %v11052_v38 = vpop.f32.mrf.mxu0  ;;  %7829 = vmatpush2.bf16.msra.mxu1 %v8895_v35  ;;  %7876 = vmatmul.mubr.bf16.vlgmr.msra.gmra.mxu0 %v10629_v9  ;;  %v4636_v9 = vld [vmem:[%s9811_s9 + $0xdb8] sm:$0xff] }
 0x48e   : > { %7830 = vmatprep.subr.bf16.mxu1 %v8888_v53  ;;  %v9120_v0 = vcombine.high %v4632_v15, %v4636_v9  ;;  %v9119_v14 = vcombine.low %v4632_v15, %v4636_v9  ;;  %v4708_v35 = vld [vmem:[%s9811_s9 + $0xff8] sm:$0xff]  ;;  %v9071_v53 = vcombine.low %v4584_v7, %v4588_v16  ;;  %v9168_v15 = vcombine.high %v4680_v46, %v4684_v19 }
 0x48f   : > { %v11055_v20 = vpop.f32.mrf.mxu0  ;;  %v9192_v36 = vcombine.high %v4704_v34, %v4708_v35  ;;  %v4672_v9 = vld [vmem:[%s9811_s9 + $0xed8] sm:$0xff] }
 0x491   : > { %v7635_v24 = vpop.f32.mrf.mxu0  ;;  %7831 = vmatpush2.bf16.msra.mxu1 %v8887_v29  ;;  %v4700_v29 = vld [vmem:[%s9811_s9 + $0xfb8] sm:$0xff] }
 0x492   : > { %7832 = vmatprep.subr.bf16.mxu1 %v8880_v33  ;;  %v9191_v33 = vcombine.low %v4704_v34, %v4708_v35  ;;  %v9184_v8 = vcombine.high %v4696_v37, %v4700_v29  ;;  %v4692_v24 = vld [vmem:[%s9811_s9 + $0xf78] sm:$0xff] }
 0x493   : > { %v7636_v49 = vpop.f32.mrf.mxu0 }
 0x494   : > { %v9175_v49 = vcombine.low %v4688_v42, %v4692_v24 }
 0x495   : > { %7833 = vmatpush2.bf16.msra.mxu1 %v8879_v43  ;;  %v9183_v43 = vcombine.low %v4696_v37, %v4700_v29 }
 0x496   : > { %7884 = vmatprep.subr.bf16.mxu1 %v9128_v45  ;;  %v9176_v45 = vcombine.high %v4688_v42, %v4692_v24 }
 0x498   : > { %v7590_v17 = vpop.f32.mrf.mxu1  ;;  %7835 = vmatmul.mubr.bf16.vlgmr.msra.gmra.mxu1 %v10544_v63  ;;  %v4620_v63 = vld [vmem:[%s9811_s9 + $0xd38] sm:$0xff] }
 0x499   : > { %7885 = vmatpush1.bf16.msra.mxu1 %v9127_v56  ;;  %7916 = vmatprep.mubr.bf16.mxu1 %v10690_v23  ;;  %v7591_v60 = vadd.f32 %v7590_v17, %v7550_v48  ;;  %v9111_v23 = vcombine.low %v4624_v58, %v4628_v25  ;;  %v9104_v51 = vcombine.high %v4616_v10, %v4620_v63  ;;  %v4656_v17 = vld [vmem:[%s9811_s9 + $0xe58] sm:$0xff] }
 0x49a   : > { %v7592_v52 = vpop.f32.mrf.mxu1  ;;  %7886 = vmatprep.subr.bf16.mxu1 %v9120_v0  ;;  %v9103_v4 = vcombine.low %v4616_v10, %v4620_v63  ;;  %v9160_v56 = vcombine.high %v4672_v9, %v4676_v50  ;;  %v4664_v0 = vld [vmem:[%s9811_s9 + $0xe98] sm:$0xff]  ;;  %v9159_v58 = vcombine.low %v4672_v9, %v4676_v50 }
 0x49b   : > { %v7593_v18 = vadd.f32 %v7592_v52, %v7552_v27  ;;  %v9152_v25 = vcombine.high %v4664_v0, %v4668_v57  ;;  %v4660_v48 = vld [vmem:[%s9811_s9 + $0xe78] sm:$0xff]  ;;  %v9151_v27 = vcombine.low %v4664_v0, %v4668_v57 }
 0x49c   : > { %v7594_v21 = vpop.f32.mrf.mxu1  ;;  %v4648_v52 = vld [vmem:[%s9811_s9 + $0xe18] sm:$0xff] }
 0x49d   : > { %v7934_v47 = vcombine.low %v7591_v60, %v7593_v18  ;;  %7887 = vmatpush1.bf16.msra.mxu1 %v9119_v14  ;;  %v9144_v14 = vcombine.high %v4656_v17, %v4660_v48  ;;  %v9143_v18 = vcombine.low %v4656_v17, %v4660_v48 }
 0x49e   : > { %v7595_v2 = vpop.f32.mrf.mxu1  ;;  %7888 = vmatprep.subr.bf16.mxu1 %v9112_v28  ;;  %v4652_v28 = vld [vmem:[%s9811_s9 + $0xe38] sm:$0xff] }
 0x49f   : > { %v7948_v44 = vrot.slane %v7934_v47, %v11072_v22  ;;  %v9136_v10 = vcombine.high %v4648_v52, %v4652_v28  ;;  %v9135_v47 = vcombine.low %v4648_v52, %v4652_v28 }
 0x4a1   : > { %v7949_v61 = vcombine.low %v7941_v30, %v7948_v44  ;;  %7889 = vmatpush1.bf16.msra.mxu1 %v9111_v23 }
 0x4a2   : > { %7890 = vmatprep.subr.bf16.mxu1 %v9104_v51 }
 0x4a3   : > { %v7969_v54 = vadd.f32 %v7949_v61, %v4187_v39 }
 0x4a5   : > { %7971 = vst [vmem:[#allocation2] sm:$0xff] %v7969_v54  ;;  %7891 = vmatpush1.bf16.msra.mxu1 %v9103_v4 }
 0x4a6   : > { %7892 = vmatprep.subr.bf16.mxu1 %v9096_v5 }
 0x4a9   : > { %7893 = vmatpush1.bf16.msra.mxu1 %v9095_v59 }
 0x4aa   : > { %7894 = vmatprep.subr.bf16.mxu1 %v9088_v62 }
 0x4ad   : > { %7895 = vmatpush1.bf16.msra.mxu1 %v9087_v41 }
 0x4ae   : > { %7896 = vmatprep.subr.bf16.mxu1 %v9080_v40 }
 0x4b1   : > { %7897 = vmatpush1.bf16.msra.mxu1 %v9079_v26 }
 0x4b2   : > { %7898 = vmatprep.subr.bf16.mxu1 %v9072_v31 }
 0x4b5   : > { %7899 = vmatpush1.bf16.msra.mxu1 %v9071_v53 }
 0x4b6   : > { %7900 = vmatprep.subr.bf16.mxu1 %v9192_v36 }
 0x4b9   : > { %7901 = vmatpush2.bf16.msra.mxu1 %v9191_v33 }
 0x4ba   : > { %7902 = vmatprep.subr.bf16.mxu1 %v9184_v8 }
 0x4bd   : > { %7903 = vmatpush2.bf16.msra.mxu1 %v9183_v43 }
 0x4be   : > { %7904 = vmatprep.subr.bf16.mxu1 %v9176_v45 }
 0x4c1   : > { %7905 = vmatpush2.bf16.msra.mxu1 %v9175_v49  ;;  %v4188_v49 = vld [vmem:[#allocation2 + $0x8] sm:$0xff] }
 0x4c2   : > { %7906 = vmatprep.subr.bf16.mxu1 %v9168_v15 }
 0x4c5   : > { %7907 = vmatpush2.bf16.msra.mxu1 %v9167_v13 }
 0x4c6   : > { %7908 = vmatprep.subr.bf16.mxu1 %v9160_v56 }
 0x4c9   : > { %7909 = vmatpush2.bf16.msra.mxu1 %v9159_v58 }
 0x4ca   : > { %7910 = vmatprep.subr.bf16.mxu1 %v9152_v25 }
 0x4cd   : > { %v7713_v60 = vpop.f32.mrf.mxu0  ;;  %7911 = vmatpush2.bf16.msra.mxu1 %v9151_v27 }
 0x4ce   : > { %7912 = vmatprep.subr.bf16.mxu1 %v9144_v14 }
 0x4cf   : > { %v7715_v63 = vpop.f32.mrf.mxu0 }
 0x4d1   : > { %v7717_v21 = vpop.f32.mrf.mxu0  ;;  %7913 = vmatpush2.bf16.msra.mxu1 %v9143_v18 }
 0x4d2   : > { %7914 = vmatprep.subr.bf16.mxu1 %v9136_v10 }
 0x4d3   : > { %v7718_v23 = vpop.f32.mrf.mxu0 }
 0x4d5   : > { %7915 = vmatpush2.bf16.msra.mxu1 %v9135_v47 }
 0x4d8   : > { %v7672_v2 = vpop.f32.mrf.mxu1  ;;  %7917 = vmatmul.mubr.bf16.vlgmr.msra.gmra.mxu1 %v10692_v11 }
 0x4d9   : > { %v7673_v51 = vadd.f32 %v7672_v2, %v11052_v38 }
 0x4da   : > { %v7674_v30 = vpop.f32.mrf.mxu1 }
 0x4db   : > { %v7675_v44 = vadd.f32 %v7674_v30, %v11055_v20  ;;  %v7714_v1 = vadd.f32 %v7713_v60, %v7673_v51 }
 0x4dc   : > { %v7676_v3 = vpop.f32.mrf.mxu1 }
 0x4dd   : > { %v7716_v39 = vadd.f32 %v7715_v63, %v7675_v44 }
 0x4de   : > { %v7677_v61 = vpop.f32.mrf.mxu1 }
 0x50d   : > { %v7795_v4 = vpop.f32.mrf.mxu0 }
 0x50f   : > { %v7797_v5 = vpop.f32.mrf.mxu0 }
 0x511   : > { %v7799_v54 = vpop.f32.mrf.mxu0 }
 0x513   : > { %v7800_v6 = vpop.f32.mrf.mxu0 }
 0x518   : > { %v7754_v12 = vpop.f32.mrf.mxu1 }
 0x519   : > { %v7755_v59 = vadd.f32 %v7754_v12, %v7714_v1 }
 0x51a   : > { %v7756_v62 = vpop.f32.mrf.mxu1 }
 0x51b   : > { %v7757_v32 = vadd.f32 %v7756_v62, %v7716_v39 }
 0x51c   : > { %v7758_v55 = vpop.f32.mrf.mxu1 }
 0x51d   : > { %v7950_v41 = vcombine.low %v7755_v59, %v7757_v32 }
 0x51e   : > { %v7759_v11 = vpop.f32.mrf.mxu1 }
 0x51f   : > { %v7958_v46 = vrot.slane %v7950_v41, %v11072_v22 }
 0x54d   : > { %v7877_v40 = vpop.f32.mrf.mxu0 }
 0x54f   : > { %v7879_v38 = vpop.f32.mrf.mxu0 }
 0x551   : > { %v7881_v7 = vpop.f32.mrf.mxu0 }
 0x553   : > { %v7882_v16 = vpop.f32.mrf.mxu0 }
 0x558   : > { %v7836_v20 = vpop.f32.mrf.mxu1 }
 0x559   : > { %v7837_v35 = vadd.f32 %v7836_v20, %v7795_v4 }
 0x55a   : > { %v7838_v26 = vpop.f32.mrf.mxu1 }
 0x55b   : > { %v7839_v53 = vadd.f32 %v7838_v26, %v7797_v5  ;;  %v7878_v37 = vadd.f32 %v7877_v40, %v7837_v35 }
 0x55c   : > { %v7840_v31 = vpop.f32.mrf.mxu1 }
 0x55d   : > { %v7880_v29 = vadd.f32 %v7879_v38, %v7839_v53 }
 0x55e   : > { %v7841_v34 = vpop.f32.mrf.mxu1 }
 0x598   : > { %v7918_v36 = vpop.f32.mrf.mxu1 }
 0x599   : > { %v7919_v8 = vadd.f32 %v7918_v36, %v7878_v37 }
 0x59a   : > { %v7920_v33 = vpop.f32.mrf.mxu1 }
 0x59b   : > { %v7921_v42 = vadd.f32 %v7920_v33, %v7880_v29 }
 0x59c   : > { %v7922_v24 = vpop.f32.mrf.mxu1 }
 0x59d   : > { %v7951_v43 = vcombine.low %v7919_v8, %v7921_v42 }
 0x59e   : > { %v7923_v45 = vpop.f32.mrf.mxu1 }
 0x59f   : > { %v7965_v19 = vrot.slane %v7951_v43, %v11072_v22 }
 0x5a1   : > { %v7966_v15 = vcombine.low %v7958_v46, %v7965_v19  ;;  %7976 = sbr.rel (%p9193_p1) target bundleno = 1454 (0x5ae), region = 60 }
 0x5a3   : > { %v7970_v9 = vadd.f32 %v7966_v15, %v4188_v49 }
 0x5a5   : > { %7972 = vst [vmem:[#allocation2 + $0x8] sm:$0xff] %v7970_v9 }
 0x5a6   : > { %v7977_v50 = vld [vmem:[#allocation2] sm:$0xff] }
 0x5a7   : > { %7979 = vst [vmem:[%s9820_s23] sm:$0xff] %v7977_v50 }
 0x5ac   : > { %v7978_v13 = vld [vmem:[#allocation2 + $0x8] sm:$0xff] }
 0x5ad   : > { %7980 = vst [vmem:[%s9820_s23 + $0x8] sm:$0xff] %v7978_v13 }
 0x5ae PF: > { %s11217_s10 = sld [smem:[#allocation17_spill]]  ;;  %s7996_s2 = sshll.u32 %s9820_s23, 4  ;;  %s7997_s2 = int_to_ptr.vmem [resolvable:$true] %s7996_s2 }
 0x5af   : > { %s11218_s0 = sld [smem:[#allocation25_spill]]  ;;  %s7982_s24 = scalar_lea.sflag [#allocation5], %s332_s13 }
 0x5b0   : > { %s9446_s7 = scalar_lea.vmem %s7997_s2, 256  ;;  %p11219_p4 = scmp.ne.s32.totalorder %s11201_s28, 0 }
 0x5b1   : > { %p9447_p3 = scmp.ne.s32.totalorder %s7997_s2, %s9446_s7  ;;  %s9586_s21 = smov [#allocation11]  }
 0x5b2   : > { %s9450_s8 = sshll.u32 %s9586_s21, 4  ;;  %s9451_s8 = int_to_ptr.vmem [resolvable:$false] %s9450_s8 }
 0x5b3   : > { %p9448_p10 = pnand %p9447_p3, %p11219_p4  ;;  %s9452_s5 = scalar_lea.vmem %s9451_s8, 512 }
 0x5b4   : > { %s9203_s12 = sshll.u32 %s11217_s10, 8  ;;  %p9453_p6 = scmp.lt.s32.totalorder %s7997_s2, %s9451_s8 }
 0x5b5   : > { %s7994_s29 = scalar_lea.hbm %s11218_s0, %s9203_s12  ;;  %p9449_p2 = pneg %p9448_p10 }
 0x5b6   : > { %p9454_p12 = scmp.lt.s32.totalorder %s9452_s5, %s9446_s7 }
 0x5b8   : > { %p9455_p13 = por %p9454_p12, %p9453_p6 }
 0x5ba   : > { %p9456_p0 = pnand %p9455_p13, %p9449_p2 }
 0x5bc   : > { %9459 = shalt.err (!%p9456_p0)
}
 0x5bd   : > { %s9460_s14 = scalar_lea.hbm %s7994_s29, 256  ;;  %s9464_s13 = scalar_lea.hbm %s11218_s0, 512 }
 0x5be   : > { %p9461_p5 = scmp.ne.s32.totalorder %s7994_s29, %s9460_s14  ;;  %p9465_p8 = scmp.lt.s32.totalorder %s7994_s29, %s11218_s0 }
 0x5bf   : > { %p9466_p7 = scmp.lt.s32.totalorder %s9464_s13, %s9460_s14 }
 0x5c0   : > { %p9462_p9 = pnand %p9461_p5, %p11219_p4 }
 0x5c1   : > { %p9467_p1 = por %p9466_p7, %p9465_p8 }
 0x5c2   : > { %p9463_p11 = pneg %p9462_p9 }
 0x5c4   : > { %p9468_p3 = pnand %p9467_p1, %p9463_p11 }
 0x5c6   : > { %9471 = shalt.err (!%p9468_p3)
}
 0x5c7   : > { %9214 = dma.vmem_to_hbm [thread:$0]  (%p11219_p4), %s7997_s2, 256, %s7994_s29, %s7982_s24  }
 0x5c8 PF: > { %p9237_p10 = scmp.ge.s32.totalorder %s9574_s25, 2  ;;  %s8008_s1 = sand.u32 1, %s9534_s15  }
 0x5c9   : > { %p11220_p2 = scmp.ne.s32.totalorder %s11202_s18, 0  ;;  %s8009_s30 = scalar_lea.sflag [#allocation5], %s8008_s1 }
 0x5cb   : > { %p9231_p6 = pnand %p9237_p10, %p11220_p2 }
 0x5cd   : > { %p9232_p12 = pneg %p9231_p6 }
 0x5cf   : > { %9529 = dma.done.wait (%p9232_p12), %s8009_s30, 256  }
 0x5d0   : > { %9531 = vsyncadd (%p9232_p12), %s8009_s30, 4294967040  ;;  %s24_s25 = sadd.s32 1, %s9574_s25   ;;  %s11221_s21 = sld [smem:[#allocation18_spill]] }
 0x5d1   : > { %p21_p13 = scmp.ge.s32.totalorder %s24_s25, 6   ;;  %s11222_s28 = sld [smem:[#allocation19_spill]] }
 0x5d2   : > { %s11223_s23 = sld [smem:[#allocation20_spill]]  ;;  %s11225_s15 = smov %s9538_s16 }
 0x5d3   : > { %s11224_s24 = sld [smem:[#allocation21_spill]]  ;;  %s11226_s16 = smov %s9542_s17 }
 0x5d4   : > { %s11227_s17 = smov %s9744_s4  ;;  %s11228_s18 = smov %s9550_s19 }
 0x5d5   : > { %s11229_s19 = smov %s9554_s20  ;;  %s11230_s20 = smov %s9702_s22 }
 0x5d6   :  { %23 = sbr.rel (!%p21_p13) target bundleno = 17 (0x11), region = 118 }
 0x5d7   : > { %s11231_s22 = smov %s11222_s28 }
 0x5db   :  { %8014 = vsyncpa [#allocation4], 1 }
 0x5dc   :  { %8016 = vsyncpa [#allocation4 + $0x1], 1 }
 0x5dd   :  { %8017 = vsyncpa [#allocation7], 1 }
 0x5de   :  { %8019 = vsyncpa [#allocation7 + $0x1], 1 }
 0x5df   :  { %8020 = vsyncpa [#allocation10], 1 }
 0x5e0   :  { %8022 = vsyncpa [#allocation10 + $0x1], 1 }
 0x5e1   :  { %8023 = vsyncpa [#allocation5], 1 }
 0x5e2   :  { %8025 = vsyncpa [#allocation5 + $0x1], 1 }

</bundles_post_ra>
